<compile_context>
chip_gen: v7x
topology: tpu7x:2x2x1
jax: 0.10.0
libtpu: 0.0.40
codegen_flags: <defaults>
</compile_context>

<pallas_src>
import functools

import jax
import jax.numpy as jnp
import numpy as np
from jax.experimental import pallas as pl
from jax.experimental.pallas import tpu as pltpu  # noqa: F401  (TPU backend)

EPS = 1e-5

# Fixed WDCNN architecture (from the PyTorch module).
B1_KERNEL, B1_STRIDE, B1_PAD = 64, 16, 24
BLOCK_PADS_2_TO_5 = [1, 1, 1, 0]          # b2..b5 are k=3, s=1 convs


# --------------------- host-side structural constants (numpy) ---------------------

def _pool_select(N, Lout):
    """0/1 matrices selecting even / odd length positions (MaxPool1d(2,2))."""
    Lh = Lout // 2
    rows = np.arange(N * Lh)
    n, m = rows // Lh, rows % Lh
    cols = np.arange(N * Lout)
    E = (cols[None, :] == (n * Lout + 2 * m)[:, None]).astype(np.float32)
    O = (cols[None, :] == (n * Lout + 2 * m + 1)[:, None]).astype(np.float32)
    return E, O, Lh


def _shift_select(N, Lin, pad):
    """k=3,s=1 conv: 3 matrices mapping output row (n,l) -> input row (n,l+d-pad),
    zero rows where the tap lands in the zero padding (never crosses batches)."""
    Lout = Lin + 2 * pad - 2
    rows = np.arange(N * Lout)
    n, l = rows // Lout, rows % Lout
    cols = np.arange(N * Lin)
    mats = []
    for d in range(3):
        src = l + d - pad
        valid = (src >= 0) & (src < Lin)
        tgt = n * Lin + np.clip(src, 0, Lin - 1)
        S = ((cols[None, :] == tgt[:, None]) & valid[:, None]).astype(np.float32)
        mats.append(S)
    return mats, Lout


def build_structs(N, in_channels, L):
    s = {}
    # block 1 im2col geometry (gather indices into the zero-padded raw input)
    Lp = L + 2 * B1_PAD
    Lout1 = (Lp - B1_KERNEL) // B1_STRIDE + 1
    idx1 = np.arange(Lout1)[:, None] * B1_STRIDE + np.arange(B1_KERNEL)[None, :]
    s["idx1"] = idx1.astype(np.int32)
    pos = idx1 - B1_PAD
    s["mask1"] = np.tile(((pos >= 0) & (pos < L)).astype(np.float32), (N, 1))
    E, O, Lh = _pool_select(N, Lout1)
    s["E1"], s["O1"] = E, O

    Lin = Lh
    for i, pad in enumerate(BLOCK_PADS_2_TO_5, start=2):
        mats, Lout = _shift_select(N, Lin, pad)
        for d in range(3):
            s[f"S{i}_{d}"] = mats[d]
        E, O, Lh = _pool_select(N, Lout)
        s[f"E{i}"], s[f"O{i}"] = E, O
        Lin = Lh

    s["Lf"] = Lin            # final per-sample length (3 for L=2048)
    s["Lout1"] = Lout1
    for l in range(Lin):     # fc: pick length-position l of every sample
        R = np.zeros((N, N * Lin), np.float32)
        R[np.arange(N), np.arange(N) * Lin + l] = 1.0
        s[f"R{l}"] = R
    return s


# ------------------------------- the fused kernel -------------------------------

def _make_kernel(names, in_channels, Lf):
    names = tuple(names)

    def _bn_pool_relu(y, gamma, beta, E, O):
        # training-mode BatchNorm1d (biased batch variance) folded to an affine,
        # MaxPool1d(2,2) via even/odd row selection matmuls, then ReLU.
        m = jnp.mean(y, axis=0, keepdims=True)
        d = y - m
        v = jnp.mean(d * d, axis=0, keepdims=True)
        sc = gamma / jnp.sqrt(v + EPS)
        sh = beta - m * sc
        even = jnp.dot(E, y, preferred_element_type=jnp.float32)
        odd = jnp.dot(O, y, preferred_element_type=jnp.float32)
        return jnp.maximum(jnp.maximum(even * sc + sh, odd * sc + sh), 0.0)

    def kernel(*refs):
        out_ref = refs[-1]
        r = dict(zip(names, refs[:-1]))

        # ---- b1 conv (k=64,s=16,p=24, no bias) with the b0 BatchNorm folded onto
        #      the raw im2col patches; padding taps re-zeroed by mask1 ----
        mask = r["mask1"][...]
        y = None
        for c in range(in_channels):
            xc = r[f"x_cl_{c}"][...]                       # (1, N*L) lane-dense
            m0 = jnp.mean(xc, axis=1, keepdims=True)       # (1,1) batch mean
            d0 = xc - m0
            v0 = jnp.mean(d0 * d0, axis=1, keepdims=True)  # biased variance
            sc0 = r[f"g0_{c}"][...] / jnp.sqrt(v0 + EPS)   # (1,1)
            sh0 = r[f"be0_{c}"][...] - m0 * sc0            # (1,1)
            p = r[f"p1_{c}"][...]                          # (N*Lout1, 64)
            pbn = (p * sc0 + sh0) * mask
            t = jnp.dot(pbn, r[f"w1_{c}"][...], preferred_element_type=jnp.float32)
            y = t if y is None else y + t                  # (N*Lout1, 16)

        a = _bn_pool_relu(y, r["g1"][...], r["be1"][...], r["E1"][...], r["O1"][...])

        # ---- b2..b5: k=3,s=1 conv = 3 row-shift matmuls + weight matmuls ----
        for i in range(2, 6):
            y = None
            for d in range(3):
                xd = jnp.dot(r[f"S{i}_{d}"][...], a, preferred_element_type=jnp.float32)
                t = jnp.dot(xd, r[f"w{i}_{d}"][...], preferred_element_type=jnp.float32)
                y = t if y is None else y + t
            a = _bn_pool_relu(y, r[f"g{i}"][...], r[f"be{i}"][...],
                              r[f"E{i}"][...], r[f"O{i}"][...])

        # ---- fc on the channel-major view(-1, 64*Lf):
        #      logits[n,o] = sum_l (row_l(a) @ V_l)[n,o] + b[o] ----
        acc = None
        for l in range(Lf):
            row = jnp.dot(r[f"R{l}"][...], a, preferred_element_type=jnp.float32)
            t = jnp.dot(row, r[f"V{l}"][...], preferred_element_type=jnp.float32)
            acc = t if acc is None else acc + t
        out_ref[...] = acc + r["fcb"][...]

    return kernel


# ----------------------------------- wrapper -----------------------------------

def _full_spec(shape):
    return pl.BlockSpec(shape, lambda i, _n=len(shape): (0,) * _n)


def wdcnn_forward(x, params, structs):
    N, Cin, L = x.shape
    Lout1 = structs["Lout1"]
    Lf = structs["Lf"]
    n_class = params["fc_b"].shape[0]

    names, inputs = [], []

    def add(name, arr):
        names.append(name)
        inputs.append(jnp.asarray(arr, jnp.float32))

    # b0 inputs: raw per-channel signals (lane-dense) + BN affine params
    for c in range(Cin):
        add(f"x_cl_{c}", x[:, c, :].reshape(1, N * L))
        add(f"g0_{c}", params["b0_gamma"][c].reshape(1, 1))
        add(f"be0_{c}", params["b0_beta"][c].reshape(1, 1))

    # block 1: im2col of the RAW zero-padded input (pure gather) + mask + weights
    xp = jnp.pad(x, ((0, 0), (0, 0), (B1_PAD, B1_PAD)))
    patches = xp[:, :, structs["idx1"]]                    # (N, Cin, Lout1, 64)
    add("mask1", structs["mask1"])
    w1 = params["b1"]["w"]                                 # (16, Cin, 64)
    for c in range(Cin):
        add(f"p1_{c}", patches[:, c].reshape(N * Lout1, B1_KERNEL))
        add(f"w1_{c}", jnp.transpose(w1[:, c, :]))         # (64, 16)
    add("g1", params["b1"]["gamma"].reshape(1, -1))
    add("be1", params["b1"]["beta"].reshape(1, -1))
    add("E1", structs["E1"])
    add("O1", structs["O1"])

    # blocks 2..5
    for i in range(2, 6):
        blk = params[f"b{i}"]
        w = blk["w"]                                       # (Cout, Cin_i, 3)
        for d in range(3):
            add(f"S{i}_{d}", structs[f"S{i}_{d}"])
            add(f"w{i}_{d}", jnp.transpose(w[:, :, d]))    # (Cin_i, Cout)
        add(f"g{i}", blk["gamma"].reshape(1, -1))
        add(f"be{i}", blk["beta"].reshape(1, -1))
        add(f"E{i}", structs[f"E{i}"])
        add(f"O{i}", structs[f"O{i}"])

    # fc (PyTorch view(-1, 64*Lf) is channel-major: feature index = c*Lf + l)
    fcw3 = params["fc_w"].reshape(n_class, -1, Lf)         # (n_class, 64, Lf)
    for l in range(Lf):
        add(f"R{l}", structs[f"R{l}"])
        add(f"V{l}", jnp.transpose(fcw3[:, :, l]))         # (64, n_class)
    add("fcb", params["fc_b"].reshape(1, n_class))

    kernel = _make_kernel(names, Cin, Lf)
    return pl.pallas_call(
        kernel,
        grid=(1,),
        in_specs=[_full_spec(a.shape) for a in inputs],
        out_specs=_full_spec((N, n_class)),
        out_shape=jax.ShapeDtypeStruct((N, n_class), jnp.float32),
    )(*inputs)


# ------------------------------- params & main -------------------------------

def init_params(key, in_channels, n_class):
    keys = jax.random.split(key, 20)

    def nrm(k, shape, s=0.1):
        return s * jax.random.normal(k, shape, jnp.float32)

    params = {
        "b0_gamma": 1.0 + nrm(keys[0], (in_channels,)),
        "b0_beta": nrm(keys[1], (in_channels,)),
    }
    specs = [
        (in_channels, 16, 64),
        (16, 32, 3),
        (32, 64, 3),
        (64, 64, 3),
        (64, 64, 3),
    ]
    ki = 2
    for i, (cin, cout, k) in enumerate(specs, start=1):
        params[f"b{i}"] = {
            "w": nrm(keys[ki], (cout, cin, k)),
            "gamma": 1.0 + nrm(keys[ki + 1], (cout,)),
            "beta": nrm(keys[ki + 2], (cout,)),
        }
        ki += 3
    params["fc_w"] = nrm(keys[ki], (n_class, 64 * 3))
    params["fc_b"] = nrm(keys[ki + 1], (n_class,))
    return params


if __name__ == "__main__":
    in_channels, n_class = 2, 10
    batch, length = 2, 2048  # length 2048 is the minimum that yields n_features = 64*3

    key = jax.random.PRNGKey(0)
    kx, kp = jax.random.split(key)
    x = jax.random.normal(kx, (batch, in_channels, length), jnp.float32)
    params = init_params(kp, in_channels, n_class)

    structs = build_structs(batch, in_channels, length)
    assert 64 * structs["Lf"] == params["fc_w"].shape[1]

    fwd = jax.jit(functools.partial(wdcnn_forward, structs=structs))
    out = jax.block_until_ready(fwd(x, params))

    assert out.shape == (batch, n_class), out.shape
    assert bool(jnp.all(jnp.isfinite(out)))
    print("KERNEL_OK")
</pallas_src>

<mosaic_0001>
module attributes {stable_mosaic.version = 11 : i64} {
  func.func @kernel(%arg0: i32, %arg1: memref<1x4096xf32, #tpu.memory_space<vmem>>, %arg2: memref<1x1xf32, #tpu.memory_space<vmem>>, %arg3: memref<1x1xf32, #tpu.memory_space<vmem>>, %arg4: memref<1x4096xf32, #tpu.memory_space<vmem>>, %arg5: memref<1x1xf32, #tpu.memory_space<vmem>>, %arg6: memref<1x1xf32, #tpu.memory_space<vmem>>, %arg7: memref<256x64xf32, #tpu.memory_space<vmem>>, %arg8: memref<256x64xf32, #tpu.memory_space<vmem>>, %arg9: memref<64x16xf32, #tpu.memory_space<vmem>>, %arg10: memref<256x64xf32, #tpu.memory_space<vmem>>, %arg11: memref<64x16xf32, #tpu.memory_space<vmem>>, %arg12: memref<1x16xf32, #tpu.memory_space<vmem>>, %arg13: memref<1x16xf32, #tpu.memory_space<vmem>>, %arg14: memref<128x256xf32, #tpu.memory_space<vmem>>, %arg15: memref<128x256xf32, #tpu.memory_space<vmem>>, %arg16: memref<128x128xf32, #tpu.memory_space<vmem>>, %arg17: memref<16x32xf32, #tpu.memory_space<vmem>>, %arg18: memref<128x128xf32, #tpu.memory_space<vmem>>, %arg19: memref<16x32xf32, #tpu.memory_space<vmem>>, %arg20: memref<128x128xf32, #tpu.memory_space<vmem>>, %arg21: memref<16x32xf32, #tpu.memory_space<vmem>>, %arg22: memref<1x32xf32, #tpu.memory_space<vmem>>, %arg23: memref<1x32xf32, #tpu.memory_space<vmem>>, %arg24: memref<64x128xf32, #tpu.memory_space<vmem>>, %arg25: memref<64x128xf32, #tpu.memory_space<vmem>>, %arg26: memref<64x64xf32, #tpu.memory_space<vmem>>, %arg27: memref<32x64xf32, #tpu.memory_space<vmem>>, %arg28: memref<64x64xf32, #tpu.memory_space<vmem>>, %arg29: memref<32x64xf32, #tpu.memory_space<vmem>>, %arg30: memref<64x64xf32, #tpu.memory_space<vmem>>, %arg31: memref<32x64xf32, #tpu.memory_space<vmem>>, %arg32: memref<1x64xf32, #tpu.memory_space<vmem>>, %arg33: memref<1x64xf32, #tpu.memory_space<vmem>>, %arg34: memref<32x64xf32, #tpu.memory_space<vmem>>, %arg35: memref<32x64xf32, #tpu.memory_space<vmem>>, %arg36: memref<32x32xf32, #tpu.memory_space<vmem>>, %arg37: memref<64x64xf32, #tpu.memory_space<vmem>>, %arg38: memref<32x32xf32, #tpu.memory_space<vmem>>, %arg39: memref<64x64xf32, #tpu.memory_space<vmem>>, %arg40: memref<32x32xf32, #tpu.memory_space<vmem>>, %arg41: memref<64x64xf32, #tpu.memory_space<vmem>>, %arg42: memref<1x64xf32, #tpu.memory_space<vmem>>, %arg43: memref<1x64xf32, #tpu.memory_space<vmem>>, %arg44: memref<16x32xf32, #tpu.memory_space<vmem>>, %arg45: memref<16x32xf32, #tpu.memory_space<vmem>>, %arg46: memref<12x16xf32, #tpu.memory_space<vmem>>, %arg47: memref<64x64xf32, #tpu.memory_space<vmem>>, %arg48: memref<12x16xf32, #tpu.memory_space<vmem>>, %arg49: memref<64x64xf32, #tpu.memory_space<vmem>>, %arg50: memref<12x16xf32, #tpu.memory_space<vmem>>, %arg51: memref<64x64xf32, #tpu.memory_space<vmem>>, %arg52: memref<1x64xf32, #tpu.memory_space<vmem>>, %arg53: memref<1x64xf32, #tpu.memory_space<vmem>>, %arg54: memref<6x12xf32, #tpu.memory_space<vmem>>, %arg55: memref<6x12xf32, #tpu.memory_space<vmem>>, %arg56: memref<2x6xf32, #tpu.memory_space<vmem>>, %arg57: memref<64x10xf32, #tpu.memory_space<vmem>>, %arg58: memref<2x6xf32, #tpu.memory_space<vmem>>, %arg59: memref<64x10xf32, #tpu.memory_space<vmem>>, %arg60: memref<2x6xf32, #tpu.memory_space<vmem>>, %arg61: memref<64x10xf32, #tpu.memory_space<vmem>>, %arg62: memref<1x10xf32, #tpu.memory_space<vmem>>, %arg63: memref<2x10xf32, #tpu.memory_space<vmem>>) attributes {dimension_semantics = [#tpu.dimension_semantics<arbitrary>], iteration_bounds = array<i64: 1>, scalar_prefetch = 0 : i64, scratch_operands = 0 : i64, tpu.core_type = #tpu.core_type<tc>, window_params = [{pipeline_mode = #tpu.pipeline_mode<synchronous>, transform_indices = @transform_0, window_bounds = array<i64: 1, 4096>}, {pipeline_mode = #tpu.pipeline_mode<synchronous>, transform_indices = @transform_1, window_bounds = array<i64: 1, 1>}, {pipeline_mode = #tpu.pipeline_mode<synchronous>, transform_indices = @transform_2, window_bounds = array<i64: 1, 1>}, {pipeline_mode = #tpu.pipeline_mode<synchronous>, transform_indices = @transform_3, window_bounds = array<i64: 1, 4096>}, {pipeline_mode = #tpu.pipeline_mode<synchronous>, transform_indices = @transform_4, window_bounds = array<i64: 1, 1>}, {pipeline_mode = #tpu.pipeline_mode<synchronous>, transform_indices = @transform_5, window_bounds = array<i64: 1, 1>}, {pipeline_mode = #tpu.pipeline_mode<synchronous>, transform_indices = @transform_6, window_bounds = array<i64: 256, 64>}, {pipeline_mode = #tpu.pipeline_mode<synchronous>, transform_indices = @transform_7, window_bounds = array<i64: 256, 64>}, {pipeline_mode = #tpu.pipeline_mode<synchronous>, transform_indices = @transform_8, window_bounds = array<i64: 64, 16>}, {pipeline_mode = #tpu.pipeline_mode<synchronous>, transform_indices = @transform_9, window_bounds = array<i64: 256, 64>}, {pipeline_mode = #tpu.pipeline_mode<synchronous>, transform_indices = @transform_10, window_bounds = array<i64: 64, 16>}, {pipeline_mode = #tpu.pipeline_mode<synchronous>, transform_indices = @transform_11, window_bounds = array<i64: 1, 16>}, {pipeline_mode = #tpu.pipeline_mode<synchronous>, transform_indices = @transform_12, window_bounds = array<i64: 1, 16>}, {pipeline_mode = #tpu.pipeline_mode<synchronous>, transform_indices = @transform_13, window_bounds = array<i64: 128, 256>}, {pipeline_mode = #tpu.pipeline_mode<synchronous>, transform_indices = @transform_14, window_bounds = array<i64: 128, 256>}, {pipeline_mode = #tpu.pipeline_mode<synchronous>, transform_indices = @transform_15, window_bounds = array<i64: 128, 128>}, {pipeline_mode = #tpu.pipeline_mode<synchronous>, transform_indices = @transform_16, window_bounds = array<i64: 16, 32>}, {pipeline_mode = #tpu.pipeline_mode<synchronous>, transform_indices = @transform_17, window_bounds = array<i64: 128, 128>}, {pipeline_mode = #tpu.pipeline_mode<synchronous>, transform_indices = @transform_18, window_bounds = array<i64: 16, 32>}, {pipeline_mode = #tpu.pipeline_mode<synchronous>, transform_indices = @transform_19, window_bounds = array<i64: 128, 128>}, {pipeline_mode = #tpu.pipeline_mode<synchronous>, transform_indices = @transform_20, window_bounds = array<i64: 16, 32>}, {pipeline_mode = #tpu.pipeline_mode<synchronous>, transform_indices = @transform_21, window_bounds = array<i64: 1, 32>}, {pipeline_mode = #tpu.pipeline_mode<synchronous>, transform_indices = @transform_22, window_bounds = array<i64: 1, 32>}, {pipeline_mode = #tpu.pipeline_mode<synchronous>, transform_indices = @transform_23, window_bounds = array<i64: 64, 128>}, {pipeline_mode = #tpu.pipeline_mode<synchronous>, transform_indices = @transform_24, window_bounds = array<i64: 64, 128>}, {pipeline_mode = #tpu.pipeline_mode<synchronous>, transform_indices = @transform_25, window_bounds = array<i64: 64, 64>}, {pipeline_mode = #tpu.pipeline_mode<synchronous>, transform_indices = @transform_26, window_bounds = array<i64: 32, 64>}, {pipeline_mode = #tpu.pipeline_mode<synchronous>, transform_indices = @transform_27, window_bounds = array<i64: 64, 64>}, {pipeline_mode = #tpu.pipeline_mode<synchronous>, transform_indices = @transform_28, window_bounds = array<i64: 32, 64>}, {pipeline_mode = #tpu.pipeline_mode<synchronous>, transform_indices = @transform_29, window_bounds = array<i64: 64, 64>}, {pipeline_mode = #tpu.pipeline_mode<synchronous>, transform_indices = @transform_30, window_bounds = array<i64: 32, 64>}, {pipeline_mode = #tpu.pipeline_mode<synchronous>, transform_indices = @transform_31, window_bounds = array<i64: 1, 64>}, {pipeline_mode = #tpu.pipeline_mode<synchronous>, transform_indices = @transform_32, window_bounds = array<i64: 1, 64>}, {pipeline_mode = #tpu.pipeline_mode<synchronous>, transform_indices = @transform_33, window_bounds = array<i64: 32, 64>}, {pipeline_mode = #tpu.pipeline_mode<synchronous>, transform_indices = @transform_34, window_bounds = array<i64: 32, 64>}, {pipeline_mode = #tpu.pipeline_mode<synchronous>, transform_indices = @transform_35, window_bounds = array<i64: 32, 32>}, {pipeline_mode = #tpu.pipeline_mode<synchronous>, transform_indices = @transform_36, window_bounds = array<i64: 64, 64>}, {pipeline_mode = #tpu.pipeline_mode<synchronous>, transform_indices = @transform_37, window_bounds = array<i64: 32, 32>}, {pipeline_mode = #tpu.pipeline_mode<synchronous>, transform_indices = @transform_38, window_bounds = array<i64: 64, 64>}, {pipeline_mode = #tpu.pipeline_mode<synchronous>, transform_indices = @transform_39, window_bounds = array<i64: 32, 32>}, {pipeline_mode = #tpu.pipeline_mode<synchronous>, transform_indices = @transform_40, window_bounds = array<i64: 64, 64>}, {pipeline_mode = #tpu.pipeline_mode<synchronous>, transform_indices = @transform_41, window_bounds = array<i64: 1, 64>}, {pipeline_mode = #tpu.pipeline_mode<synchronous>, transform_indices = @transform_42, window_bounds = array<i64: 1, 64>}, {pipeline_mode = #tpu.pipeline_mode<synchronous>, transform_indices = @transform_43, window_bounds = array<i64: 16, 32>}, {pipeline_mode = #tpu.pipeline_mode<synchronous>, transform_indices = @transform_44, window_bounds = array<i64: 16, 32>}, {pipeline_mode = #tpu.pipeline_mode<synchronous>, transform_indices = @transform_45, window_bounds = array<i64: 12, 16>}, {pipeline_mode = #tpu.pipeline_mode<synchronous>, transform_indices = @transform_46, window_bounds = array<i64: 64, 64>}, {pipeline_mode = #tpu.pipeline_mode<synchronous>, transform_indices = @transform_47, window_bounds = array<i64: 12, 16>}, {pipeline_mode = #tpu.pipeline_mode<synchronous>, transform_indices = @transform_48, window_bounds = array<i64: 64, 64>}, {pipeline_mode = #tpu.pipeline_mode<synchronous>, transform_indices = @transform_49, window_bounds = array<i64: 12, 16>}, {pipeline_mode = #tpu.pipeline_mode<synchronous>, transform_indices = @transform_50, window_bounds = array<i64: 64, 64>}, {pipeline_mode = #tpu.pipeline_mode<synchronous>, transform_indices = @transform_51, window_bounds = array<i64: 1, 64>}, {pipeline_mode = #tpu.pipeline_mode<synchronous>, transform_indices = @transform_52, window_bounds = array<i64: 1, 64>}, {pipeline_mode = #tpu.pipeline_mode<synchronous>, transform_indices = @transform_53, window_bounds = array<i64: 6, 12>}, {pipeline_mode = #tpu.pipeline_mode<synchronous>, transform_indices = @transform_54, window_bounds = array<i64: 6, 12>}, {pipeline_mode = #tpu.pipeline_mode<synchronous>, transform_indices = @transform_55, window_bounds = array<i64: 2, 6>}, {pipeline_mode = #tpu.pipeline_mode<synchronous>, transform_indices = @transform_56, window_bounds = array<i64: 64, 10>}, {pipeline_mode = #tpu.pipeline_mode<synchronous>, transform_indices = @transform_57, window_bounds = array<i64: 2, 6>}, {pipeline_mode = #tpu.pipeline_mode<synchronous>, transform_indices = @transform_58, window_bounds = array<i64: 64, 10>}, {pipeline_mode = #tpu.pipeline_mode<synchronous>, transform_indices = @transform_59, window_bounds = array<i64: 2, 6>}, {pipeline_mode = #tpu.pipeline_mode<synchronous>, transform_indices = @transform_60, window_bounds = array<i64: 64, 10>}, {pipeline_mode = #tpu.pipeline_mode<synchronous>, transform_indices = @transform_61, window_bounds = array<i64: 1, 10>}, {pipeline_mode = #tpu.pipeline_mode<synchronous>, transform_indices = @transform_62, window_bounds = array<i64: 2, 10>}]} {
    %c0 = arith.constant 0 : index
    %c0_0 = arith.constant 0 : index
    %0 = vector.load %arg7[%c0, %c0_0] : memref<256x64xf32, #tpu.memory_space<vmem>>, vector<256x64xf32>
    %c0_1 = arith.constant 0 : index
    %c0_2 = arith.constant 0 : index
    %1 = vector.load %arg1[%c0_1, %c0_2] : memref<1x4096xf32, #tpu.memory_space<vmem>>, vector<1x4096xf32>
    %cst = arith.constant dense<0.000000e+00> : vector<1xf32>
    %2 = vector.multi_reduction <add>, %1, %cst [1] : vector<1x4096xf32> to vector<1xf32>
    %3 = vector.shape_cast %2 : vector<1xf32> to vector<1x1xf32>
    %cst_3 = arith.constant 4.096000e+03 : f32
    %4 = vector.broadcast %cst_3 : f32 to vector<1x1xf32>
    %5 = arith.divf %3, %4 : vector<1x1xf32>
    %6 = vector.broadcast %5 : vector<1x1xf32> to vector<1x4096xf32>
    %7 = arith.subf %1, %6 : vector<1x4096xf32>
    %8 = arith.mulf %7, %7 : vector<1x4096xf32>
    %cst_4 = arith.constant dense<0.000000e+00> : vector<1xf32>
    %9 = vector.multi_reduction <add>, %8, %cst_4 [1] : vector<1x4096xf32> to vector<1xf32>
    %10 = vector.shape_cast %9 : vector<1xf32> to vector<1x1xf32>
    %cst_5 = arith.constant 4.096000e+03 : f32
    %11 = vector.broadcast %cst_5 : f32 to vector<1x1xf32>
    %12 = arith.divf %10, %11 : vector<1x1xf32>
    %c0_6 = arith.constant 0 : index
    %c0_7 = arith.constant 0 : index
    %13 = vector.load %arg2[%c0_6, %c0_7] : memref<1x1xf32, #tpu.memory_space<vmem>>, vector<1x1xf32>
    %cst_8 = arith.constant 9.99999974E-6 : f32
    %14 = vector.broadcast %cst_8 : f32 to vector<1x1xf32>
    %15 = arith.addf %12, %14 : vector<1x1xf32>
    %16 = math.sqrt %15 : vector<1x1xf32>
    %17 = arith.divf %13, %16 : vector<1x1xf32>
    %c0_9 = arith.constant 0 : index
    %c0_10 = arith.constant 0 : index
    %18 = vector.load %arg3[%c0_9, %c0_10] : memref<1x1xf32, #tpu.memory_space<vmem>>, vector<1x1xf32>
    %19 = arith.mulf %5, %17 : vector<1x1xf32>
    %20 = arith.subf %18, %19 : vector<1x1xf32>
    %c0_11 = arith.constant 0 : index
    %c0_12 = arith.constant 0 : index
    %21 = vector.load %arg8[%c0_11, %c0_12] : memref<256x64xf32, #tpu.memory_space<vmem>>, vector<256x64xf32>
    %22 = vector.broadcast %17 : vector<1x1xf32> to vector<256x64xf32>
    %23 = arith.mulf %21, %22 : vector<256x64xf32>
    %24 = vector.broadcast %20 : vector<1x1xf32> to vector<256x64xf32>
    %25 = arith.addf %23, %24 : vector<256x64xf32>
    %26 = arith.mulf %25, %0 : vector<256x64xf32>
    %c0_13 = arith.constant 0 : index
    %c0_14 = arith.constant 0 : index
    %27 = vector.load %arg9[%c0_13, %c0_14] : memref<64x16xf32, #tpu.memory_space<vmem>>, vector<64x16xf32>
    %cst_15 = arith.constant dense<0.000000e+00> : vector<256x16xf32>
    %28 = tpu.matmul %26, %27, %cst_15 {dimension_numbers = #tpu.dot_dimension_numbers<[1], [0], [0], [1], [0, 0, 1, 1], [], []>} : vector<256x64xf32>, vector<64x16xf32>, vector<256x16xf32> -> vector<256x16xf32>
    %c0_16 = arith.constant 0 : index
    %c0_17 = arith.constant 0 : index
    %29 = vector.load %arg4[%c0_16, %c0_17] : memref<1x4096xf32, #tpu.memory_space<vmem>>, vector<1x4096xf32>
    %cst_18 = arith.constant dense<0.000000e+00> : vector<1xf32>
    %30 = vector.multi_reduction <add>, %29, %cst_18 [1] : vector<1x4096xf32> to vector<1xf32>
    %31 = vector.shape_cast %30 : vector<1xf32> to vector<1x1xf32>
    %cst_19 = arith.constant 4.096000e+03 : f32
    %32 = vector.broadcast %cst_19 : f32 to vector<1x1xf32>
    %33 = arith.divf %31, %32 : vector<1x1xf32>
    %34 = vector.broadcast %33 : vector<1x1xf32> to vector<1x4096xf32>
    %35 = arith.subf %29, %34 : vector<1x4096xf32>
    %36 = arith.mulf %35, %35 : vector<1x4096xf32>
    %cst_20 = arith.constant dense<0.000000e+00> : vector<1xf32>
    %37 = vector.multi_reduction <add>, %36, %cst_20 [1] : vector<1x4096xf32> to vector<1xf32>
    %38 = vector.shape_cast %37 : vector<1xf32> to vector<1x1xf32>
    %cst_21 = arith.constant 4.096000e+03 : f32
    %39 = vector.broadcast %cst_21 : f32 to vector<1x1xf32>
    %40 = arith.divf %38, %39 : vector<1x1xf32>
    %c0_22 = arith.constant 0 : index
    %c0_23 = arith.constant 0 : index
    %41 = vector.load %arg5[%c0_22, %c0_23] : memref<1x1xf32, #tpu.memory_space<vmem>>, vector<1x1xf32>
    %cst_24 = arith.constant 9.99999974E-6 : f32
    %42 = vector.broadcast %cst_24 : f32 to vector<1x1xf32>
    %43 = arith.addf %40, %42 : vector<1x1xf32>
    %44 = math.sqrt %43 : vector<1x1xf32>
    %45 = arith.divf %41, %44 : vector<1x1xf32>
    %c0_25 = arith.constant 0 : index
    %c0_26 = arith.constant 0 : index
    %46 = vector.load %arg6[%c0_25, %c0_26] : memref<1x1xf32, #tpu.memory_space<vmem>>, vector<1x1xf32>
    %47 = arith.mulf %33, %45 : vector<1x1xf32>
    %48 = arith.subf %46, %47 : vector<1x1xf32>
    %c0_27 = arith.constant 0 : index
    %c0_28 = arith.constant 0 : index
    %49 = vector.load %arg10[%c0_27, %c0_28] : memref<256x64xf32, #tpu.memory_space<vmem>>, vector<256x64xf32>
    %50 = vector.broadcast %45 : vector<1x1xf32> to vector<256x64xf32>
    %51 = arith.mulf %49, %50 : vector<256x64xf32>
    %52 = vector.broadcast %48 : vector<1x1xf32> to vector<256x64xf32>
    %53 = arith.addf %51, %52 : vector<256x64xf32>
    %54 = arith.mulf %53, %0 : vector<256x64xf32>
    %c0_29 = arith.constant 0 : index
    %c0_30 = arith.constant 0 : index
    %55 = vector.load %arg11[%c0_29, %c0_30] : memref<64x16xf32, #tpu.memory_space<vmem>>, vector<64x16xf32>
    %cst_31 = arith.constant dense<0.000000e+00> : vector<256x16xf32>
    %56 = tpu.matmul %54, %55, %cst_31 {dimension_numbers = #tpu.dot_dimension_numbers<[1], [0], [0], [1], [0, 0, 1, 1], [], []>} : vector<256x64xf32>, vector<64x16xf32>, vector<256x16xf32> -> vector<256x16xf32>
    %57 = arith.addf %28, %56 : vector<256x16xf32>
    %c0_32 = arith.constant 0 : index
    %c0_33 = arith.constant 0 : index
    %58 = vector.load %arg12[%c0_32, %c0_33] : memref<1x16xf32, #tpu.memory_space<vmem>>, vector<1x16xf32>
    %c0_34 = arith.constant 0 : index
    %c0_35 = arith.constant 0 : index
    %59 = vector.load %arg13[%c0_34, %c0_35] : memref<1x16xf32, #tpu.memory_space<vmem>>, vector<1x16xf32>
    %c0_36 = arith.constant 0 : index
    %c0_37 = arith.constant 0 : index
    %60 = vector.load %arg14[%c0_36, %c0_37] : memref<128x256xf32, #tpu.memory_space<vmem>>, vector<128x256xf32>
    %c0_38 = arith.constant 0 : index
    %c0_39 = arith.constant 0 : index
    %61 = vector.load %arg15[%c0_38, %c0_39] : memref<128x256xf32, #tpu.memory_space<vmem>>, vector<128x256xf32>
    %cst_40 = arith.constant dense<0.000000e+00> : vector<16xf32>
    %62 = vector.multi_reduction <add>, %57, %cst_40 [0] : vector<256x16xf32> to vector<16xf32>
    %63 = vector.shape_cast %62 : vector<16xf32> to vector<1x16xf32>
    %cst_41 = arith.constant 2.560000e+02 : f32
    %64 = vector.broadcast %cst_41 : f32 to vector<1x16xf32>
    %65 = arith.divf %63, %64 : vector<1x16xf32>
    %66 = vector.broadcast %65 : vector<1x16xf32> to vector<256x16xf32>
    %67 = arith.subf %57, %66 : vector<256x16xf32>
    %68 = arith.mulf %67, %67 : vector<256x16xf32>
    %cst_42 = arith.constant dense<0.000000e+00> : vector<16xf32>
    %69 = vector.multi_reduction <add>, %68, %cst_42 [0] : vector<256x16xf32> to vector<16xf32>
    %70 = vector.shape_cast %69 : vector<16xf32> to vector<1x16xf32>
    %cst_43 = arith.constant 2.560000e+02 : f32
    %71 = vector.broadcast %cst_43 : f32 to vector<1x16xf32>
    %72 = arith.divf %70, %71 : vector<1x16xf32>
    %cst_44 = arith.constant 9.99999974E-6 : f32
    %73 = vector.broadcast %cst_44 : f32 to vector<1x16xf32>
    %74 = arith.addf %72, %73 : vector<1x16xf32>
    %75 = math.sqrt %74 : vector<1x16xf32>
    %76 = arith.divf %58, %75 : vector<1x16xf32>
    %77 = arith.mulf %65, %76 : vector<1x16xf32>
    %78 = arith.subf %59, %77 : vector<1x16xf32>
    %cst_45 = arith.constant dense<0.000000e+00> : vector<128x16xf32>
    %79 = tpu.matmul %60, %57, %cst_45 {dimension_numbers = #tpu.dot_dimension_numbers<[1], [0], [0], [1], [0, 0, 1, 1], [], []>} : vector<128x256xf32>, vector<256x16xf32>, vector<128x16xf32> -> vector<128x16xf32>
    %cst_46 = arith.constant dense<0.000000e+00> : vector<128x16xf32>
    %80 = tpu.matmul %61, %57, %cst_46 {dimension_numbers = #tpu.dot_dimension_numbers<[1], [0], [0], [1], [0, 0, 1, 1], [], []>} : vector<128x256xf32>, vector<256x16xf32>, vector<128x16xf32> -> vector<128x16xf32>
    %81 = vector.broadcast %76 : vector<1x16xf32> to vector<128x16xf32>
    %82 = arith.mulf %79, %81 : vector<128x16xf32>
    %83 = vector.broadcast %78 : vector<1x16xf32> to vector<128x16xf32>
    %84 = arith.addf %82, %83 : vector<128x16xf32>
    %85 = vector.broadcast %76 : vector<1x16xf32> to vector<128x16xf32>
    %86 = arith.mulf %80, %85 : vector<128x16xf32>
    %87 = vector.broadcast %78 : vector<1x16xf32> to vector<128x16xf32>
    %88 = arith.addf %86, %87 : vector<128x16xf32>
    %89 = arith.maximumf %84, %88 : vector<128x16xf32>
    %cst_47 = arith.constant 0.000000e+00 : f32
    %90 = vector.broadcast %cst_47 : f32 to vector<128x16xf32>
    %91 = arith.maximumf %89, %90 : vector<128x16xf32>
    %c0_48 = arith.constant 0 : index
    %c0_49 = arith.constant 0 : index
    %92 = vector.load %arg16[%c0_48, %c0_49] : memref<128x128xf32, #tpu.memory_space<vmem>>, vector<128x128xf32>
    %cst_50 = arith.constant dense<0.000000e+00> : vector<128x16xf32>
    %93 = tpu.matmul %92, %91, %cst_50 {dimension_numbers = #tpu.dot_dimension_numbers<[1], [0], [0], [1], [0, 0, 1, 1], [], []>} : vector<128x128xf32>, vector<128x16xf32>, vector<128x16xf32> -> vector<128x16xf32>
    %c0_51 = arith.constant 0 : index
    %c0_52 = arith.constant 0 : index
    %94 = vector.load %arg17[%c0_51, %c0_52] : memref<16x32xf32, #tpu.memory_space<vmem>>, vector<16x32xf32>
    %cst_53 = arith.constant dense<0.000000e+00> : vector<128x32xf32>
    %95 = tpu.matmul %93, %94, %cst_53 {dimension_numbers = #tpu.dot_dimension_numbers<[1], [0], [0], [1], [0, 0, 1, 1], [], []>} : vector<128x16xf32>, vector<16x32xf32>, vector<128x32xf32> -> vector<128x32xf32>
    %c0_54 = arith.constant 0 : index
    %c0_55 = arith.constant 0 : index
    %96 = vector.load %arg18[%c0_54, %c0_55] : memref<128x128xf32, #tpu.memory_space<vmem>>, vector<128x128xf32>
    %cst_56 = arith.constant dense<0.000000e+00> : vector<128x16xf32>
    %97 = tpu.matmul %96, %91, %cst_56 {dimension_numbers = #tpu.dot_dimension_numbers<[1], [0], [0], [1], [0, 0, 1, 1], [], []>} : vector<128x128xf32>, vector<128x16xf32>, vector<128x16xf32> -> vector<128x16xf32>
    %c0_57 = arith.constant 0 : index
    %c0_58 = arith.constant 0 : index
    %98 = vector.load %arg19[%c0_57, %c0_58] : memref<16x32xf32, #tpu.memory_space<vmem>>, vector<16x32xf32>
    %cst_59 = arith.constant dense<0.000000e+00> : vector<128x32xf32>
    %99 = tpu.matmul %97, %98, %cst_59 {dimension_numbers = #tpu.dot_dimension_numbers<[1], [0], [0], [1], [0, 0, 1, 1], [], []>} : vector<128x16xf32>, vector<16x32xf32>, vector<128x32xf32> -> vector<128x32xf32>
    %100 = arith.addf %95, %99 : vector<128x32xf32>
    %c0_60 = arith.constant 0 : index
    %c0_61 = arith.constant 0 : index
    %101 = vector.load %arg20[%c0_60, %c0_61] : memref<128x128xf32, #tpu.memory_space<vmem>>, vector<128x128xf32>
    %cst_62 = arith.constant dense<0.000000e+00> : vector<128x16xf32>
    %102 = tpu.matmul %101, %91, %cst_62 {dimension_numbers = #tpu.dot_dimension_numbers<[1], [0], [0], [1], [0, 0, 1, 1], [], []>} : vector<128x128xf32>, vector<128x16xf32>, vector<128x16xf32> -> vector<128x16xf32>
    %c0_63 = arith.constant 0 : index
    %c0_64 = arith.constant 0 : index
    %103 = vector.load %arg21[%c0_63, %c0_64] : memref<16x32xf32, #tpu.memory_space<vmem>>, vector<16x32xf32>
    %cst_65 = arith.constant dense<0.000000e+00> : vector<128x32xf32>
    %104 = tpu.matmul %102, %103, %cst_65 {dimension_numbers = #tpu.dot_dimension_numbers<[1], [0], [0], [1], [0, 0, 1, 1], [], []>} : vector<128x16xf32>, vector<16x32xf32>, vector<128x32xf32> -> vector<128x32xf32>
    %105 = arith.addf %100, %104 : vector<128x32xf32>
    %c0_66 = arith.constant 0 : index
    %c0_67 = arith.constant 0 : index
    %106 = vector.load %arg22[%c0_66, %c0_67] : memref<1x32xf32, #tpu.memory_space<vmem>>, vector<1x32xf32>
    %c0_68 = arith.constant 0 : index
    %c0_69 = arith.constant 0 : index
    %107 = vector.load %arg23[%c0_68, %c0_69] : memref<1x32xf32, #tpu.memory_space<vmem>>, vector<1x32xf32>
    %c0_70 = arith.constant 0 : index
    %c0_71 = arith.constant 0 : index
    %108 = vector.load %arg24[%c0_70, %c0_71] : memref<64x128xf32, #tpu.memory_space<vmem>>, vector<64x128xf32>
    %c0_72 = arith.constant 0 : index
    %c0_73 = arith.constant 0 : index
    %109 = vector.load %arg25[%c0_72, %c0_73] : memref<64x128xf32, #tpu.memory_space<vmem>>, vector<64x128xf32>
    %cst_74 = arith.constant dense<0.000000e+00> : vector<32xf32>
    %110 = vector.multi_reduction <add>, %105, %cst_74 [0] : vector<128x32xf32> to vector<32xf32>
    %111 = vector.shape_cast %110 : vector<32xf32> to vector<1x32xf32>
    %cst_75 = arith.constant 1.280000e+02 : f32
    %112 = vector.broadcast %cst_75 : f32 to vector<1x32xf32>
    %113 = arith.divf %111, %112 : vector<1x32xf32>
    %114 = vector.broadcast %113 : vector<1x32xf32> to vector<128x32xf32>
    %115 = arith.subf %105, %114 : vector<128x32xf32>
    %116 = arith.mulf %115, %115 : vector<128x32xf32>
    %cst_76 = arith.constant dense<0.000000e+00> : vector<32xf32>
    %117 = vector.multi_reduction <add>, %116, %cst_76 [0] : vector<128x32xf32> to vector<32xf32>
    %118 = vector.shape_cast %117 : vector<32xf32> to vector<1x32xf32>
    %cst_77 = arith.constant 1.280000e+02 : f32
    %119 = vector.broadcast %cst_77 : f32 to vector<1x32xf32>
    %120 = arith.divf %118, %119 : vector<1x32xf32>
    %cst_78 = arith.constant 9.99999974E-6 : f32
    %121 = vector.broadcast %cst_78 : f32 to vector<1x32xf32>
    %122 = arith.addf %120, %121 : vector<1x32xf32>
    %123 = math.sqrt %122 : vector<1x32xf32>
    %124 = arith.divf %106, %123 : vector<1x32xf32>
    %125 = arith.mulf %113, %124 : vector<1x32xf32>
    %126 = arith.subf %107, %125 : vector<1x32xf32>
    %cst_79 = arith.constant dense<0.000000e+00> : vector<64x32xf32>
    %127 = tpu.matmul %108, %105, %cst_79 {dimension_numbers = #tpu.dot_dimension_numbers<[1], [0], [0], [1], [0, 0, 1, 1], [], []>} : vector<64x128xf32>, vector<128x32xf32>, vector<64x32xf32> -> vector<64x32xf32>
    %cst_80 = arith.constant dense<0.000000e+00> : vector<64x32xf32>
    %128 = tpu.matmul %109, %105, %cst_80 {dimension_numbers = #tpu.dot_dimension_numbers<[1], [0], [0], [1], [0, 0, 1, 1], [], []>} : vector<64x128xf32>, vector<128x32xf32>, vector<64x32xf32> -> vector<64x32xf32>
    %129 = vector.broadcast %124 : vector<1x32xf32> to vector<64x32xf32>
    %130 = arith.mulf %127, %129 : vector<64x32xf32>
    %131 = vector.broadcast %126 : vector<1x32xf32> to vector<64x32xf32>
    %132 = arith.addf %130, %131 : vector<64x32xf32>
    %133 = vector.broadcast %124 : vector<1x32xf32> to vector<64x32xf32>
    %134 = arith.mulf %128, %133 : vector<64x32xf32>
    %135 = vector.broadcast %126 : vector<1x32xf32> to vector<64x32xf32>
    %136 = arith.addf %134, %135 : vector<64x32xf32>
    %137 = arith.maximumf %132, %136 : vector<64x32xf32>
    %cst_81 = arith.constant 0.000000e+00 : f32
    %138 = vector.broadcast %cst_81 : f32 to vector<64x32xf32>
    %139 = arith.maximumf %137, %138 : vector<64x32xf32>
    %c0_82 = arith.constant 0 : index
    %c0_83 = arith.constant 0 : index
    %140 = vector.load %arg26[%c0_82, %c0_83] : memref<64x64xf32, #tpu.memory_space<vmem>>, vector<64x64xf32>
    %cst_84 = arith.constant dense<0.000000e+00> : vector<64x32xf32>
    %141 = tpu.matmul %140, %139, %cst_84 {dimension_numbers = #tpu.dot_dimension_numbers<[1], [0], [0], [1], [0, 0, 1, 1], [], []>} : vector<64x64xf32>, vector<64x32xf32>, vector<64x32xf32> -> vector<64x32xf32>
    %c0_85 = arith.constant 0 : index
    %c0_86 = arith.constant 0 : index
    %142 = vector.load %arg27[%c0_85, %c0_86] : memref<32x64xf32, #tpu.memory_space<vmem>>, vector<32x64xf32>
    %cst_87 = arith.constant dense<0.000000e+00> : vector<64x64xf32>
    %143 = tpu.matmul %141, %142, %cst_87 {dimension_numbers = #tpu.dot_dimension_numbers<[1], [0], [0], [1], [0, 0, 1, 1], [], []>} : vector<64x32xf32>, vector<32x64xf32>, vector<64x64xf32> -> vector<64x64xf32>
    %c0_88 = arith.constant 0 : index
    %c0_89 = arith.constant 0 : index
    %144 = vector.load %arg28[%c0_88, %c0_89] : memref<64x64xf32, #tpu.memory_space<vmem>>, vector<64x64xf32>
    %cst_90 = arith.constant dense<0.000000e+00> : vector<64x32xf32>
    %145 = tpu.matmul %144, %139, %cst_90 {dimension_numbers = #tpu.dot_dimension_numbers<[1], [0], [0], [1], [0, 0, 1, 1], [], []>} : vector<64x64xf32>, vector<64x32xf32>, vector<64x32xf32> -> vector<64x32xf32>
    %c0_91 = arith.constant 0 : index
    %c0_92 = arith.constant 0 : index
    %146 = vector.load %arg29[%c0_91, %c0_92] : memref<32x64xf32, #tpu.memory_space<vmem>>, vector<32x64xf32>
    %cst_93 = arith.constant dense<0.000000e+00> : vector<64x64xf32>
    %147 = tpu.matmul %145, %146, %cst_93 {dimension_numbers = #tpu.dot_dimension_numbers<[1], [0], [0], [1], [0, 0, 1, 1], [], []>} : vector<64x32xf32>, vector<32x64xf32>, vector<64x64xf32> -> vector<64x64xf32>
    %148 = arith.addf %143, %147 : vector<64x64xf32>
    %c0_94 = arith.constant 0 : index
    %c0_95 = arith.constant 0 : index
    %149 = vector.load %arg30[%c0_94, %c0_95] : memref<64x64xf32, #tpu.memory_space<vmem>>, vector<64x64xf32>
    %cst_96 = arith.constant dense<0.000000e+00> : vector<64x32xf32>
    %150 = tpu.matmul %149, %139, %cst_96 {dimension_numbers = #tpu.dot_dimension_numbers<[1], [0], [0], [1], [0, 0, 1, 1], [], []>} : vector<64x64xf32>, vector<64x32xf32>, vector<64x32xf32> -> vector<64x32xf32>
    %c0_97 = arith.constant 0 : index
    %c0_98 = arith.constant 0 : index
    %151 = vector.load %arg31[%c0_97, %c0_98] : memref<32x64xf32, #tpu.memory_space<vmem>>, vector<32x64xf32>
    %cst_99 = arith.constant dense<0.000000e+00> : vector<64x64xf32>
    %152 = tpu.matmul %150, %151, %cst_99 {dimension_numbers = #tpu.dot_dimension_numbers<[1], [0], [0], [1], [0, 0, 1, 1], [], []>} : vector<64x32xf32>, vector<32x64xf32>, vector<64x64xf32> -> vector<64x64xf32>
    %153 = arith.addf %148, %152 : vector<64x64xf32>
    %c0_100 = arith.constant 0 : index
    %c0_101 = arith.constant 0 : index
    %154 = vector.load %arg32[%c0_100, %c0_101] : memref<1x64xf32, #tpu.memory_space<vmem>>, vector<1x64xf32>
    %c0_102 = arith.constant 0 : index
    %c0_103 = arith.constant 0 : index
    %155 = vector.load %arg33[%c0_102, %c0_103] : memref<1x64xf32, #tpu.memory_space<vmem>>, vector<1x64xf32>
    %c0_104 = arith.constant 0 : index
    %c0_105 = arith.constant 0 : index
    %156 = vector.load %arg34[%c0_104, %c0_105] : memref<32x64xf32, #tpu.memory_space<vmem>>, vector<32x64xf32>
    %c0_106 = arith.constant 0 : index
    %c0_107 = arith.constant 0 : index
    %157 = vector.load %arg35[%c0_106, %c0_107] : memref<32x64xf32, #tpu.memory_space<vmem>>, vector<32x64xf32>
    %cst_108 = arith.constant dense<0.000000e+00> : vector<64xf32>
    %158 = vector.multi_reduction <add>, %153, %cst_108 [0] : vector<64x64xf32> to vector<64xf32>
    %159 = vector.shape_cast %158 : vector<64xf32> to vector<1x64xf32>
    %cst_109 = arith.constant 6.400000e+01 : f32
    %160 = vector.broadcast %cst_109 : f32 to vector<1x64xf32>
    %161 = arith.divf %159, %160 : vector<1x64xf32>
    %162 = vector.broadcast %161 : vector<1x64xf32> to vector<64x64xf32>
    %163 = arith.subf %153, %162 : vector<64x64xf32>
    %164 = arith.mulf %163, %163 : vector<64x64xf32>
    %cst_110 = arith.constant dense<0.000000e+00> : vector<64xf32>
    %165 = vector.multi_reduction <add>, %164, %cst_110 [0] : vector<64x64xf32> to vector<64xf32>
    %166 = vector.shape_cast %165 : vector<64xf32> to vector<1x64xf32>
    %cst_111 = arith.constant 6.400000e+01 : f32
    %167 = vector.broadcast %cst_111 : f32 to vector<1x64xf32>
    %168 = arith.divf %166, %167 : vector<1x64xf32>
    %cst_112 = arith.constant 9.99999974E-6 : f32
    %169 = vector.broadcast %cst_112 : f32 to vector<1x64xf32>
    %170 = arith.addf %168, %169 : vector<1x64xf32>
    %171 = math.sqrt %170 : vector<1x64xf32>
    %172 = arith.divf %154, %171 : vector<1x64xf32>
    %173 = arith.mulf %161, %172 : vector<1x64xf32>
    %174 = arith.subf %155, %173 : vector<1x64xf32>
    %cst_113 = arith.constant dense<0.000000e+00> : vector<32x64xf32>
    %175 = tpu.matmul %156, %153, %cst_113 {dimension_numbers = #tpu.dot_dimension_numbers<[1], [0], [0], [1], [0, 0, 1, 1], [], []>} : vector<32x64xf32>, vector<64x64xf32>, vector<32x64xf32> -> vector<32x64xf32>
    %cst_114 = arith.constant dense<0.000000e+00> : vector<32x64xf32>
    %176 = tpu.matmul %157, %153, %cst_114 {dimension_numbers = #tpu.dot_dimension_numbers<[1], [0], [0], [1], [0, 0, 1, 1], [], []>} : vector<32x64xf32>, vector<64x64xf32>, vector<32x64xf32> -> vector<32x64xf32>
    %177 = vector.broadcast %172 : vector<1x64xf32> to vector<32x64xf32>
    %178 = arith.mulf %175, %177 : vector<32x64xf32>
    %179 = vector.broadcast %174 : vector<1x64xf32> to vector<32x64xf32>
    %180 = arith.addf %178, %179 : vector<32x64xf32>
    %181 = vector.broadcast %172 : vector<1x64xf32> to vector<32x64xf32>
    %182 = arith.mulf %176, %181 : vector<32x64xf32>
    %183 = vector.broadcast %174 : vector<1x64xf32> to vector<32x64xf32>
    %184 = arith.addf %182, %183 : vector<32x64xf32>
    %185 = arith.maximumf %180, %184 : vector<32x64xf32>
    %cst_115 = arith.constant 0.000000e+00 : f32
    %186 = vector.broadcast %cst_115 : f32 to vector<32x64xf32>
    %187 = arith.maximumf %185, %186 : vector<32x64xf32>
    %c0_116 = arith.constant 0 : index
    %c0_117 = arith.constant 0 : index
    %188 = vector.load %arg36[%c0_116, %c0_117] : memref<32x32xf32, #tpu.memory_space<vmem>>, vector<32x32xf32>
    %cst_118 = arith.constant dense<0.000000e+00> : vector<32x64xf32>
    %189 = tpu.matmul %188, %187, %cst_118 {dimension_numbers = #tpu.dot_dimension_numbers<[1], [0], [0], [1], [0, 0, 1, 1], [], []>} : vector<32x32xf32>, vector<32x64xf32>, vector<32x64xf32> -> vector<32x64xf32>
    %c0_119 = arith.constant 0 : index
    %c0_120 = arith.constant 0 : index
    %190 = vector.load %arg37[%c0_119, %c0_120] : memref<64x64xf32, #tpu.memory_space<vmem>>, vector<64x64xf32>
    %cst_121 = arith.constant dense<0.000000e+00> : vector<32x64xf32>
    %191 = tpu.matmul %189, %190, %cst_121 {dimension_numbers = #tpu.dot_dimension_numbers<[1], [0], [0], [1], [0, 0, 1, 1], [], []>} : vector<32x64xf32>, vector<64x64xf32>, vector<32x64xf32> -> vector<32x64xf32>
    %c0_122 = arith.constant 0 : index
    %c0_123 = arith.constant 0 : index
    %192 = vector.load %arg38[%c0_122, %c0_123] : memref<32x32xf32, #tpu.memory_space<vmem>>, vector<32x32xf32>
    %cst_124 = arith.constant dense<0.000000e+00> : vector<32x64xf32>
    %193 = tpu.matmul %192, %187, %cst_124 {dimension_numbers = #tpu.dot_dimension_numbers<[1], [0], [0], [1], [0, 0, 1, 1], [], []>} : vector<32x32xf32>, vector<32x64xf32>, vector<32x64xf32> -> vector<32x64xf32>
    %c0_125 = arith.constant 0 : index
    %c0_126 = arith.constant 0 : index
    %194 = vector.load %arg39[%c0_125, %c0_126] : memref<64x64xf32, #tpu.memory_space<vmem>>, vector<64x64xf32>
    %cst_127 = arith.constant dense<0.000000e+00> : vector<32x64xf32>
    %195 = tpu.matmul %193, %194, %cst_127 {dimension_numbers = #tpu.dot_dimension_numbers<[1], [0], [0], [1], [0, 0, 1, 1], [], []>} : vector<32x64xf32>, vector<64x64xf32>, vector<32x64xf32> -> vector<32x64xf32>
    %196 = arith.addf %191, %195 : vector<32x64xf32>
    %c0_128 = arith.constant 0 : index
    %c0_129 = arith.constant 0 : index
    %197 = vector.load %arg40[%c0_128, %c0_129] : memref<32x32xf32, #tpu.memory_space<vmem>>, vector<32x32xf32>
    %cst_130 = arith.constant dense<0.000000e+00> : vector<32x64xf32>
    %198 = tpu.matmul %197, %187, %cst_130 {dimension_numbers = #tpu.dot_dimension_numbers<[1], [0], [0], [1], [0, 0, 1, 1], [], []>} : vector<32x32xf32>, vector<32x64xf32>, vector<32x64xf32> -> vector<32x64xf32>
    %c0_131 = arith.constant 0 : index
    %c0_132 = arith.constant 0 : index
    %199 = vector.load %arg41[%c0_131, %c0_132] : memref<64x64xf32, #tpu.memory_space<vmem>>, vector<64x64xf32>
    %cst_133 = arith.constant dense<0.000000e+00> : vector<32x64xf32>
    %200 = tpu.matmul %198, %199, %cst_133 {dimension_numbers = #tpu.dot_dimension_numbers<[1], [0], [0], [1], [0, 0, 1, 1], [], []>} : vector<32x64xf32>, vector<64x64xf32>, vector<32x64xf32> -> vector<32x64xf32>
    %201 = arith.addf %196, %200 : vector<32x64xf32>
    %c0_134 = arith.constant 0 : index
    %c0_135 = arith.constant 0 : index
    %202 = vector.load %arg42[%c0_134, %c0_135] : memref<1x64xf32, #tpu.memory_space<vmem>>, vector<1x64xf32>
    %c0_136 = arith.constant 0 : index
    %c0_137 = arith.constant 0 : index
    %203 = vector.load %arg43[%c0_136, %c0_137] : memref<1x64xf32, #tpu.memory_space<vmem>>, vector<1x64xf32>
    %c0_138 = arith.constant 0 : index
    %c0_139 = arith.constant 0 : index
    %204 = vector.load %arg44[%c0_138, %c0_139] : memref<16x32xf32, #tpu.memory_space<vmem>>, vector<16x32xf32>
    %c0_140 = arith.constant 0 : index
    %c0_141 = arith.constant 0 : index
    %205 = vector.load %arg45[%c0_140, %c0_141] : memref<16x32xf32, #tpu.memory_space<vmem>>, vector<16x32xf32>
    %cst_142 = arith.constant dense<0.000000e+00> : vector<64xf32>
    %206 = vector.multi_reduction <add>, %201, %cst_142 [0] : vector<32x64xf32> to vector<64xf32>
    %207 = vector.shape_cast %206 : vector<64xf32> to vector<1x64xf32>
    %cst_143 = arith.constant 3.200000e+01 : f32
    %208 = vector.broadcast %cst_143 : f32 to vector<1x64xf32>
    %209 = arith.divf %207, %208 : vector<1x64xf32>
    %210 = vector.broadcast %209 : vector<1x64xf32> to vector<32x64xf32>
    %211 = arith.subf %201, %210 : vector<32x64xf32>
    %212 = arith.mulf %211, %211 : vector<32x64xf32>
    %cst_144 = arith.constant dense<0.000000e+00> : vector<64xf32>
    %213 = vector.multi_reduction <add>, %212, %cst_144 [0] : vector<32x64xf32> to vector<64xf32>
    %214 = vector.shape_cast %213 : vector<64xf32> to vector<1x64xf32>
    %cst_145 = arith.constant 3.200000e+01 : f32
    %215 = vector.broadcast %cst_145 : f32 to vector<1x64xf32>
    %216 = arith.divf %214, %215 : vector<1x64xf32>
    %cst_146 = arith.constant 9.99999974E-6 : f32
    %217 = vector.broadcast %cst_146 : f32 to vector<1x64xf32>
    %218 = arith.addf %216, %217 : vector<1x64xf32>
    %219 = math.sqrt %218 : vector<1x64xf32>
    %220 = arith.divf %202, %219 : vector<1x64xf32>
    %221 = arith.mulf %209, %220 : vector<1x64xf32>
    %222 = arith.subf %203, %221 : vector<1x64xf32>
    %cst_147 = arith.constant dense<0.000000e+00> : vector<16x64xf32>
    %223 = tpu.matmul %204, %201, %cst_147 {dimension_numbers = #tpu.dot_dimension_numbers<[1], [0], [0], [1], [0, 0, 1, 1], [], []>} : vector<16x32xf32>, vector<32x64xf32>, vector<16x64xf32> -> vector<16x64xf32>
    %cst_148 = arith.constant dense<0.000000e+00> : vector<16x64xf32>
    %224 = tpu.matmul %205, %201, %cst_148 {dimension_numbers = #tpu.dot_dimension_numbers<[1], [0], [0], [1], [0, 0, 1, 1], [], []>} : vector<16x32xf32>, vector<32x64xf32>, vector<16x64xf32> -> vector<16x64xf32>
    %225 = vector.broadcast %220 : vector<1x64xf32> to vector<16x64xf32>
    %226 = arith.mulf %223, %225 : vector<16x64xf32>
    %227 = vector.broadcast %222 : vector<1x64xf32> to vector<16x64xf32>
    %228 = arith.addf %226, %227 : vector<16x64xf32>
    %229 = vector.broadcast %220 : vector<1x64xf32> to vector<16x64xf32>
    %230 = arith.mulf %224, %229 : vector<16x64xf32>
    %231 = vector.broadcast %222 : vector<1x64xf32> to vector<16x64xf32>
    %232 = arith.addf %230, %231 : vector<16x64xf32>
    %233 = arith.maximumf %228, %232 : vector<16x64xf32>
    %cst_149 = arith.constant 0.000000e+00 : f32
    %234 = vector.broadcast %cst_149 : f32 to vector<16x64xf32>
    %235 = arith.maximumf %233, %234 : vector<16x64xf32>
    %c0_150 = arith.constant 0 : index
    %c0_151 = arith.constant 0 : index
    %236 = vector.load %arg46[%c0_150, %c0_151] : memref<12x16xf32, #tpu.memory_space<vmem>>, vector<12x16xf32>
    %cst_152 = arith.constant dense<0.000000e+00> : vector<12x64xf32>
    %237 = tpu.matmul %236, %235, %cst_152 {dimension_numbers = #tpu.dot_dimension_numbers<[1], [0], [0], [1], [0, 0, 1, 1], [], []>} : vector<12x16xf32>, vector<16x64xf32>, vector<12x64xf32> -> vector<12x64xf32>
    %c0_153 = arith.constant 0 : index
    %c0_154 = arith.constant 0 : index
    %238 = vector.load %arg47[%c0_153, %c0_154] : memref<64x64xf32, #tpu.memory_space<vmem>>, vector<64x64xf32>
    %cst_155 = arith.constant dense<0.000000e+00> : vector<12x64xf32>
    %239 = tpu.matmul %237, %238, %cst_155 {dimension_numbers = #tpu.dot_dimension_numbers<[1], [0], [0], [1], [0, 0, 1, 1], [], []>} : vector<12x64xf32>, vector<64x64xf32>, vector<12x64xf32> -> vector<12x64xf32>
    %c0_156 = arith.constant 0 : index
    %c0_157 = arith.constant 0 : index
    %240 = vector.load %arg48[%c0_156, %c0_157] : memref<12x16xf32, #tpu.memory_space<vmem>>, vector<12x16xf32>
    %cst_158 = arith.constant dense<0.000000e+00> : vector<12x64xf32>
    %241 = tpu.matmul %240, %235, %cst_158 {dimension_numbers = #tpu.dot_dimension_numbers<[1], [0], [0], [1], [0, 0, 1, 1], [], []>} : vector<12x16xf32>, vector<16x64xf32>, vector<12x64xf32> -> vector<12x64xf32>
    %c0_159 = arith.constant 0 : index
    %c0_160 = arith.constant 0 : index
    %242 = vector.load %arg49[%c0_159, %c0_160] : memref<64x64xf32, #tpu.memory_space<vmem>>, vector<64x64xf32>
    %cst_161 = arith.constant dense<0.000000e+00> : vector<12x64xf32>
    %243 = tpu.matmul %241, %242, %cst_161 {dimension_numbers = #tpu.dot_dimension_numbers<[1], [0], [0], [1], [0, 0, 1, 1], [], []>} : vector<12x64xf32>, vector<64x64xf32>, vector<12x64xf32> -> vector<12x64xf32>
    %244 = arith.addf %239, %243 : vector<12x64xf32>
    %c0_162 = arith.constant 0 : index
    %c0_163 = arith.constant 0 : index
    %245 = vector.load %arg50[%c0_162, %c0_163] : memref<12x16xf32, #tpu.memory_space<vmem>>, vector<12x16xf32>
    %cst_164 = arith.constant dense<0.000000e+00> : vector<12x64xf32>
    %246 = tpu.matmul %245, %235, %cst_164 {dimension_numbers = #tpu.dot_dimension_numbers<[1], [0], [0], [1], [0, 0, 1, 1], [], []>} : vector<12x16xf32>, vector<16x64xf32>, vector<12x64xf32> -> vector<12x64xf32>
    %c0_165 = arith.constant 0 : index
    %c0_166 = arith.constant 0 : index
    %247 = vector.load %arg51[%c0_165, %c0_166] : memref<64x64xf32, #tpu.memory_space<vmem>>, vector<64x64xf32>
    %cst_167 = arith.constant dense<0.000000e+00> : vector<12x64xf32>
    %248 = tpu.matmul %246, %247, %cst_167 {dimension_numbers = #tpu.dot_dimension_numbers<[1], [0], [0], [1], [0, 0, 1, 1], [], []>} : vector<12x64xf32>, vector<64x64xf32>, vector<12x64xf32> -> vector<12x64xf32>
    %249 = arith.addf %244, %248 : vector<12x64xf32>
    %c0_168 = arith.constant 0 : index
    %c0_169 = arith.constant 0 : index
    %250 = vector.load %arg52[%c0_168, %c0_169] : memref<1x64xf32, #tpu.memory_space<vmem>>, vector<1x64xf32>
    %c0_170 = arith.constant 0 : index
    %c0_171 = arith.constant 0 : index
    %251 = vector.load %arg53[%c0_170, %c0_171] : memref<1x64xf32, #tpu.memory_space<vmem>>, vector<1x64xf32>
    %c0_172 = arith.constant 0 : index
    %c0_173 = arith.constant 0 : index
    %252 = vector.load %arg54[%c0_172, %c0_173] : memref<6x12xf32, #tpu.memory_space<vmem>>, vector<6x12xf32>
    %c0_174 = arith.constant 0 : index
    %c0_175 = arith.constant 0 : index
    %253 = vector.load %arg55[%c0_174, %c0_175] : memref<6x12xf32, #tpu.memory_space<vmem>>, vector<6x12xf32>
    %cst_176 = arith.constant dense<0.000000e+00> : vector<64xf32>
    %254 = vector.multi_reduction <add>, %249, %cst_176 [0] : vector<12x64xf32> to vector<64xf32>
    %255 = vector.shape_cast %254 : vector<64xf32> to vector<1x64xf32>
    %cst_177 = arith.constant 1.200000e+01 : f32
    %256 = vector.broadcast %cst_177 : f32 to vector<1x64xf32>
    %257 = arith.divf %255, %256 : vector<1x64xf32>
    %258 = vector.broadcast %257 : vector<1x64xf32> to vector<12x64xf32>
    %259 = arith.subf %249, %258 : vector<12x64xf32>
    %260 = arith.mulf %259, %259 : vector<12x64xf32>
    %cst_178 = arith.constant dense<0.000000e+00> : vector<64xf32>
    %261 = vector.multi_reduction <add>, %260, %cst_178 [0] : vector<12x64xf32> to vector<64xf32>
    %262 = vector.shape_cast %261 : vector<64xf32> to vector<1x64xf32>
    %cst_179 = arith.constant 1.200000e+01 : f32
    %263 = vector.broadcast %cst_179 : f32 to vector<1x64xf32>
    %264 = arith.divf %262, %263 : vector<1x64xf32>
    %cst_180 = arith.constant 9.99999974E-6 : f32
    %265 = vector.broadcast %cst_180 : f32 to vector<1x64xf32>
    %266 = arith.addf %264, %265 : vector<1x64xf32>
    %267 = math.sqrt %266 : vector<1x64xf32>
    %268 = arith.divf %250, %267 : vector<1x64xf32>
    %269 = arith.mulf %257, %268 : vector<1x64xf32>
    %270 = arith.subf %251, %269 : vector<1x64xf32>
    %cst_181 = arith.constant dense<0.000000e+00> : vector<6x64xf32>
    %271 = tpu.matmul %252, %249, %cst_181 {dimension_numbers = #tpu.dot_dimension_numbers<[1], [0], [0], [1], [0, 0, 1, 1], [], []>} : vector<6x12xf32>, vector<12x64xf32>, vector<6x64xf32> -> vector<6x64xf32>
    %cst_182 = arith.constant dense<0.000000e+00> : vector<6x64xf32>
    %272 = tpu.matmul %253, %249, %cst_182 {dimension_numbers = #tpu.dot_dimension_numbers<[1], [0], [0], [1], [0, 0, 1, 1], [], []>} : vector<6x12xf32>, vector<12x64xf32>, vector<6x64xf32> -> vector<6x64xf32>
    %273 = vector.broadcast %268 : vector<1x64xf32> to vector<6x64xf32>
    %274 = arith.mulf %271, %273 : vector<6x64xf32>
    %275 = vector.broadcast %270 : vector<1x64xf32> to vector<6x64xf32>
    %276 = arith.addf %274, %275 : vector<6x64xf32>
    %277 = vector.broadcast %268 : vector<1x64xf32> to vector<6x64xf32>
    %278 = arith.mulf %272, %277 : vector<6x64xf32>
    %279 = vector.broadcast %270 : vector<1x64xf32> to vector<6x64xf32>
    %280 = arith.addf %278, %279 : vector<6x64xf32>
    %281 = arith.maximumf %276, %280 : vector<6x64xf32>
    %cst_183 = arith.constant 0.000000e+00 : f32
    %282 = vector.broadcast %cst_183 : f32 to vector<6x64xf32>
    %283 = arith.maximumf %281, %282 : vector<6x64xf32>
    %c0_184 = arith.constant 0 : index
    %c0_185 = arith.constant 0 : index
    %284 = vector.load %arg56[%c0_184, %c0_185] : memref<2x6xf32, #tpu.memory_space<vmem>>, vector<2x6xf32>
    %cst_186 = arith.constant dense<0.000000e+00> : vector<2x64xf32>
    %285 = tpu.matmul %284, %283, %cst_186 {dimension_numbers = #tpu.dot_dimension_numbers<[1], [0], [0], [1], [0, 0, 1, 1], [], []>} : vector<2x6xf32>, vector<6x64xf32>, vector<2x64xf32> -> vector<2x64xf32>
    %c0_187 = arith.constant 0 : index
    %c0_188 = arith.constant 0 : index
    %286 = vector.load %arg57[%c0_187, %c0_188] : memref<64x10xf32, #tpu.memory_space<vmem>>, vector<64x10xf32>
    %cst_189 = arith.constant dense<0.000000e+00> : vector<2x10xf32>
    %287 = tpu.matmul %285, %286, %cst_189 {dimension_numbers = #tpu.dot_dimension_numbers<[1], [0], [0], [1], [0, 0, 1, 1], [], []>} : vector<2x64xf32>, vector<64x10xf32>, vector<2x10xf32> -> vector<2x10xf32>
    %c0_190 = arith.constant 0 : index
    %c0_191 = arith.constant 0 : index
    %288 = vector.load %arg58[%c0_190, %c0_191] : memref<2x6xf32, #tpu.memory_space<vmem>>, vector<2x6xf32>
    %cst_192 = arith.constant dense<0.000000e+00> : vector<2x64xf32>
    %289 = tpu.matmul %288, %283, %cst_192 {dimension_numbers = #tpu.dot_dimension_numbers<[1], [0], [0], [1], [0, 0, 1, 1], [], []>} : vector<2x6xf32>, vector<6x64xf32>, vector<2x64xf32> -> vector<2x64xf32>
    %c0_193 = arith.constant 0 : index
    %c0_194 = arith.constant 0 : index
    %290 = vector.load %arg59[%c0_193, %c0_194] : memref<64x10xf32, #tpu.memory_space<vmem>>, vector<64x10xf32>
    %cst_195 = arith.constant dense<0.000000e+00> : vector<2x10xf32>
    %291 = tpu.matmul %289, %290, %cst_195 {dimension_numbers = #tpu.dot_dimension_numbers<[1], [0], [0], [1], [0, 0, 1, 1], [], []>} : vector<2x64xf32>, vector<64x10xf32>, vector<2x10xf32> -> vector<2x10xf32>
    %292 = arith.addf %287, %291 : vector<2x10xf32>
    %c0_196 = arith.constant 0 : index
    %c0_197 = arith.constant 0 : index
    %293 = vector.load %arg60[%c0_196, %c0_197] : memref<2x6xf32, #tpu.memory_space<vmem>>, vector<2x6xf32>
    %cst_198 = arith.constant dense<0.000000e+00> : vector<2x64xf32>
    %294 = tpu.matmul %293, %283, %cst_198 {dimension_numbers = #tpu.dot_dimension_numbers<[1], [0], [0], [1], [0, 0, 1, 1], [], []>} : vector<2x6xf32>, vector<6x64xf32>, vector<2x64xf32> -> vector<2x64xf32>
    %c0_199 = arith.constant 0 : index
    %c0_200 = arith.constant 0 : index
    %295 = vector.load %arg61[%c0_199, %c0_200] : memref<64x10xf32, #tpu.memory_space<vmem>>, vector<64x10xf32>
    %cst_201 = arith.constant dense<0.000000e+00> : vector<2x10xf32>
    %296 = tpu.matmul %294, %295, %cst_201 {dimension_numbers = #tpu.dot_dimension_numbers<[1], [0], [0], [1], [0, 0, 1, 1], [], []>} : vector<2x64xf32>, vector<64x10xf32>, vector<2x10xf32> -> vector<2x10xf32>
    %297 = arith.addf %292, %296 : vector<2x10xf32>
    %c0_202 = arith.constant 0 : index
    %c0_203 = arith.constant 0 : index
    %298 = vector.load %arg62[%c0_202, %c0_203] : memref<1x10xf32, #tpu.memory_space<vmem>>, vector<1x10xf32>
    %299 = vector.broadcast %298 : vector<1x10xf32> to vector<2x10xf32>
    %300 = arith.addf %297, %299 : vector<2x10xf32>
    %c0_204 = arith.constant 0 : index
    %c0_205 = arith.constant 0 : index
    %301 = vector.load %arg63[%c0_204, %c0_205] : memref<2x10xf32, #tpu.memory_space<vmem>>, vector<2x10xf32>
    tpu.vector_store %arg63[%c0_204, %c0_205], %300 {strides = array<i32>} : memref<2x10xf32, #tpu.memory_space<vmem>>, vector<2x10xf32>,
    return
  }
  func.func @transform_0(%arg0: i32) -> (i32, i32) {
    %c0_i32 = arith.constant 0 : i32
    %c0_i32_0 = arith.constant 0 : i32
    %c0_i32_1 = arith.constant 0 : i32
    return %c0_i32, %c0_i32_0 : i32, i32
  }
  func.func @transform_1(%arg0: i32) -> (i32, i32) {
    %c0_i32 = arith.constant 0 : i32
    %c0_i32_0 = arith.constant 0 : i32
    %c0_i32_1 = arith.constant 0 : i32
    return %c0_i32, %c0_i32_0 : i32, i32
  }
  func.func @transform_2(%arg0: i32) -> (i32, i32) {
    %c0_i32 = arith.constant 0 : i32
    %c0_i32_0 = arith.constant 0 : i32
    %c0_i32_1 = arith.constant 0 : i32
    return %c0_i32, %c0_i32_0 : i32, i32
  }
  func.func @transform_3(%arg0: i32) -> (i32, i32) {
    %c0_i32 = arith.constant 0 : i32
    %c0_i32_0 = arith.constant 0 : i32
    %c0_i32_1 = arith.constant 0 : i32
    return %c0_i32, %c0_i32_0 : i32, i32
  }
  func.func @transform_4(%arg0: i32) -> (i32, i32) {
    %c0_i32 = arith.constant 0 : i32
    %c0_i32_0 = arith.constant 0 : i32
    %c0_i32_1 = arith.constant 0 : i32
    return %c0_i32, %c0_i32_0 : i32, i32
  }
  func.func @transform_5(%arg0: i32) -> (i32, i32) {
    %c0_i32 = arith.constant 0 : i32
    %c0_i32_0 = arith.constant 0 : i32
    %c0_i32_1 = arith.constant 0 : i32
    return %c0_i32, %c0_i32_0 : i32, i32
  }
  func.func @transform_6(%arg0: i32) -> (i32, i32) {
    %c0_i32 = arith.constant 0 : i32
    %c0_i32_0 = arith.constant 0 : i32
    %c0_i32_1 = arith.constant 0 : i32
    return %c0_i32, %c0_i32_0 : i32, i32
  }
  func.func @transform_7(%arg0: i32) -> (i32, i32) {
    %c0_i32 = arith.constant 0 : i32
    %c0_i32_0 = arith.constant 0 : i32
    %c0_i32_1 = arith.constant 0 : i32
    return %c0_i32, %c0_i32_0 : i32, i32
  }
  func.func @transform_8(%arg0: i32) -> (i32, i32) {
    %c0_i32 = arith.constant 0 : i32
    %c0_i32_0 = arith.constant 0 : i32
    %c0_i32_1 = arith.constant 0 : i32
    return %c0_i32, %c0_i32_0 : i32, i32
  }
  func.func @transform_9(%arg0: i32) -> (i32, i32) {
    %c0_i32 = arith.constant 0 : i32
    %c0_i32_0 = arith.constant 0 : i32
    %c0_i32_1 = arith.constant 0 : i32
    return %c0_i32, %c0_i32_0 : i32, i32
  }
  func.func @transform_10(%arg0: i32) -> (i32, i32) {
    %c0_i32 = arith.constant 0 : i32
    %c0_i32_0 = arith.constant 0 : i32
    %c0_i32_1 = arith.constant 0 : i32
    return %c0_i32, %c0_i32_0 : i32, i32
  }
  func.func @transform_11(%arg0: i32) -> (i32, i32) {
    %c0_i32 = arith.constant 0 : i32
    %c0_i32_0 = arith.constant 0 : i32
    %c0_i32_1 = arith.constant 0 : i32
    return %c0_i32, %c0_i32_0 : i32, i32
  }
  func.func @transform_12(%arg0: i32) -> (i32, i32) {
    %c0_i32 = arith.constant 0 : i32
    %c0_i32_0 = arith.constant 0 : i32
    %c0_i32_1 = arith.constant 0 : i32
    return %c0_i32, %c0_i32_0 : i32, i32
  }
  func.func @transform_13(%arg0: i32) -> (i32, i32) {
    %c0_i32 = arith.constant 0 : i32
    %c0_i32_0 = arith.constant 0 : i32
    %c0_i32_1 = arith.constant 0 : i32
    return %c0_i32, %c0_i32_0 : i32, i32
  }
  func.func @transform_14(%arg0: i32) -> (i32, i32) {
    %c0_i32 = arith.constant 0 : i32
    %c0_i32_0 = arith.constant 0 : i32
    %c0_i32_1 = arith.constant 0 : i32
    return %c0_i32, %c0_i32_0 : i32, i32
  }
  func.func @transform_15(%arg0: i32) -> (i32, i32) {
    %c0_i32 = arith.constant 0 : i32
    %c0_i32_0 = arith.constant 0 : i32
    %c0_i32_1 = arith.constant 0 : i32
    return %c0_i32, %c0_i32_0 : i32, i32
  }
  func.func @transform_16(%arg0: i32) -> (i32, i32) {
    %c0_i32 = arith.constant 0 : i32
    %c0_i32_0 = arith.constant 0 : i32
    %c0_i32_1 = arith.constant 0 : i32
    return %c0_i32, %c0_i32_0 : i32, i32
  }
  func.func @transform_17(%arg0: i32) -> (i32, i32) {
    %c0_i32 = arith.constant 0 : i32
    %c0_i32_0 = arith.constant 0 : i32
    %c0_i32_1 = arith.constant 0 : i32
    return %c0_i32, %c0_i32_0 : i32, i32
  }
  func.func @transform_18(%arg0: i32) -> (i32, i32) {
    %c0_i32 = arith.constant 0 : i32
    %c0_i32_0 = arith.constant 0 : i32
    %c0_i32_1 = arith.constant 0 : i32
    return %c0_i32, %c0_i32_0 : i32, i32
  }
  func.func @transform_19(%arg0: i32) -> (i32, i32) {
    %c0_i32 = arith.constant 0 : i32
    %c0_i32_0 = arith.constant 0 : i32
    %c0_i32_1 = arith.constant 0 : i32
    return %c0_i32, %c0_i32_0 : i32, i32
  }
  func.func @transform_20(%arg0: i32) -> (i32, i32) {
    %c0_i32 = arith.constant 0 : i32
    %c0_i32_0 = arith.constant 0 : i32
    %c0_i32_1 = arith.constant 0 : i32
    return %c0_i32, %c0_i32_0 : i32, i32
  }
  func.func @transform_21(%arg0: i32) -> (i32, i32) {
    %c0_i32 = arith.constant 0 : i32
    %c0_i32_0 = arith.constant 0 : i32
    %c0_i32_1 = arith.constant 0 : i32
    return %c0_i32, %c0_i32_0 : i32, i32
  }
  func.func @transform_22(%arg0: i32) -> (i32, i32) {
    %c0_i32 = arith.constant 0 : i32
    %c0_i32_0 = arith.constant 0 : i32
    %c0_i32_1 = arith.constant 0 : i32
    return %c0_i32, %c0_i32_0 : i32, i32
  }
  func.func @transform_23(%arg0: i32) -> (i32, i32) {
    %c0_i32 = arith.constant 0 : i32
    %c0_i32_0 = arith.constant 0 : i32
    %c0_i32_1 = arith.constant 0 : i32
    return %c0_i32, %c0_i32_0 : i32, i32
  }
  func.func @transform_24(%arg0: i32) -> (i32, i32) {
    %c0_i32 = arith.constant 0 : i32
    %c0_i32_0 = arith.constant 0 : i32
    %c0_i32_1 = arith.constant 0 : i32
    return %c0_i32, %c0_i32_0 : i32, i32
  }
  func.func @transform_25(%arg0: i32) -> (i32, i32) {
    %c0_i32 = arith.constant 0 : i32
    %c0_i32_0 = arith.constant 0 : i32
    %c0_i32_1 = arith.constant 0 : i32
    return %c0_i32, %c0_i32_0 : i32, i32
  }
  func.func @transform_26(%arg0: i32) -> (i32, i32) {
    %c0_i32 = arith.constant 0 : i32
    %c0_i32_0 = arith.constant 0 : i32
    %c0_i32_1 = arith.constant 0 : i32
    return %c0_i32, %c0_i32_0 : i32, i32
  }
  func.func @transform_27(%arg0: i32) -> (i32, i32) {
    %c0_i32 = arith.constant 0 : i32
    %c0_i32_0 = arith.constant 0 : i32
    %c0_i32_1 = arith.constant 0 : i32
    return %c0_i32, %c0_i32_0 : i32, i32
  }
  func.func @transform_28(%arg0: i32) -> (i32, i32) {
    %c0_i32 = arith.constant 0 : i32
    %c0_i32_0 = arith.constant 0 : i32
    %c0_i32_1 = arith.constant 0 : i32
    return %c0_i32, %c0_i32_0 : i32, i32
  }
  func.func @transform_29(%arg0: i32) -> (i32, i32) {
    %c0_i32 = arith.constant 0 : i32
    %c0_i32_0 = arith.constant 0 : i32
    %c0_i32_1 = arith.constant 0 : i32
    return %c0_i32, %c0_i32_0 : i32, i32
  }
  func.func @transform_30(%arg0: i32) -> (i32, i32) {
    %c0_i32 = arith.constant 0 : i32
    %c0_i32_0 = arith.constant 0 : i32
    %c0_i32_1 = arith.constant 0 : i32
    return %c0_i32, %c0_i32_0 : i32, i32
  }
  func.func @transform_31(%arg0: i32) -> (i32, i32) {
    %c0_i32 = arith.constant 0 : i32
    %c0_i32_0 = arith.constant 0 : i32
    %c0_i32_1 = arith.constant 0 : i32
    return %c0_i32, %c0_i32_0 : i32, i32
  }
  func.func @transform_32(%arg0: i32) -> (i32, i32) {
    %c0_i32 = arith.constant 0 : i32
    %c0_i32_0 = arith.constant 0 : i32
    %c0_i32_1 = arith.constant 0 : i32
    return %c0_i32, %c0_i32_0 : i32, i32
  }
  func.func @transform_33(%arg0: i32) -> (i32, i32) {
    %c0_i32 = arith.constant 0 : i32
    %c0_i32_0 = arith.constant 0 : i32
    %c0_i32_1 = arith.constant 0 : i32
    return %c0_i32, %c0_i32_0 : i32, i32
  }
  func.func @transform_34(%arg0: i32) -> (i32, i32) {
    %c0_i32 = arith.constant 0 : i32
    %c0_i32_0 = arith.constant 0 : i32
    %c0_i32_1 = arith.constant 0 : i32
    return %c0_i32, %c0_i32_0 : i32, i32
  }
  func.func @transform_35(%arg0: i32) -> (i32, i32) {
    %c0_i32 = arith.constant 0 : i32
    %c0_i32_0 = arith.constant 0 : i32
    %c0_i32_1 = arith.constant 0 : i32
    return %c0_i32, %c0_i32_0 : i32, i32
  }
  func.func @transform_36(%arg0: i32) -> (i32, i32) {
    %c0_i32 = arith.constant 0 : i32
    %c0_i32_0 = arith.constant 0 : i32
    %c0_i32_1 = arith.constant 0 : i32
    return %c0_i32, %c0_i32_0 : i32, i32
  }
  func.func @transform_37(%arg0: i32) -> (i32, i32) {
    %c0_i32 = arith.constant 0 : i32
    %c0_i32_0 = arith.constant 0 : i32
    %c0_i32_1 = arith.constant 0 : i32
    return %c0_i32, %c0_i32_0 : i32, i32
  }
  func.func @transform_38(%arg0: i32) -> (i32, i32) {
    %c0_i32 = arith.constant 0 : i32
    %c0_i32_0 = arith.constant 0 : i32
    %c0_i32_1 = arith.constant 0 : i32
    return %c0_i32, %c0_i32_0 : i32, i32
  }
  func.func @transform_39(%arg0: i32) -> (i32, i32) {
    %c0_i32 = arith.constant 0 : i32
    %c0_i32_0 = arith.constant 0 : i32
    %c0_i32_1 = arith.constant 0 : i32
    return %c0_i32, %c0_i32_0 : i32, i32
  }
  func.func @transform_40(%arg0: i32) -> (i32, i32) {
    %c0_i32 = arith.constant 0 : i32
    %c0_i32_0 = arith.constant 0 : i32
    %c0_i32_1 = arith.constant 0 : i32
    return %c0_i32, %c0_i32_0 : i32, i32
  }
  func.func @transform_41(%arg0: i32) -> (i32, i32) {
    %c0_i32 = arith.constant 0 : i32
    %c0_i32_0 = arith.constant 0 : i32
    %c0_i32_1 = arith.constant 0 : i32
    return %c0_i32, %c0_i32_0 : i32, i32
  }
  func.func @transform_42(%arg0: i32) -> (i32, i32) {
    %c0_i32 = arith.constant 0 : i32
    %c0_i32_0 = arith.constant 0 : i32
    %c0_i32_1 = arith.constant 0 : i32
    return %c0_i32, %c0_i32_0 : i32, i32
  }
  func.func @transform_43(%arg0: i32) -> (i32, i32) {
    %c0_i32 = arith.constant 0 : i32
    %c0_i32_0 = arith.constant 0 : i32
    %c0_i32_1 = arith.constant 0 : i32
    return %c0_i32, %c0_i32_0 : i32, i32
  }
  func.func @transform_44(%arg0: i32) -> (i32, i32) {
    %c0_i32 = arith.constant 0 : i32
    %c0_i32_0 = arith.constant 0 : i32
    %c0_i32_1 = arith.constant 0 : i32
    return %c0_i32, %c0_i32_0 : i32, i32
  }
  func.func @transform_45(%arg0: i32) -> (i32, i32) {
    %c0_i32 = arith.constant 0 : i32
    %c0_i32_0 = arith.constant 0 : i32
    %c0_i32_1 = arith.constant 0 : i32
    return %c0_i32, %c0_i32_0 : i32, i32
  }
  func.func @transform_46(%arg0: i32) -> (i32, i32) {
    %c0_i32 = arith.constant 0 : i32
    %c0_i32_0 = arith.constant 0 : i32
    %c0_i32_1 = arith.constant 0 : i32
    return %c0_i32, %c0_i32_0 : i32, i32
  }
  func.func @transform_47(%arg0: i32) -> (i32, i32) {
    %c0_i32 = arith.constant 0 : i32
    %c0_i32_0 = arith.constant 0 : i32
    %c0_i32_1 = arith.constant 0 : i32
    return %c0_i32, %c0_i32_0 : i32, i32
  }
  func.func @transform_48(%arg0: i32) -> (i32, i32) {
    %c0_i32 = arith.constant 0 : i32
    %c0_i32_0 = arith.constant 0 : i32
    %c0_i32_1 = arith.constant 0 : i32
    return %c0_i32, %c0_i32_0 : i32, i32
  }
  func.func @transform_49(%arg0: i32) -> (i32, i32) {
    %c0_i32 = arith.constant 0 : i32
    %c0_i32_0 = arith.constant 0 : i32
    %c0_i32_1 = arith.constant 0 : i32
    return %c0_i32, %c0_i32_0 : i32, i32
  }
  func.func @transform_50(%arg0: i32) -> (i32, i32) {
    %c0_i32 = arith.constant 0 : i32
    %c0_i32_0 = arith.constant 0 : i32
    %c0_i32_1 = arith.constant 0 : i32
    return %c0_i32, %c0_i32_0 : i32, i32
  }
  func.func @transform_51(%arg0: i32) -> (i32, i32) {
    %c0_i32 = arith.constant 0 : i32
    %c0_i32_0 = arith.constant 0 : i32
    %c0_i32_1 = arith.constant 0 : i32
    return %c0_i32, %c0_i32_0 : i32, i32
  }
  func.func @transform_52(%arg0: i32) -> (i32, i32) {
    %c0_i32 = arith.constant 0 : i32
    %c0_i32_0 = arith.constant 0 : i32
    %c0_i32_1 = arith.constant 0 : i32
    return %c0_i32, %c0_i32_0 : i32, i32
  }
  func.func @transform_53(%arg0: i32) -> (i32, i32) {
    %c0_i32 = arith.constant 0 : i32
    %c0_i32_0 = arith.constant 0 : i32
    %c0_i32_1 = arith.constant 0 : i32
    return %c0_i32, %c0_i32_0 : i32, i32
  }
  func.func @transform_54(%arg0: i32) -> (i32, i32) {
    %c0_i32 = arith.constant 0 : i32
    %c0_i32_0 = arith.constant 0 : i32
    %c0_i32_1 = arith.constant 0 : i32
    return %c0_i32, %c0_i32_0 : i32, i32
  }
  func.func @transform_55(%arg0: i32) -> (i32, i32) {
    %c0_i32 = arith.constant 0 : i32
    %c0_i32_0 = arith.constant 0 : i32
    %c0_i32_1 = arith.constant 0 : i32
    return %c0_i32, %c0_i32_0 : i32, i32
  }
  func.func @transform_56(%arg0: i32) -> (i32, i32) {
    %c0_i32 = arith.constant 0 : i32
    %c0_i32_0 = arith.constant 0 : i32
    %c0_i32_1 = arith.constant 0 : i32
    return %c0_i32, %c0_i32_0 : i32, i32
  }
  func.func @transform_57(%arg0: i32) -> (i32, i32) {
    %c0_i32 = arith.constant 0 : i32
    %c0_i32_0 = arith.constant 0 : i32
    %c0_i32_1 = arith.constant 0 : i32
    return %c0_i32, %c0_i32_0 : i32, i32
  }
  func.func @transform_58(%arg0: i32) -> (i32, i32) {
    %c0_i32 = arith.constant 0 : i32
    %c0_i32_0 = arith.constant 0 : i32
    %c0_i32_1 = arith.constant 0 : i32
    return %c0_i32, %c0_i32_0 : i32, i32
  }
  func.func @transform_59(%arg0: i32) -> (i32, i32) {
    %c0_i32 = arith.constant 0 : i32
    %c0_i32_0 = arith.constant 0 : i32
    %c0_i32_1 = arith.constant 0 : i32
    return %c0_i32, %c0_i32_0 : i32, i32
  }
  func.func @transform_60(%arg0: i32) -> (i32, i32) {
    %c0_i32 = arith.constant 0 : i32
    %c0_i32_0 = arith.constant 0 : i32
    %c0_i32_1 = arith.constant 0 : i32
    return %c0_i32, %c0_i32_0 : i32, i32
  }
  func.func @transform_61(%arg0: i32) -> (i32, i32) {
    %c0_i32 = arith.constant 0 : i32
    %c0_i32_0 = arith.constant 0 : i32
    %c0_i32_1 = arith.constant 0 : i32
    return %c0_i32, %c0_i32_0 : i32, i32
  }
  func.func @transform_62(%arg0: i32) -> (i32, i32) {
    %c0_i32 = arith.constant 0 : i32
    %c0_i32_0 = arith.constant 0 : i32
    %c0_i32_1 = arith.constant 0 : i32
    return %c0_i32, %c0_i32_0 : i32, i32
  }
}

</mosaic_0001>

<bundles_post_ra>
// kernel: wdcnn_forward.1
= control target key start
LH: loop header
LB: loop body
LE: loop exit
PB: predicated region body
PF: predicated region fallthrough
CT: control target
= control target key end

     0   :  { %s10447_s6 = smov 1   ;;  %s10448_s10 = smov 3   ;;  %s12940_s0 = inlined_call_operand.smem [shape: u32[63], index: -1, kind: input, shape index: {}] }
   0x1   :  { %s10526_s5 = sld [smem:[%s12940_s0]]   ;;  %s10449_s14 = smov 6  }
   0x2   :  { %s7663_s9 = sld [smem:[%s12940_s0 + %s10447_s6]]   ;;  %s10450_s18 = smov 7  }
   0x3   :  { %s10534_s13 = sld [smem:[%s12940_s0 + %s10448_s10]]   ;;  %s10451_s22 = smov 8  }
   0x4   :  { %s10539_s17 = sld [smem:[%s12940_s0 + %s10449_s14]]   ;;  %s10452_s26 = smov 9  }
   0x5   :  { %s10544_s21 = sld [smem:[%s12940_s0 + %s10450_s18]]   ;;  %s10453_s30 = smov 10  }
   0x6   :  { %s10549_s25 = sld [smem:[%s12940_s0 + %s10451_s22]]   ;;  %s10454_s4 = smov 11  }
   0x7   :  { %s10554_s29 = sld [smem:[%s12940_s0 + %s10452_s26]]   ;;  %s10455_s10 = smov 12  }
   0x8   :  { %s10559_s3 = sld [smem:[%s12940_s0 + %s10453_s30]]   ;;  %v130_v0 = vstv %s7663_s9  ;;  %s10456_s15 = smov 13  }
   0x9   :  { %s10564_s8 = sld [smem:[%s12940_s0 + %s10454_s4]]   ;;  %131 = vst [vmem:[#allocation2] sm:$0x1] %v130_v0  ;;  %s10457_s9 = smov 14  }
   0xa   :  { %s10569_s14 = sld [smem:[%s12940_s0 + %s10455_s10]]   ;;  %s10458_s24 = smov 15  }
   0xb   :  { %s10574_s19 = sld [smem:[%s12940_s0 + %s10456_s15]]   ;;  %s10459_s30 = smov 16  }
   0xc   :  { %s10579_s23 = sld [smem:[%s12940_s0 + %s10457_s9]]   ;;  %s10460_s6 = smov 17  }
   0xd   :  { %s10584_s28 = sld [smem:[%s12940_s0 + %s10458_s24]]   ;;  %s10461_s12 = smov 18  }
   0xe   :  { %s10589_s4 = sld [smem:[%s12940_s0 + %s10459_s30]]   ;;  %s10462_s9 = smov 19  }
   0xf   :  { %s10594_s11 = sld [smem:[%s12940_s0 + %s10460_s6]]   ;;  %s10463_s26 = smov 20  }
  0x10   :  { %s10599_s18 = sld [smem:[%s12940_s0 + %s10461_s12]]   ;;  %s10464_s2 = smov 21  }
  0x11   :  { %s10604_s24 = sld [smem:[%s12940_s0 + %s10462_s9]]   ;;  %s10465_s12 = smov 22  }
  0x12   :  { %s10609_s1 = sld [smem:[%s12940_s0 + %s10463_s26]]   ;;  %s10466_s9 = smov 23  }
  0x13   :  { %12974 = sst [smem:[#allocation16_spill]] %s10584_s28  ;;  %s10467_s26 = smov 24  }
  0x14   :  { %12975 = sst [smem:[#allocation17_spill]] %s10589_s4  ;;  %s10507_s27 = smov 4  }
  0x15   :  { %12976 = sst [smem:[#allocation18_spill]] %s10594_s11  ;;  %s10508_s11 = smov 5  }
  0x16   :  { %12977 = sst [smem:[#allocation19_spill]] %s10599_s18 }
  0x17   :  { %12978 = sst [smem:[#allocation20_spill]] %s10604_s24 }
  0x18   :  { %12979 = sst [smem:[#allocation21_spill]] %s10609_s1 }
  0x19   :  { %s10614_s10 = sld [smem:[%s12940_s0 + %s10464_s2]]   ;;  %s10468_s2 = smov 25  }
  0x1a   :  { %s10619_s4 = sld [smem:[%s12940_s0 + %s10465_s12]]   ;;  %s10469_s12 = smov 26  }
  0x1b   :  { %s10624_s24 = sld [smem:[%s12940_s0 + %s10466_s9]]   ;;  %s10470_s9 = smov 27  }
  0x1c   :  { %s10629_s1 = sld [smem:[%s12940_s0 + %s10467_s26]]   ;;  %s10471_s26 = smov 28  }
  0x1d   :  { %s7667_s7 = sld [smem:[%s12940_s0 + %s10508_s11]]  }
  0x1f   :  { %12980 = sst [smem:[#allocation22_spill]] %s10614_s10 }
  0x20   :  { %12981 = sst [smem:[#allocation23_spill]] %s10619_s4 }
  0x21   :  { %12982 = sst [smem:[#allocation24_spill]] %s10624_s24 }
  0x22   :  { %12983 = sst [smem:[#allocation25_spill]] %s10629_s1 }
  0x23   :  { %s10634_s10 = sld [smem:[%s12940_s0 + %s10468_s2]]   ;;  %s10472_s2 = smov 29   ;;  %v136_v3 = vstv %s7667_s7 }
  0x24   :  { %s10639_s4 = sld [smem:[%s12940_s0 + %s10469_s12]]   ;;  %s10473_s12 = smov 30   ;;  %137 = vst [vmem:[#allocation5] sm:$0x1] %v136_v3 }
  0x25   :  { %s10644_s24 = sld [smem:[%s12940_s0 + %s10470_s9]]   ;;  %s10474_s9 = smov 31  }
  0x26   :  { %s10649_s1 = sld [smem:[%s12940_s0 + %s10471_s26]]   ;;  %s10475_s26 = smov 32  }
  0x29   :  { %12984 = sst [smem:[#allocation26_spill]] %s10634_s10 }
  0x2a   :  { %12985 = sst [smem:[#allocation27_spill]] %s10639_s4 }
  0x2b   :  { %12986 = sst [smem:[#allocation28_spill]] %s10644_s24 }
  0x2c   :  { %12987 = sst [smem:[#allocation29_spill]] %s10649_s1 }
  0x2d   :  { %s10654_s10 = sld [smem:[%s12940_s0 + %s10472_s2]]   ;;  %s10476_s2 = smov 33  }
  0x2e   :  { %s10659_s4 = sld [smem:[%s12940_s0 + %s10473_s12]]   ;;  %s10477_s12 = smov 34  }
  0x2f   :  { %s10664_s24 = sld [smem:[%s12940_s0 + %s10474_s9]]   ;;  %s10478_s9 = smov 35  }
  0x30   :  { %s10669_s1 = sld [smem:[%s12940_s0 + %s10475_s26]]   ;;  %s10479_s26 = smov 36  }
  0x33   :  { %12988 = sst [smem:[#allocation30_spill]] %s10654_s10 }
  0x34   :  { %12989 = sst [smem:[#allocation31_spill]] %s10659_s4 }
  0x35   :  { %12990 = sst [smem:[#allocation32_spill]] %s10664_s24 }
  0x36   :  { %12991 = sst [smem:[#allocation33_spill]] %s10669_s1 }
  0x37   :  { %s10674_s10 = sld [smem:[%s12940_s0 + %s10476_s2]]   ;;  %s10480_s2 = smov 37  }
  0x38   :  { %s10679_s4 = sld [smem:[%s12940_s0 + %s10477_s12]]   ;;  %s10481_s12 = smov 38  }
  0x39   :  { %s10684_s24 = sld [smem:[%s12940_s0 + %s10478_s9]]   ;;  %s10482_s9 = smov 39  }
  0x3a   :  { %s10689_s1 = sld [smem:[%s12940_s0 + %s10479_s26]]   ;;  %s10483_s26 = smov 40  }
  0x3d   :  { %12992 = sst [smem:[#allocation34_spill]] %s10674_s10 }
  0x3e   :  { %12993 = sst [smem:[#allocation35_spill]] %s10679_s4 }
  0x3f   :  { %12994 = sst [smem:[#allocation36_spill]] %s10684_s24 }
  0x40   :  { %12995 = sst [smem:[#allocation37_spill]] %s10689_s1 }
  0x41   :  { %s10694_s10 = sld [smem:[%s12940_s0 + %s10480_s2]]   ;;  %s10484_s2 = smov 41  }
  0x42   :  { %s10699_s4 = sld [smem:[%s12940_s0 + %s10481_s12]]   ;;  %s10485_s12 = smov 42  }
  0x43   :  { %s10704_s24 = sld [smem:[%s12940_s0 + %s10482_s9]]   ;;  %s10486_s9 = smov 43  }
  0x44   :  { %s10709_s1 = sld [smem:[%s12940_s0 + %s10483_s26]]   ;;  %s10487_s26 = smov 44  }
  0x47   :  { %12996 = sst [smem:[#allocation38_spill]] %s10694_s10 }
  0x48   :  { %12997 = sst [smem:[#allocation39_spill]] %s10699_s4 }
  0x49   :  { %12998 = sst [smem:[#allocation40_spill]] %s10704_s24 }
  0x4a   :  { %12999 = sst [smem:[#allocation41_spill]] %s10709_s1 }
  0x4b   :  { %s10714_s10 = sld [smem:[%s12940_s0 + %s10484_s2]]   ;;  %s10488_s2 = smov 45  }
  0x4c   :  { %s10719_s4 = sld [smem:[%s12940_s0 + %s10485_s12]]   ;;  %s10489_s12 = smov 46  }
  0x4d   :  { %s10724_s24 = sld [smem:[%s12940_s0 + %s10486_s9]]   ;;  %s10490_s9 = smov 47  }
  0x4e   :  { %s10729_s1 = sld [smem:[%s12940_s0 + %s10487_s26]]   ;;  %s10491_s26 = smov 48  }
  0x51   :  { %13000 = sst [smem:[#allocation42_spill]] %s10714_s10 }
  0x52   :  { %13001 = sst [smem:[#allocation43_spill]] %s10719_s4 }
  0x53   :  { %13002 = sst [smem:[#allocation44_spill]] %s10724_s24 }
  0x54   :  { %13003 = sst [smem:[#allocation45_spill]] %s10729_s1 }
  0x55   :  { %s10734_s10 = sld [smem:[%s12940_s0 + %s10488_s2]]   ;;  %s10492_s2 = smov 49  }
  0x56   :  { %s10739_s4 = sld [smem:[%s12940_s0 + %s10489_s12]]   ;;  %s10493_s12 = smov 50  }
  0x57   :  { %s10744_s24 = sld [smem:[%s12940_s0 + %s10490_s9]]   ;;  %s10494_s9 = smov 51  }
  0x58   :  { %s10749_s1 = sld [smem:[%s12940_s0 + %s10491_s26]]   ;;  %s10495_s26 = smov 52  }
  0x5b   :  { %13004 = sst [smem:[#allocation46_spill]] %s10734_s10 }
  0x5c   :  { %13005 = sst [smem:[#allocation47_spill]] %s10739_s4 }
  0x5d   :  { %13006 = sst [smem:[#allocation48_spill]] %s10744_s24 }
  0x5e   :  { %13007 = sst [smem:[#allocation49_spill]] %s10749_s1 }
  0x5f   :  { %s10754_s10 = sld [smem:[%s12940_s0 + %s10492_s2]]   ;;  %s10496_s2 = smov 53  }
  0x60   :  { %s10759_s4 = sld [smem:[%s12940_s0 + %s10493_s12]]   ;;  %s10497_s12 = smov 54  }
  0x61   :  { %s10764_s24 = sld [smem:[%s12940_s0 + %s10494_s9]]   ;;  %s10498_s9 = smov 55  }
  0x62   :  { %s10769_s1 = sld [smem:[%s12940_s0 + %s10495_s26]]   ;;  %s10499_s26 = smov 56  }
  0x63   :  { %s10784_s18 = sld [smem:[%s12940_s0 + %s10498_s9]]   ;;  %s10502_s9 = smov 59  }
  0x64   :  { %s10789_s28 = sld [smem:[%s12940_s0 + %s10499_s26]]   ;;  %s10503_s26 = smov 60  }
  0x65   :  { %13008 = sst [smem:[#allocation50_spill]] %s10754_s10 }
  0x66   :  { %13009 = sst [smem:[#allocation51_spill]] %s10759_s4 }
  0x67   :  { %s10774_s10 = sld [smem:[%s12940_s0 + %s10496_s2]]   ;;  %s10500_s2 = smov 57  }
  0x68   :  { %s10779_s4 = sld [smem:[%s12940_s0 + %s10497_s12]]   ;;  %s10501_s12 = smov 58  }
  0x69   :  { %13012 = sst [smem:[#allocation54_spill]] %s10784_s18 }
  0x6a   :  { %13013 = sst [smem:[#allocation55_spill]] %s10789_s28 }
  0x6b   :  { %s10804_s18 = sld [smem:[%s12940_s0 + %s10502_s9]]   ;;  %s10506_s9 = smov 2  }
  0x6c   :  { %s10809_s28 = sld [smem:[%s12940_s0 + %s10503_s26]]  }
  0x6d   :  { %13010 = sst [smem:[#allocation52_spill]] %s10774_s10 }
  0x6e   :  { %13011 = sst [smem:[#allocation53_spill]] %s10779_s4 }
  0x6f   :  { %s10794_s10 = sld [smem:[%s12940_s0 + %s10500_s2]]   ;;  %s10504_s2 = smov 61  }
  0x70   :  { %s10799_s4 = sld [smem:[%s12940_s0 + %s10501_s12]]   ;;  %s10505_s12 = smov 62  }
  0x71   :  { %13016 = sst [smem:[#allocation58_spill]] %s10804_s18 }
  0x72   :  { %13017 = sst [smem:[#allocation59_spill]] %s10809_s28 }
  0x73   :  { %s7664_s18 = sld [smem:[%s12940_s0 + %s10506_s9]]  }
  0x74   :  { %s7666_s28 = sld [smem:[%s12940_s0 + %s10507_s27]]  }
  0x75   :  { %13014 = sst [smem:[#allocation56_spill]] %s10794_s10 }
  0x76   :  { %13015 = sst [smem:[#allocation57_spill]] %s10799_s4 }
  0x77   :  { %s10814_s10 = sld [smem:[%s12940_s0 + %s10504_s2]]  }
  0x78   :  { %s10819_s4 = sld [smem:[%s12940_s0 + %s10505_s12]]  }
  0x79   :  { %v132_v1 = vstv %s7664_s18 }
  0x7a   :  { %133 = vst [vmem:[#allocation3] sm:$0x1] %v132_v1  ;;  %v134_v2 = vstv %s7666_s28 }
  0x7b   :  { %135 = vst [vmem:[#allocation4] sm:$0x1] %v134_v2 }
  0x7c   :  { %138 = vsyncpa [#allocation7], 0 }
  0x7d   :  { %139 = vsyncpa [#allocation10], 0 }
  0x7e   :  { %140 = vsyncpa [#allocation8], 0  ;;  %s10509_s12 = smov [#allocation9]   ;;  %s10510_s16 = smov [#allocation6]  }
  0x7f   :  { %s259_s15 = sshll.u32 %s10509_s12, 4  ;;  %s249_s9 = sshll.u32 %s10510_s16, 4  ;;  %s260_s15 = int_to_ptr.vmem [resolvable:$true] %s259_s15  ;;  %s250_s9 = int_to_ptr.vmem [resolvable:$true] %s249_s9 }
  0x80   :  { %s10353_s20 = scalar_lea.hbm %s10769_s1, 16 }
  0x81   :  { %p10354_p0 = scmp.ne.s32.totalorder %s10769_s1, %s10353_s20  ;;  %p10357_p1 = scmp.lt.u32.totalorder %s10353_s20, %s10769_s1 }
  0x83   :  { %p10359_p2 = pnand %p10357_p1, %p10354_p0 }
  0x85   :  { %10362 = shalt.err (!%p10359_p2)
}
  0x86   :  { %s10363_s0 = scalar_lea.vmem %s260_s15, 16  ;;  %s10367_s28 = scalar_lea.vmem %s260_s15, 32 }
  0x87   :  { %p10364_p3 = scmp.ne.s32.totalorder %s260_s15, %s10363_s0  ;;  %p10368_p4 = scmp.lt.s32.totalorder %s260_s15, %s260_s15 }
  0x88   :  { %p10369_p5 = scmp.lt.s32.totalorder %s10367_s28, %s10363_s0 }
  0x8a   :  { %p10370_p6 = por %p10369_p5, %p10368_p4 }
  0x8c   :  { %p10371_p7 = pnand %p10370_p6, %p10364_p3 }
  0x8e   :  { %10374 = shalt.err (!%p10371_p7)
}
  0x8f   :  { %262 = dma.hbm_to_vmem [thread:$0]  %s10769_s1, 16, %s260_s15, [#allocation10]  }
  0x90   :  { %s10375_s11 = scalar_lea.hbm %s10764_s24, 16 }
  0x91   :  { %p10376_p8 = scmp.ne.s32.totalorder %s10764_s24, %s10375_s11  ;;  %p10379_p9 = scmp.lt.u32.totalorder %s10375_s11, %s10764_s24 }
  0x93   :  { %p10381_p10 = pnand %p10379_p9, %p10376_p8 }
  0x95   :  { %10384 = shalt.err (!%p10381_p10)
}
  0x96   :  { %s10385_s18 = scalar_lea.vmem %s250_s9, 16  ;;  %s10389_s22 = scalar_lea.vmem %s250_s9, 32 }
  0x97   :  { %p10386_p11 = scmp.ne.s32.totalorder %s250_s9, %s10385_s18  ;;  %p10390_p12 = scmp.lt.s32.totalorder %s250_s9, %s250_s9 }
  0x98   :  { %p10391_p13 = scmp.lt.s32.totalorder %s10389_s22, %s10385_s18 }
  0x9a   :  { %p10392_p0 = por %p10391_p13, %p10390_p12 }
  0x9c   :  { %p10393_p1 = pnand %p10392_p0, %p10386_p11 }
  0x9e   :  { %10396 = shalt.err (!%p10393_p1)
}
  0x9f   :  { %252 = dma.hbm_to_vmem [thread:$0]  %s10764_s24, 16, %s250_s9, [#allocation7]  }
  0xa0   :  { %s10511_s27 = smov [#allocation11]   ;;  %s10397_s26 = scalar_lea.hbm %s10814_s10, 16 }
  0xa1   :  { %s285_s1 = sshll.u32 %s10511_s27, 4  ;;  %p10398_p2 = scmp.ne.s32.totalorder %s10814_s10, %s10397_s26  ;;  %s286_s1 = int_to_ptr.vmem [resolvable:$true] %s285_s1 }
  0xa2   :  { %p10401_p3 = scmp.lt.u32.totalorder %s10397_s26, %s10814_s10 }
  0xa4   :  { %p10403_p4 = pnand %p10401_p3, %p10398_p2 }
  0xa6   :  { %10406 = shalt.err (!%p10403_p4)
}
  0xa7   :  { %s10407_s30 = scalar_lea.vmem %s286_s1, 16  ;;  %s10411_s6 = scalar_lea.vmem %s286_s1, 32 }
  0xa8   :  { %p10408_p5 = scmp.ne.s32.totalorder %s286_s1, %s10407_s30  ;;  %p10412_p6 = scmp.lt.s32.totalorder %s286_s1, %s286_s1 }
  0xa9   :  { %p10413_p7 = scmp.lt.s32.totalorder %s10411_s6, %s10407_s30 }
  0xab   :  { %p10414_p8 = por %p10413_p7, %p10412_p6 }
  0xad   :  { %p10415_p9 = pnand %p10414_p8, %p10408_p5 }
  0xaf   :  { %10418 = shalt.err (!%p10415_p9)
}
  0xb0   :  { %288 = dma.hbm_to_vmem [thread:$0]  %s10814_s10, 16, %s286_s1, [#allocation10]  }
  0xb1   :  { %10441 = dma.done.wait [#allocation7], 16  }
  0xb2   :  { %10442 = vsyncadd [#allocation7], 4294967280 }
  0xb3   :  { %10443 = dma.done.wait [#allocation10], 32  }
  0xb4   :  { %10444 = vsyncadd [#allocation10], 4294967264  ;;  %v338_v4 = vlaneseq  ;;  %v10849_v9 = vld [vmem:[%s10534_s13] sm:$0xff]  ;;  %vm498_vm0 = vcmask 1040384   ;;  %v10881_v29 = vld [vmem:[%s10534_s13 + $0x8] sm:$0xff]  ;;  %vm1624_vm5 = vcmask 523264  }
  0xb5   :  { %v10893_v40 = vld [vmem:[%s10526_s5] sm:$0xff]  ;;  %v10927_v2 = vld [vmem:[%s10534_s13 + $0x10] sm:$0xff]  ;;  %vm2333_vm6 = vcmask 130048   ;;  %vm4051_vm9 = vcmask 261120   ;;  %s13029_s24 = sld [smem:[#allocation23_spill]]  ;;  %s13030_s10 = sld [smem:[#allocation29_spill]] }
  0xb6   :  { %v339_v5 = vshrl.u32 %v338_v4, 7  ;;  %s13031_s2 = sld [smem:[#allocation30_spill]]  ;;  %s13032_s7 = sld [smem:[#allocation27_spill]] }
  0xb7   :  { %s13033_s12 = sld [smem:[#allocation31_spill]]  ;;  %s13034_s15 = sld [smem:[#allocation34_spill]] }
  0xb8   :  { %v10842_v6 = vsub.s32 0, %v339_v5  ;;  %v10844_v7 = vsub.s32 1, %v339_v5  ;;  %v10846_v8 = vsub.s32 2, %v339_v5  ;;  %v10851_v10 = vsub.s32 3, %v339_v5  ;;  %s13035_s16 = sld [smem:[#allocation35_spill]]  ;;  %s13036_s9 = sld [smem:[#allocation32_spill]] }
  0xb9   :  { %v10853_v11 = vsub.s32 4, %v339_v5  ;;  %v10861_v15 = vsub.s32 5, %v339_v5  ;;  %v10865_v17 = vsub.s32 6, %v339_v5  ;;  %v10872_v23 = vsub.s32 7, %v339_v5  ;;  %s13037_s20 = sld [smem:[#allocation38_spill]]  ;;  %s13038_s0 = sld [smem:[#allocation36_spill]] }
  0xba   :  { %v989_v12 = vrot.slane %v10849_v9, %v10842_v6  ;;  %v993_v13 = vrot.slane %v10849_v9, %v10844_v7  ;;  %v997_v14 = vrot.slane %v10849_v9, %v10846_v8  ;;  %v1001_v16 = vrot.slane %v10849_v9, %v10851_v10  ;;  %s13039_s28 = sld [smem:[#allocation33_spill]]  ;;  %s13040_s11 = sld [smem:[#allocation39_spill]] }
  0xbb   :  { %v1005_v18 = vrot.slane %v10849_v9, %v10853_v11  ;;  %v1009_v24 = vrot.slane %v10849_v9, %v10861_v15  ;;  %v1013_v27 = vrot.slane %v10849_v9, %v10865_v17  ;;  %v1017_v31 = vrot.slane %v10849_v9, %v10872_v23  ;;  %s13041_s18 = sld [smem:[#allocation40_spill]]  ;;  %s13042_s22 = sld [smem:[#allocation37_spill]] }
  0xbc   :  { %v1146_v19 = vsel %vm498_vm0, %v989_v12, 0.0  ;;  %v1147_v20 = vsel %vm498_vm0, %v993_v13, 0.0  ;;  %v1149_v21 = vsel %vm498_vm0, %v997_v14, 0.0  ;;  %v1151_v25 = vsel %vm498_vm0, %v1001_v16, 0.0  ;;  %s13043_s27 = sld [smem:[#allocation41_spill]]  ;;  %s13044_s1 = sld [smem:[#allocation44_spill]] }
  0xbd   :  { %v1148_v22 = vadd.f32 %v1147_v20, %v1146_v19  ;;  %v1153_v28 = vsel %vm498_vm0, %v1005_v18, 0.0  ;;  %v1155_v32 = vsel %vm498_vm0, %v1009_v24, 0.0  ;;  %v1021_v34 = vrot.slane %v10881_v29, %v10842_v6  ;;  %v10936_v18 = vld [vmem:[%s10526_s5 + $0x8] sm:$0xff]  ;;  %s13045_s26 = sld [smem:[#allocation45_spill]]  ;;  %s13046_s30 = sld [smem:[#allocation42_spill]] }
  0xbe   :  { %v1157_v35 = vsel %vm498_vm0, %v1013_v27, 0.0  ;;  %v1025_v37 = vrot.slane %v10881_v29, %v10844_v7  ;;  %v1159_v38 = vsel %vm498_vm0, %v1017_v31, 0.0  ;;  %v1029_v41 = vrot.slane %v10881_v29, %v10846_v8  ;;  %s13047_s6 = sld [smem:[#allocation46_spill]] }
  0xbf   :  { %v1150_v26 = vadd.f32 %v1149_v21, %v1148_v22  ;;  %v1161_v42 = vsel %vm498_vm0, %v1021_v34, 0.0  ;;  %v1033_v43 = vrot.slane %v10881_v29, %v10851_v10  ;;  %v341_v46 = vrot.slane %v10893_v40, %v10842_v6 }
  0xc0   :  { %v1163_v45 = vsel %vm498_vm0, %v1025_v37, 0.0  ;;  %v345_v47 = vrot.slane %v10893_v40, %v10844_v7  ;;  %v349_v48 = vrot.slane %v10893_v40, %v10846_v8  ;;  %v1037_v50 = vrot.slane %v10881_v29, %v10853_v11 }
  0xc1   :  { %v1152_v30 = vadd.f32 %v1151_v25, %v1150_v26  ;;  %v1165_v51 = vsel %vm498_vm0, %v1029_v41, 0.0  ;;  %v353_v52 = vrot.slane %v10893_v40, %v10851_v10  ;;  %v1041_v53 = vrot.slane %v10881_v29, %v10861_v15 }
  0xc2   :  { %v1167_v55 = vsel %vm498_vm0, %v1033_v43, 0.0  ;;  %v357_v56 = vrot.slane %v10893_v40, %v10853_v11  ;;  %v499_v57 = vsel %vm498_vm0, %v341_v46, 0.0  ;;  %v500_v58 = vsel %vm498_vm0, %v345_v47, 0.0 }
  0xc3   :  { %v1154_v33 = vadd.f32 %v1153_v28, %v1152_v30  ;;  %v502_v59 = vsel %vm498_vm0, %v349_v48, 0.0  ;;  %v501_v61 = vadd.f32 %v500_v58, %v499_v57  ;;  %v1045_v62 = vrot.slane %v10881_v29, %v10865_v17 }
  0xc4   :  { %v1169_v63 = vsel %vm498_vm0, %v1037_v50, 0.0  ;;  %v361_v0 = vrot.slane %v10893_v40, %v10861_v15  ;;  %v504_v1 = vsel %vm498_vm0, %v353_v52, 0.0  ;;  %v1049_v5 = vrot.slane %v10881_v29, %v10872_v23 }
  0xc5   :  { %v1156_v36 = vadd.f32 %v1155_v32, %v1154_v33  ;;  %v503_v4 = vadd.f32 %v502_v59, %v501_v61  ;;  %v1171_v12 = vsel %vm498_vm0, %v1041_v53, 0.0  ;;  %v365_v13 = vrot.slane %v10893_v40, %v10865_v17 }
  0xc6   :  { %v506_v14 = vsel %vm498_vm0, %v357_v56, 0.0  ;;  %v1053_v20 = vrot.slane %v10927_v2, %v10842_v6  ;;  %v1173_v21 = vsel %vm498_vm0, %v1045_v62, 0.0  ;;  %v369_v22 = vrot.slane %v10893_v40, %v10872_v23 }
  0xc7   :  { %v1158_v39 = vadd.f32 %v1157_v35, %v1156_v36  ;;  %v505_v19 = vadd.f32 %v504_v1, %v503_v4  ;;  %v508_v24 = vsel %vm498_vm0, %v361_v0, 0.0  ;;  %v1057_v27 = vrot.slane %v10927_v2, %v10844_v7 }
  0xc8   :  { %v1175_v28 = vsel %vm498_vm0, %v1049_v5, 0.0  ;;  %v373_v30 = vrot.slane %v10936_v18, %v10842_v6  ;;  %v510_v31 = vsel %vm498_vm0, %v365_v13, 0.0  ;;  %v1061_v34 = vrot.slane %v10927_v2, %v10846_v8 }
  0xc9   :  { %v1160_v44 = vadd.f32 %v1159_v38, %v1158_v39  ;;  %v507_v26 = vadd.f32 %v506_v14, %v505_v19  ;;  %v1177_v35 = vsel %vm498_vm0, %v1053_v20, 0.0  ;;  %v377_v36 = vrot.slane %v10936_v18, %v10844_v7  ;;  %v10990_v14 = vld [vmem:[%s10526_s5 + $0x10] sm:$0xff] }
  0xca   :  { %v512_v37 = vsel %vm498_vm0, %v369_v22, 0.0  ;;  %v1065_v41 = vrot.slane %v10927_v2, %v10851_v10  ;;  %v381_v43 = vrot.slane %v10936_v18, %v10846_v8  ;;  %v1069_v47 = vrot.slane %v10927_v2, %v10853_v11 }
  0xcb   :  { %v1162_v49 = vadd.f32 %v1161_v42, %v1160_v44  ;;  %v509_v33 = vadd.f32 %v508_v24, %v507_v26  ;;  %v1179_v42 = vsel %vm498_vm0, %v1057_v27, 0.0  ;;  %v514_v44 = vsel %vm498_vm0, %v373_v30, 0.0 }
  0xcc   :  { %v1181_v48 = vsel %vm498_vm0, %v1061_v34, 0.0  ;;  %v516_v50 = vsel %vm498_vm0, %v377_v36, 0.0  ;;  %v1073_v53 = vrot.slane %v10927_v2, %v10861_v15  ;;  %v518_v56 = vsel %vm498_vm0, %v381_v43, 0.0 }
  0xcd   :  { %v1164_v54 = vadd.f32 %v1163_v45, %v1162_v49  ;;  %v511_v39 = vadd.f32 %v510_v31, %v509_v33  ;;  %v385_v49 = vrot.slane %v10936_v18, %v10851_v10  ;;  %v1077_v59 = vrot.slane %v10927_v2, %v10865_v17 }
  0xce   :  { %v393_v61 = vrot.slane %v10936_v18, %v10861_v15  ;;  %v1187_v4 = vsel %vm498_vm0, %v1073_v53, 0.0  ;;  %v397_v5 = vrot.slane %v10936_v18, %v10865_v17 }
  0xcf   :  { %v1166_v60 = vadd.f32 %v1165_v51, %v1164_v54  ;;  %v513_v46 = vadd.f32 %v512_v37, %v511_v39  ;;  %v1183_v54 = vsel %vm498_vm0, %v1065_v41, 0.0  ;;  %v520_v62 = vsel %vm498_vm0, %v385_v49, 0.0 }
  0xd0   :  { %v1189_v20 = vsel %vm498_vm0, %v1077_v59, 0.0  ;;  %v524_v22 = vsel %vm498_vm0, %v393_v61, 0.0  ;;  %v526_v30 = vsel %vm498_vm0, %v397_v5, 0.0 }
  0xd1   :  { %v1168_v3 = vadd.f32 %v1167_v55, %v1166_v60  ;;  %v515_v52 = vadd.f32 %v514_v44, %v513_v46  ;;  %v389_v55 = vrot.slane %v10936_v18, %v10853_v11  ;;  %v1185_v60 = vsel %vm498_vm0, %v1069_v47, 0.0 }
  0xd3   :  { %v1170_v16 = vadd.f32 %v1169_v63, %v1168_v3  ;;  %v517_v58 = vadd.f32 %v516_v50, %v515_v52  ;;  %v10981_v63 = vld [vmem:[%s10534_s13 + $0x18] sm:$0xff]  ;;  %v1081_v3 = vrot.slane %v10927_v2, %v10872_v23  ;;  %s13019_s13 = sld [smem:[#allocation16_spill]] }
  0xd4   :  { %v1085_v19 = vrot.slane %v10981_v63, %v10842_v6  ;;  %v1089_v26 = vrot.slane %v10981_v63, %v10844_v7  ;;  %v1093_v33 = vrot.slane %v10981_v63, %v10846_v8  ;;  %v1097_v39 = vrot.slane %v10981_v63, %v10851_v10 }
  0xd5   :  { %v1172_v25 = vadd.f32 %v1171_v12, %v1170_v16  ;;  %v519_v1 = vadd.f32 %v518_v56, %v517_v58  ;;  %v522_v12 = vsel %vm498_vm0, %v389_v55, 0.0  ;;  %v1191_v27 = vsel %vm498_vm0, %v1081_v3, 0.0 }
  0xd6   :  { %v1193_v34 = vsel %vm498_vm0, %v1085_v19, 0.0  ;;  %v1195_v41 = vsel %vm498_vm0, %v1089_v26, 0.0  ;;  %v1101_v46 = vrot.slane %v10981_v63, %v10853_v11  ;;  %v1197_v47 = vsel %vm498_vm0, %v1093_v33, 0.0 }
  0xd7   :  { %v1174_v32 = vadd.f32 %v1173_v21, %v1172_v25  ;;  %v521_v16 = vadd.f32 %v520_v62, %v519_v1  ;;  %v401_v21 = vrot.slane %v10936_v18, %v10872_v23  ;;  %v1105_v52 = vrot.slane %v10981_v63, %v10861_v15 }
  0xd8   :  { %v1199_v53 = vsel %vm498_vm0, %v1097_v39, 0.0  ;;  %v1109_v58 = vrot.slane %v10981_v63, %v10865_v17  ;;  %v1201_v59 = vsel %vm498_vm0, %v1101_v46, 0.0  ;;  %v1113_v1 = vrot.slane %v10981_v63, %v10872_v23 }
  0xd9   :  { %v1176_v38 = vadd.f32 %v1175_v28, %v1174_v32  ;;  %v523_v25 = vadd.f32 %v522_v12, %v521_v16  ;;  %v405_v28 = vrot.slane %v10990_v14, %v10842_v6  ;;  %v528_v36 = vsel %vm498_vm0, %v401_v21, 0.0 }
  0xda   :  { %v1203_v3 = vsel %vm498_vm0, %v1105_v52, 0.0  ;;  %v1205_v19 = vsel %vm498_vm0, %v1109_v58, 0.0 }
  0xdb   :  { %v1178_v45 = vadd.f32 %v1177_v35, %v1176_v38  ;;  %v525_v32 = vadd.f32 %v524_v22, %v523_v25  ;;  %v409_v35 = vrot.slane %v10990_v14, %v10844_v7  ;;  %v530_v43 = vsel %vm498_vm0, %v405_v28, 0.0 }
  0xdc   :  { %v1207_v25 = vsel %vm498_vm0, %v1113_v1, 0.0 }
  0xdd   :  { %v1180_v51 = vadd.f32 %v1179_v42, %v1178_v45  ;;  %v527_v38 = vadd.f32 %v526_v30, %v525_v32  ;;  %v413_v42 = vrot.slane %v10990_v14, %v10846_v8  ;;  %v532_v49 = vsel %vm498_vm0, %v409_v35, 0.0 }
  0xdf   :  { %v1182_v57 = vadd.f32 %v1181_v48, %v1180_v51  ;;  %v529_v45 = vadd.f32 %v528_v36, %v527_v38  ;;  %v417_v48 = vrot.slane %v10990_v14, %v10851_v10  ;;  %v534_v55 = vsel %vm498_vm0, %v413_v42, 0.0 }
  0xe1   :  { %v1184_v0 = vadd.f32 %v1183_v54, %v1182_v57  ;;  %v531_v51 = vadd.f32 %v530_v43, %v529_v45  ;;  %v421_v54 = vrot.slane %v10990_v14, %v10853_v11  ;;  %v536_v61 = vsel %vm498_vm0, %v417_v48, 0.0 }
  0xe3   :  { %v1186_v13 = vadd.f32 %v1185_v60, %v1184_v0  ;;  %v533_v57 = vadd.f32 %v532_v49, %v531_v51  ;;  %v425_v60 = vrot.slane %v10990_v14, %v10861_v15  ;;  %v538_v5 = vsel %vm498_vm0, %v421_v54, 0.0 }
  0xe5   :  { %v1188_v24 = vadd.f32 %v1187_v4, %v1186_v13  ;;  %v535_v0 = vadd.f32 %v534_v55, %v533_v57  ;;  %v429_v4 = vrot.slane %v10990_v14, %v10865_v17  ;;  %v11041_v13 = vld [vmem:[%s10526_s5 + $0x18] sm:$0xff]  ;;  %v540_v21 = vsel %vm498_vm0, %v425_v60, 0.0  ;;  %s13018_s5 = sld [smem:[#allocation18_spill]] }
  0xe6   :  { %v437_v26 = vrot.slane %v11041_v13, %v10842_v6  ;;  %v445_v35 = vrot.slane %v11041_v13, %v10846_v8  ;;  %v449_v38 = vrot.slane %v11041_v13, %v10851_v10  ;;  %v453_v42 = vrot.slane %v11041_v13, %v10853_v11 }
  0xe7   :  { %v1190_v31 = vadd.f32 %v1189_v20, %v1188_v24  ;;  %v537_v16 = vadd.f32 %v536_v61, %v535_v0  ;;  %v433_v20 = vrot.slane %v10990_v14, %v10872_v23  ;;  %v457_v45 = vrot.slane %v11041_v13, %v10861_v15 }
  0xe8   :  { %v546_v36 = vsel %vm498_vm0, %v437_v26, 0.0  ;;  %v550_v43 = vsel %vm498_vm0, %v445_v35, 0.0  ;;  %v552_v46 = vsel %vm498_vm0, %v449_v38, 0.0  ;;  %v461_v48 = vrot.slane %v11041_v13, %v10865_v17 }
  0xe9   :  { %v1192_v37 = vadd.f32 %v1191_v27, %v1190_v31  ;;  %v539_v24 = vadd.f32 %v538_v5, %v537_v16  ;;  %v542_v27 = vsel %vm498_vm0, %v429_v4, 0.0  ;;  %v441_v31 = vrot.slane %v11041_v13, %v10844_v7 }
  0xea   :  { %v544_v32 = vsel %vm498_vm0, %v433_v20, 0.0  ;;  %v554_v49 = vsel %vm498_vm0, %v453_v42, 0.0  ;;  %v465_v51 = vrot.slane %v11041_v13, %v10872_v23  ;;  %v556_v52 = vsel %vm498_vm0, %v457_v45, 0.0 }
  0xeb   :  { %v1194_v44 = vadd.f32 %v1193_v34, %v1192_v37  ;;  %v541_v30 = vadd.f32 %v540_v21, %v539_v24  ;;  %v548_v39 = vsel %vm498_vm0, %v441_v31, 0.0  ;;  %v558_v54 = vsel %vm498_vm0, %v461_v48, 0.0 }
  0xed   :  { %v1196_v50 = vadd.f32 %v1195_v41, %v1194_v44  ;;  %v543_v34 = vadd.f32 %v542_v27, %v541_v30 }
  0xef   :  { %v1198_v56 = vadd.f32 %v1197_v47, %v1196_v50  ;;  %v545_v37 = vadd.f32 %v544_v32, %v543_v34 }
  0xf1   :  { %v1200_v62 = vadd.f32 %v1199_v53, %v1198_v56  ;;  %v547_v41 = vadd.f32 %v546_v36, %v545_v37  ;;  %v560_v56 = vsel %vm498_vm0, %v465_v51, 0.0 }
  0xf3   :  { %v1202_v12 = vadd.f32 %v1201_v59, %v1200_v62  ;;  %v549_v44 = vadd.f32 %v548_v39, %v547_v41 }
  0xf5   :  { %v1204_v22 = vadd.f32 %v1203_v3, %v1202_v12  ;;  %v551_v47 = vadd.f32 %v550_v43, %v549_v44 }
  0xf7   :  { %v1206_v28 = vadd.f32 %v1205_v19, %v1204_v22  ;;  %v553_v50 = vadd.f32 %v552_v46, %v551_v47 }
  0xf9   :  { %v1208_v33 = vadd.f32 %v1207_v25, %v1206_v28  ;;  %v555_v53 = vadd.f32 %v554_v49, %v553_v50 }
  0xfb   :  { %1209 = vadd.xlane.f32.xlu0 %v1208_v33  ;;  %v557_v55 = vadd.f32 %v556_v52, %v555_v53 }
  0xfd   :  { %v559_v57 = vadd.f32 %v558_v54, %v557_v55 }
  0xff   :  { %v561_v58 = vadd.f32 %v560_v56, %v559_v57 }
 0x101   :  { %562 = vadd.xlane.f32.xlu0 %v561_v58 }
 0x188   :  { %v1210_v59 = vpop.xlane.xlu0 %1209 }
 0x189   :  { %v11074_v60 = vmul.f32 0.00024414063, %v1210_v59 }
 0x18b   :  { %v11078_v61 = vrot.slane %v11074_v60, %v10842_v6 }
 0x18d   :  { %v1218_v62 = vsub.f32 %v10849_v9, %v11078_v61  ;;  %v1219_v26 = vsub.f32 %v10881_v29, %v11078_v61 }
 0x18e   :  { %v563_v28 = vpop.xlane.xlu0 %562 }
 0x18f   :  { %v1222_v0 = vmul.f32 %v1218_v62, %v1218_v62  ;;  %v11096_v32 = vmul.f32 0.00024414063, %v563_v28  ;;  %v11103_v36 = vmul.f32 %v1219_v26, %v1219_v26 }
 0x191   :  { %v1233_v1 = vrot.slane %v1222_v0, %v10842_v6  ;;  %v1237_v3 = vrot.slane %v1222_v0, %v10844_v7  ;;  %v1241_v4 = vrot.slane %v1222_v0, %v10846_v8  ;;  %v1245_v12 = vrot.slane %v1222_v0, %v10851_v10 }
 0x192   :  { %v1249_v20 = vrot.slane %v1222_v0, %v10853_v11  ;;  %v1253_v9 = vrot.slane %v1222_v0, %v10861_v15  ;;  %v1257_v30 = vrot.slane %v1222_v0, %v10865_v17  ;;  %v11101_v35 = vrot.slane %v11096_v32, %v10842_v6 }
 0x193   :  { %v1390_v5 = vsel %vm498_vm0, %v1233_v1, 0.0  ;;  %v1391_v16 = vsel %vm498_vm0, %v1237_v3, 0.0  ;;  %v1393_v21 = vsel %vm498_vm0, %v1241_v4, 0.0  ;;  %v1395_v24 = vsel %vm498_vm0, %v1245_v12, 0.0 }
 0x194   :  { %v1392_v19 = vadd.f32 %v1391_v16, %v1390_v5  ;;  %v1397_v27 = vsel %vm498_vm0, %v1249_v20, 0.0  ;;  %v1399_v33 = vsel %vm498_vm0, %v1253_v9, 0.0  ;;  %v1261_v37 = vrot.slane %v1222_v0, %v10872_v23 }
 0x195   :  { %v1401_v29 = vsel %vm498_vm0, %v1257_v30, 0.0  ;;  %v572_v38 = vsub.f32 %v10893_v40, %v11101_v35  ;;  %v1265_v42 = vrot.slane %v11103_v36, %v10842_v6  ;;  %v1269_v49 = vrot.slane %v11103_v36, %v10844_v7 }
 0x196   :  { %v1394_v22 = vadd.f32 %v1393_v21, %v1392_v19  ;;  %v1403_v43 = vsel %vm498_vm0, %v1261_v37, 0.0  ;;  %v573_v40 = vsub.f32 %v10936_v18, %v11101_v35  ;;  %v1273_v54 = vrot.slane %v11103_v36, %v10846_v8 }
 0x197   :  { %v576_v41 = vmul.f32 %v572_v38, %v572_v38  ;;  %v1405_v55 = vsel %vm498_vm0, %v1265_v42, 0.0  ;;  %v1277_v62 = vrot.slane %v11103_v36, %v10851_v10  ;;  %v1407_v0 = vsel %vm498_vm0, %v1269_v49, 0.0 }
 0x198   :  { %v1396_v25 = vadd.f32 %v1395_v24, %v1394_v22  ;;  %v11132_v1 = vmul.f32 %v573_v40, %v573_v40  ;;  %v1220_v12 = vsub.f32 %v10927_v2, %v11078_v61  ;;  %v1281_v19 = vrot.slane %v11103_v36, %v10853_v11 }
 0x199   :  { %v587_v44 = vrot.slane %v576_v41, %v10842_v6  ;;  %v591_v45 = vrot.slane %v576_v41, %v10844_v7  ;;  %v595_v46 = vrot.slane %v576_v41, %v10846_v8  ;;  %v599_v48 = vrot.slane %v576_v41, %v10851_v10 }
 0x19a   :  { %v1398_v31 = vadd.f32 %v1397_v27, %v1396_v25  ;;  %v603_v50 = vrot.slane %v576_v41, %v10853_v11  ;;  %v607_v57 = vrot.slane %v576_v41, %v10861_v15  ;;  %v611_v3 = vrot.slane %v576_v41, %v10865_v17 }
 0x19b   :  { %v744_v51 = vsel %vm498_vm0, %v587_v44, 0.0  ;;  %v745_v52 = vsel %vm498_vm0, %v591_v45, 0.0  ;;  %v747_v53 = vsel %vm498_vm0, %v595_v46, 0.0  ;;  %v749_v58 = vsel %vm498_vm0, %v599_v48, 0.0 }
 0x19c   :  { %v1400_v34 = vadd.f32 %v1399_v33, %v1398_v31  ;;  %v746_v56 = vadd.f32 %v745_v52, %v744_v51  ;;  %v751_v4 = vsel %vm498_vm0, %v603_v50, 0.0  ;;  %v1409_v20 = vsel %vm498_vm0, %v1273_v54, 0.0 }
 0x19d   :  { %v615_v21 = vrot.slane %v576_v41, %v10872_v23  ;;  %v753_v22 = vsel %vm498_vm0, %v607_v57, 0.0  ;;  %v1285_v25 = vrot.slane %v11103_v36, %v10861_v15  ;;  %v1411_v26 = vsel %vm498_vm0, %v1277_v62, 0.0 }
 0x19e   :  { %v1402_v39 = vadd.f32 %v1401_v29, %v1400_v34  ;;  %v748_v18 = vadd.f32 %v747_v53, %v746_v56  ;;  %v619_v2 = vrot.slane %v11132_v1, %v10842_v6  ;;  %v755_v27 = vsel %vm498_vm0, %v611_v3, 0.0 }
 0x19f   :  { %v11149_v30 = vmul.f32 %v1220_v12, %v1220_v12  ;;  %v1289_v33 = vrot.slane %v11103_v36, %v10865_v17  ;;  %v1413_v34 = vsel %vm498_vm0, %v1281_v19, 0.0  ;;  %v623_v37 = vrot.slane %v11132_v1, %v10844_v7 }
 0x1a0   :  { %v1404_v47 = vadd.f32 %v1403_v43, %v1402_v39  ;;  %v750_v16 = vadd.f32 %v749_v58, %v748_v18  ;;  %v757_v29 = vsel %vm498_vm0, %v615_v21, 0.0  ;;  %v1293_v41 = vrot.slane %v11103_v36, %v10872_v23 }
 0x1a1   :  { %v1415_v42 = vsel %vm498_vm0, %v1285_v25, 0.0  ;;  %v627_v43 = vrot.slane %v11132_v1, %v10846_v8  ;;  %v759_v44 = vsel %vm498_vm0, %v619_v2, 0.0  ;;  %v1417_v48 = vsel %vm498_vm0, %v1289_v33, 0.0 }
 0x1a2   :  { %v1406_v59 = vadd.f32 %v1405_v55, %v1404_v47  ;;  %v752_v24 = vadd.f32 %v751_v4, %v750_v16  ;;  %v1297_v47 = vrot.slane %v11149_v30, %v10842_v6  ;;  %v631_v49 = vrot.slane %v11132_v1, %v10851_v10 }
 0x1a3   :  { %v761_v40 = vsel %vm498_vm0, %v623_v37, 0.0  ;;  %v1301_v51 = vrot.slane %v11149_v30, %v10844_v7  ;;  %v1419_v52 = vsel %vm498_vm0, %v1293_v41, 0.0  ;;  %v574_v53 = vsub.f32 %v10990_v14, %v11101_v35 }
 0x1a4   :  { %v1408_v5 = vadd.f32 %v1407_v0, %v1406_v59  ;;  %v754_v31 = vadd.f32 %v753_v22, %v752_v24  ;;  %v635_v55 = vrot.slane %v11132_v1, %v10853_v11  ;;  %v763_v56 = vsel %vm498_vm0, %v627_v43, 0.0 }
 0x1a5   :  { %v1305_v57 = vrot.slane %v11149_v30, %v10846_v8  ;;  %v1421_v58 = vsel %vm498_vm0, %v1297_v47, 0.0  ;;  %v639_v62 = vrot.slane %v11132_v1, %v10861_v15  ;;  %v765_v0 = vsel %vm498_vm0, %v631_v49, 0.0 }
 0x1a6   :  { %v1410_v9 = vadd.f32 %v1409_v20, %v1408_v5  ;;  %v756_v39 = vadd.f32 %v755_v27, %v754_v31  ;;  %v1309_v14 = vrot.slane %v11149_v30, %v10851_v10  ;;  %v1423_v3 = vsel %vm498_vm0, %v1301_v51, 0.0 }
 0x1a7   :  { %v11186_v5 = vmul.f32 %v574_v53, %v574_v53  ;;  %v643_v16 = vrot.slane %v11132_v1, %v10865_v17  ;;  %v767_v19 = vsel %vm498_vm0, %v635_v55, 0.0  ;;  %v1221_v20 = vsub.f32 %v10981_v63, %v11078_v61 }
 0x1a8   :  { %v1412_v28 = vadd.f32 %v1411_v26, %v1410_v9  ;;  %v758_v46 = vadd.f32 %v757_v29, %v756_v39  ;;  %v1313_v21 = vrot.slane %v11149_v30, %v10853_v11  ;;  %v1425_v22 = vsel %vm498_vm0, %v1305_v57, 0.0 }
 0x1a9   :  { %v647_v25 = vrot.slane %v11132_v1, %v10872_v23  ;;  %v769_v26 = vsel %vm498_vm0, %v639_v62, 0.0  ;;  %v1317_v2 = vrot.slane %v11149_v30, %v10861_v15  ;;  %v1427_v27 = vsel %vm498_vm0, %v1309_v14, 0.0 }
 0x1aa   :  { %v1414_v38 = vadd.f32 %v1413_v34, %v1412_v28  ;;  %v760_v50 = vadd.f32 %v759_v44, %v758_v46  ;;  %v651_v63 = vrot.slane %v11186_v5, %v10842_v6  ;;  %v771_v61 = vsel %vm498_vm0, %v643_v16, 0.0 }
 0x1ab   :  { %v11205_v33 = vmul.f32 %v1221_v20, %v1221_v20  ;;  %v1321_v34 = vrot.slane %v11149_v30, %v10865_v17  ;;  %v1429_v1 = vsel %vm498_vm0, %v1313_v21, 0.0  ;;  %v773_v39 = vsel %vm498_vm0, %v647_v25, 0.0 }
 0x1ac   :  { %v1416_v45 = vadd.f32 %v1415_v42, %v1414_v38  ;;  %v762_v59 = vadd.f32 %v761_v40, %v760_v50  ;;  %v655_v38 = vrot.slane %v11186_v5, %v10844_v7  ;;  %v1325_v41 = vrot.slane %v11149_v30, %v10872_v23 }
 0x1ad   :  { %v1431_v42 = vsel %vm498_vm0, %v1317_v2, 0.0  ;;  %v775_v46 = vsel %vm498_vm0, %v651_v63, 0.0  ;;  %v1329_v47 = vrot.slane %v11205_v33, %v10842_v6  ;;  %v1333_v50 = vrot.slane %v11205_v33, %v10844_v7 }
 0x1ae   :  { %v1418_v36 = vadd.f32 %v1417_v48, %v1416_v45  ;;  %v764_v4 = vadd.f32 %v763_v56, %v762_v59  ;;  %v659_v45 = vrot.slane %v11186_v5, %v10846_v8  ;;  %v1433_v48 = vsel %vm498_vm0, %v1321_v34, 0.0 }
 0x1af   :  { %v777_v30 = vsel %vm498_vm0, %v655_v38, 0.0  ;;  %v1435_v51 = vsel %vm498_vm0, %v1325_v41, 0.0  ;;  %v575_v53 = vsub.f32 %v11041_v13, %v11101_v35  ;;  %v667_v55 = vrot.slane %v11186_v5, %v10853_v11 }
 0x1b0   :  { %v1420_v54 = vadd.f32 %v1419_v52, %v1418_v36  ;;  %v766_v9 = vadd.f32 %v765_v0, %v764_v4  ;;  %v663_v36 = vrot.slane %v11186_v5, %v10851_v10  ;;  %v779_v56 = vsel %vm498_vm0, %v659_v45, 0.0 }
 0x1b1   :  { %v1337_v57 = vrot.slane %v11205_v33, %v10846_v8  ;;  %v671_v62 = vrot.slane %v11186_v5, %v10861_v15  ;;  %v1341_v13 = vrot.slane %v11205_v33, %v10851_v10  ;;  %v1439_v35 = vsel %vm498_vm0, %v1333_v50, 0.0 }
 0x1b2   :  { %v1422_v18 = vadd.f32 %v1421_v58, %v1420_v54  ;;  %v768_v28 = vadd.f32 %v767_v19, %v766_v9  ;;  %v1437_v58 = vsel %vm498_vm0, %v1329_v47, 0.0  ;;  %v781_v0 = vsel %vm498_vm0, %v663_v36, 0.0 }
 0x1b3   :  { %v783_v16 = vsel %vm498_vm0, %v667_v55, 0.0  ;;  %v1345_v19 = vrot.slane %v11205_v33, %v10853_v11  ;;  %v1441_v20 = vsel %vm498_vm0, %v1337_v57, 0.0  ;;  %v679_v9 = vrot.slane %v11186_v5, %v10872_v23 }
 0x1b4   :  { %v1424_v12 = vadd.f32 %v1423_v3, %v1422_v18  ;;  %v770_v37 = vadd.f32 %v769_v26, %v768_v28  ;;  %v579_v3 = vmul.f32 %v575_v53, %v575_v53  ;;  %v1349_v25 = vrot.slane %v11205_v33, %v10861_v15 }
 0x1b5   :  { %v1443_v26 = vsel %vm498_vm0, %v1341_v13, 0.0  ;;  %v1353_v63 = vrot.slane %v11205_v33, %v10865_v17 }
 0x1b6   :  { %v1426_v24 = vadd.f32 %v1425_v22, %v1424_v12  ;;  %v772_v43 = vadd.f32 %v771_v61, %v770_v37  ;;  %v675_v12 = vrot.slane %v11186_v5, %v10865_v17  ;;  %v683_v28 = vrot.slane %v579_v3, %v10842_v6 }
 0x1b7   :  { %v1445_v61 = vsel %vm498_vm0, %v1345_v19, 0.0  ;;  %v789_v37 = vsel %vm498_vm0, %v679_v9, 0.0  ;;  %v1447_v38 = vsel %vm498_vm0, %v1349_v25, 0.0  ;;  %v695_v47 = vrot.slane %v579_v3, %v10851_v10 }
 0x1b8   :  { %v1428_v31 = vadd.f32 %v1427_v27, %v1426_v24  ;;  %v774_v49 = vadd.f32 %v773_v39, %v772_v43  ;;  %v785_v24 = vsel %vm498_vm0, %v671_v62, 0.0  ;;  %v791_v43 = vsel %vm498_vm0, %v683_v28, 0.0  ;;  %v1617_v62 = vld [vmem:[%s10559_s3 + $0x8] sm:$0xff] }
 0x1b9   :  { %v797_v50 = vsel %vm498_vm0, %v695_v47, 0.0  ;;  %v707_v10 = vrot.slane %v579_v3, %v10865_v17  ;;  %v10512_v17 = vmov 0   ;;  %v821_v47 = vld [vmem:[#allocation3] sm:$0x1] }
 0x1ba   :  { %v1430_v29 = vadd.f32 %v1429_v1, %v1428_v31  ;;  %v776_v52 = vadd.f32 %v775_v46, %v774_v49  ;;  %v787_v31 = vsel %vm498_vm0, %v675_v12, 0.0  ;;  %v687_v1 = vrot.slane %v579_v3, %v10844_v7  ;;  %10323 = vset.pattern.permute.xlu0 %v10512_v17  ;;  %10324 = vset.pattern.permute.xlu1 %v10512_v17  ;;  %v972_v17 = vld [vmem:[%s10549_s25 + $0x10] sm:$0xff] }
 0x1bc   :  { %v1432_v44 = vadd.f32 %v1431_v42, %v1430_v29  ;;  %v778_v59 = vadd.f32 %v777_v30, %v776_v52  ;;  %v1357_v29 = vrot.slane %v11205_v33, %v10872_v23  ;;  %v691_v42 = vrot.slane %v579_v3, %v10846_v8 }
 0x1bd   :  { %v793_v7 = vsel %vm498_vm0, %v687_v1, 0.0  ;;  %v703_v8 = vrot.slane %v579_v3, %v10861_v15 }
 0x1be   :  { %v1434_v40 = vadd.f32 %v1433_v48, %v1432_v44  ;;  %v780_v14 = vadd.f32 %v779_v56, %v778_v59  ;;  %v1449_v44 = vsel %vm498_vm0, %v1353_v63, 0.0  ;;  %v1451_v48 = vsel %vm498_vm0, %v1357_v29, 0.0  ;;  %v1621_v29 = vld [vmem:[%s10559_s3 + $0x28] sm:$0xff] }
 0x1bf   :  { %v795_v36 = vsel %vm498_vm0, %v691_v42, 0.0  ;;  %v803_v56 = vsel %vm498_vm0, %v707_v10, 0.0  ;;  %v1622_v42 = vld [vmem:[%s10559_s3 + $0x30] sm:$0xff] }
 0x1c0   :  { %v1436_v54 = vadd.f32 %v1435_v51, %v1434_v40  ;;  %v782_v21 = vadd.f32 %v781_v0, %v780_v14  ;;  %v699_v40 = vrot.slane %v579_v3, %v10853_v11  ;;  %v801_v11 = vsel %vm498_vm0, %v703_v8, 0.0  ;;  %v1618_v0 = vld [vmem:[%s10559_s3 + $0x10] sm:$0xff] }
 0x1c2   :  { %v1438_v18 = vadd.f32 %v1437_v58, %v1436_v54  ;;  %v784_v2 = vadd.f32 %v783_v16, %v782_v21  ;;  %v799_v52 = vsel %vm498_vm0, %v699_v40, 0.0  ;;  %v711_v54 = vrot.slane %v579_v3, %v10872_v23  ;;  %v1619_v23 = vld [vmem:[%s10559_s3 + $0x18] sm:$0xff]  ;;  %v970_v40 = vld [vmem:[%s10549_s25] sm:$0xff] }
 0x1c4   :  { %v1440_v4 = vadd.f32 %v1439_v35, %v1438_v18  ;;  %v786_v34 = vadd.f32 %v785_v24, %v784_v2  ;;  %v805_v57 = vsel %vm498_vm0, %v711_v54, 0.0  ;;  %v1616_v18 = vld [vmem:[%s10559_s3] sm:$0xff]  ;;  %v9600_v35 = vpack.c.bf16 %v1619_v23, %v1618_v0  ;;  %v1473_v54 = vld [vmem:[%s10554_s29 + $0x18] sm:$0xff] }
 0x1c5   :  { %v9596_v13 = vpack.c.bf16 %v1617_v62, %v1616_v18  ;;  %v973_v18 = vld [vmem:[%s10549_s25 + $0x18] sm:$0xff]  ;;  %v11320_v62 = vld [vmem:[%s10539_s17 + $0x10] sm:$0xff]  ;;  %vm10514_vm0 = vmmov 0  }
 0x1c6   :  { %v1442_v22 = vadd.f32 %v1441_v20, %v1440_v4  ;;  %v788_v39 = vadd.f32 %v787_v31, %v786_v34 }
 0x1c7   :  { %9597 = vmatprep.subr.bf16.mxu0 %v9596_v13 }
 0x1c8   :  { %v1444_v27 = vadd.f32 %v1443_v26, %v1442_v22  ;;  %v790_v45 = vadd.f32 %v789_v37, %v788_v39  ;;  %9599 = vmatpush3.bf16.msra.mxu0 %v9596_v13  ;;  %v1456_v26 = vld [vmem:[#allocation4] sm:$0x1] }
 0x1c9   :  { %9601 = vmatprep.subr.bf16.mxu0 %v9600_v35  ;;  %v1620_v37 = vld [vmem:[%s10559_s3 + $0x20] sm:$0xff] }
 0x1ca   :  { %v1446_v5 = vadd.f32 %v1445_v61, %v1444_v27  ;;  %v792_v49 = vadd.f32 %v791_v43, %v790_v45  ;;  %v1467_v61 = vld [vmem:[#allocation5] sm:$0x1]  ;;  %v9604_v39 = vpack.c.bf16 %v1621_v29, %v1620_v37  ;;  %v1623_v43 = vld [vmem:[%s10559_s3 + $0x38] sm:$0xff]  ;;  %v810_v45 = vld [vmem:[#allocation2] sm:$0x1]  ;;  %s13024_s3 = sld [smem:[#allocation24_spill]] }
 0x1cb   :  { %v11357_v37 = vld [vmem:[%s10539_s17 + $0x30] sm:$0xff] }
 0x1cc   :  { %v1448_v41 = vadd.f32 %v1447_v38, %v1446_v5  ;;  %v794_v30 = vadd.f32 %v793_v7, %v792_v49  ;;  %9603 = vmatpush3.bf16.msra.mxu0 %v9600_v35 }
 0x1cd   :  { %9605 = vmatprep.subr.bf16.mxu0 %v9604_v39 }
 0x1ce   :  { %v1450_v46 = vadd.f32 %v1449_v44, %v1448_v41  ;;  %v796_v51 = vadd.f32 %v795_v36, %v794_v30  ;;  %v9608_v44 = vpack.c.bf16 %v1623_v43, %v1622_v42  ;;  %v971_v36 = vld [vmem:[%s10549_s25 + $0x8] sm:$0xff]  ;;  %v1480_v43 = vld [vmem:[%s10554_s29 + $0x50] sm:$0xff] }
 0x1cf   :  { %v9612_v30 = vpack.c.bf16 %v971_v36, %v970_v40  ;;  %v1482_v36 = vld [vmem:[%s10554_s29 + $0x60] sm:$0xff] }
 0x1d0   :  { %v1452_v33 = vadd.f32 %v1451_v48, %v1450_v46  ;;  %v798_v53 = vadd.f32 %v797_v50, %v796_v51  ;;  %9607 = vmatpush3.bf16.msra.mxu0 %v9604_v39  ;;  %v1470_v50 = vld [vmem:[%s10554_s29] sm:$0xff]  ;;  %v1471_v51 = vld [vmem:[%s10554_s29 + $0x8] sm:$0xff] }
 0x1d1   :  { %9609 = vmatprep.subr.bf16.mxu0 %v9608_v44  ;;  %v1479_v39 = vld [vmem:[%s10554_s29 + $0x48] sm:$0xff] }
 0x1d2   :  { %1453 = vadd.xlane.f32.xlu1 %v1452_v33  ;;  %v800_v55 = vadd.f32 %v799_v52, %v798_v53 }
 0x1d4   :  { %v802_v15 = vadd.f32 %v801_v11, %v800_v55  ;;  %9611 = vmatpush3.bf16.msra.mxu0 %v9608_v44  ;;  %v11308_v55 = vld [vmem:[%s10539_s17] sm:$0xff] }
 0x1d5   :  { %9613 = vmatprep.subr.bf16.mxu0 %v9612_v30 }
 0x1d6   :  { %v804_v58 = vadd.f32 %v803_v56, %v802_v15  ;;  %v11311_v56 = vld [vmem:[%s10539_s17 + $0x8] sm:$0xff]  ;;  %v1474_v15 = vld [vmem:[%s10554_s29 + $0x20] sm:$0xff] }
 0x1d8   :  { %v806_v59 = vadd.f32 %v805_v57, %v804_v58 }
 0x1da   :  { %807 = vadd.xlane.f32.xlu1 %v806_v59 }
 0x25f   :  { %v1454_v14 = vpop.xlane.xlu1 %1453 }
 0x260   :  { %v1455_v3 = vmul.f32 0.00024414063, %v1454_v14  ;;  %v1475_v14 = vld [vmem:[%s10554_s29 + $0x28] sm:$0xff] }
 0x262   :  { %v1457_v4 = vadd.f32 1e-05, %v1455_v3 }
 0x264   :  { %10325 = vrsqrt.f32 %v1457_v4  ;;  %vm1460_vm1 = vcmp.eq.f32.partialorder %v1457_v4, inf  ;;  %v1463_v22 = vand.u32 2147483648, %v1457_v4  ;;  %vm1462_vm2 = vcmp.eq.f32.partialorder %v1457_v4, 0.0 }
 0x267   :  { %v808_v12 = vpop.xlane.xlu1 %807 }
 0x268   :  { %v809_v16 = vmul.f32 0.00024414063, %v808_v12  ;;  %v9616_v12 = vpack.c.bf16 %v973_v18, %v972_v17  ;;  %v11405_v18 = vld [vmem:[%s10539_s17 + $0x60] sm:$0xff] }
 0x26a   :  { %v811_v21 = vadd.f32 1e-05, %v809_v16 }
 0x26c   :  { %10327 = vrsqrt.f32 %v811_v21  ;;  %vm814_vm3 = vcmp.eq.f32.partialorder %v811_v21, inf  ;;  %v817_v28 = vand.u32 2147483648, %v811_v21  ;;  %vm816_vm4 = vcmp.eq.f32.partialorder %v811_v21, 0.0 }
 0x26e   :  { %v10326_v19 = vpop.eup %10325 }
 0x26f   :  { %v1459_v20 = vmul.f32 %v10326_v19, %v1457_v4  ;;  %v11332_v19 = vld [vmem:[%s10539_s17 + $0x18] sm:$0xff] }
 0x271   :  { %v1461_v9 = vsel %vm1460_vm1, %v1457_v4, %v1459_v20  ;;  %v1476_v4 = vld [vmem:[%s10554_s29 + $0x30] sm:$0xff]  ;;  %vm6960_vm1 = vcmask 519168  }
 0x272   :  { %v1464_v24 = vsel %vm1462_vm2, %v1463_v22, %v1461_v9  ;;  %v975_v22 = vld [vmem:[%s10549_s25 + $0x28] sm:$0xff]  ;;  %v11339_v9 = vld [vmem:[%s10539_s17 + $0x20] sm:$0xff]  ;;  %vm7001_vm2 = vcmask 1043456  }
 0x273   :  { %10329 = vrcp.f32 %v1464_v24 }
 0x276   :  { %v10328_v25 = vpop.eup %10327 }
 0x277   :  { %v813_v2 = vmul.f32 %v10328_v25, %v811_v21 }
 0x279   :  { %v815_v31 = vsel %vm814_vm3, %v811_v21, %v813_v2  ;;  %v974_v21 = vld [vmem:[%s10549_s25 + $0x20] sm:$0xff]  ;;  %vm10516_vm3 = vmmov 1  }
 0x27a   :  { %v818_v34 = vsel %vm816_vm4, %v817_v28, %v815_v31  ;;  %v1478_v28 = vld [vmem:[%s10554_s29 + $0x40] sm:$0xff]  ;;  %v9620_v31 = vpack.c.bf16 %v975_v22, %v974_v21  ;;  %vm10118_vm4 = vmpackc.low %vm7001_vm2, %vm10516_vm3 }
 0x27b   :  { %10331 = vrcp.f32 %v818_v34 }
 0x27d   :  { %v10330_v27 = vpop.eup %10329 }
 0x27e   :  { %v1466_v63 = vmul.f32 %v10330_v27, %v1456_v26  ;;  %v1477_v26 = vld [vmem:[%s10554_s29 + $0x38] sm:$0xff] }
 0x280   :  { %v1506_v5 = vrot.slane %v1466_v63, %v10842_v6  ;;  %v1468_v1 = vmul.f32 %v1466_v63, %v11074_v60 }
 0x282   :  { %1508 = vperm.xlu0 %10323, %v1506_v5   ;;  %v1469_v38 = vsub.f32 %v1467_v61, %v1468_v1  ;;  %v11350_v61 = vld [vmem:[%s10539_s17 + $0x28] sm:$0xff]  ;;  %v976_v5 = vld [vmem:[%s10549_s25 + $0x30] sm:$0xff]  ;;  %v977_v1 = vld [vmem:[%s10549_s25 + $0x38] sm:$0xff]  ;;  %s13022_s25 = sld [smem:[#allocation17_spill]] }
 0x283   :  { %v9624_v44 = vpack.c.bf16 %v977_v1, %v976_v5  ;;  %v1489_v1 = vld [vmem:[%s10554_s29 + $0x98] sm:$0xff] }
 0x284   :  { %v1547_v41 = vrot.slane %v1469_v38, %v10842_v6 }
 0x285   :  { %v10332_v60 = vpop.eup %10331 }
 0x286   :  { %1549 = vperm.xlu1 %10324, %v1547_v41   ;;  %v820_v46 = vmul.f32 %v10332_v60, %v810_v45  ;;  %v11368_v60 = vld [vmem:[%s10539_s17 + $0x38] sm:$0xff] }
 0x288   :  { %v860_v7 = vrot.slane %v820_v46, %v10842_v6  ;;  %v822_v48 = vmul.f32 %v820_v46, %v11096_v32  ;;  %v1472_v32 = vld [vmem:[%s10554_s29 + $0x10] sm:$0xff] }
 0x28a   :  { %862 = vperm.xlu1 %10324, %v860_v7   ;;  %v823_v49 = vsub.f32 %v821_v47, %v822_v48  ;;  %v11373_v47 = vld [vmem:[%s10539_s17 + $0x40] sm:$0xff] }
 0x28c   :  { %v901_v33 = vrot.slane %v823_v49, %v10842_v6  ;;  %v1481_v49 = vld [vmem:[%s10554_s29 + $0x58] sm:$0xff] }
 0x28e   :  { %903 = vperm.xlu1 %10324, %v901_v33  }
 0x301   :  { %v11296_v8 = vpop.permute.xlu0 %1508 }
 0x302   :  { %v1511_v10 = vmul.f32 %v11296_v8, %v1470_v50  ;;  %v1512_v52 = vmul.f32 %v11296_v8, %v1471_v51  ;;  %v1513_v53 = vmul.f32 %v11296_v8, %v1472_v32  ;;  %v1514_v0 = vmul.f32 %v11296_v8, %v1473_v54  ;;  %v11384_v50 = vld [vmem:[%s10539_s17 + $0x48] sm:$0xff]  ;;  %v11389_v32 = vld [vmem:[%s10539_s17 + $0x50] sm:$0xff] }
 0x303   :  { %v1515_v35 = vmul.f32 %v11296_v8, %v1474_v15  ;;  %v1516_v24 = vmul.f32 %v11296_v8, %v1475_v14  ;;  %v1517_v25 = vmul.f32 %v11296_v8, %v1476_v4  ;;  %v1518_v29 = vmul.f32 %v11296_v8, %v1477_v26 }
 0x304   :  { %v1519_v38 = vmul.f32 %v11296_v8, %v1478_v28  ;;  %v1520_v7 = vmul.f32 %v11296_v8, %v1479_v39  ;;  %v1521_v48 = vmul.f32 %v11296_v8, %v1480_v43  ;;  %v11432_v28 = vld [vmem:[%s10539_s17 + $0x78] sm:$0xff]  ;;  %v1490_v39 = vld [vmem:[%s10554_s29 + $0xa0] sm:$0xff] }
 0x305   :  { %v11305_v11 = vpop.permute.xlu1 %1549 }
 0x306   :  { %v1552_v57 = vadd.f32 %v11305_v11, %v1511_v10  ;;  %v1553_v58 = vadd.f32 %v11305_v11, %v1512_v52  ;;  %v1554_v59 = vadd.f32 %v11305_v11, %v1513_v53  ;;  %v1555_v3 = vadd.f32 %v11305_v11, %v1514_v0  ;;  %v1483_v53 = vld [vmem:[%s10554_s29 + $0x68] sm:$0xff] }
 0x307   :  { %v1556_v20 = vadd.f32 %v11305_v11, %v1515_v35  ;;  %v1557_v27 = vadd.f32 %v11305_v11, %v1516_v24  ;;  %v1558_v34 = vadd.f32 %v11305_v11, %v1517_v25  ;;  %v1559_v42 = vadd.f32 %v11305_v11, %v1518_v29  ;;  %v1487_v24 = vld [vmem:[%s10554_s29 + $0x88] sm:$0xff] }
 0x308   :  { %v1584_v13 = vmul.f32 %v1552_v57, %v11308_v55  ;;  %v1585_v23 = vmul.f32 %v1553_v58, %v11311_v56  ;;  %v1586_v16 = vmul.f32 %v1554_v59, %v11320_v62  ;;  %v1587_v2 = vmul.f32 %v1555_v3, %v11332_v19  ;;  %v1484_v57 = vld [vmem:[%s10554_s29 + $0x70] sm:$0xff]  ;;  %v11400_v59 = vld [vmem:[%s10539_s17 + $0x58] sm:$0xff]  ;;  %v1486_v3 = vld [vmem:[%s10554_s29 + $0x80] sm:$0xff] }
 0x309   :  { %v1588_v63 = vmul.f32 %v1556_v20, %v11339_v9  ;;  %v1589_v41 = vmul.f32 %v1557_v27, %v11350_v61  ;;  %v1590_v45 = vmul.f32 %v1558_v34, %v11357_v37  ;;  %v1560_v46 = vadd.f32 %v11305_v11, %v1519_v38  ;;  %v11421_v20 = vld [vmem:[%s10539_s17 + $0x70] sm:$0xff] }
 0x30a   :  { %8662 = vmatprep.mubr.msk.f32.mxu0 %vm1624_vm5, %v1584_v13  ;;  %v1591_v33 = vmul.f32 %v1559_v42, %v11368_v60  ;;  %v1561_v40 = vadd.f32 %v11305_v11, %v1520_v7  ;;  %v1562_v51 = vadd.f32 %v11305_v11, %v1521_v48  ;;  %v1522_v10 = vmul.f32 %v11296_v8, %v1481_v49  ;;  %v11448_v42 = vld [vmem:[%s10539_s17 + $0x88] sm:$0xff] }
 0x30b   :  { %8663 = vmatmul.mubr.msk.f32.vlgmr.msra.gmra.mrb[0].mxu0 %vm1624_vm5, %v1585_v23  ;;  %v1523_v52 = vmul.f32 %v11296_v8, %v1482_v36  ;;  %v1524_v0 = vmul.f32 %v11296_v8, %v1483_v53  ;;  %v1525_v13 = vmul.f32 %v11296_v8, %v1484_v57  ;;  %v1485_v23 = vld [vmem:[%s10554_s29 + $0x78] sm:$0xff]  ;;  %v1527_v22 = vmul.f32 %v11296_v8, %v1486_v3  ;;  %v1491_v7 = vld [vmem:[%s10554_s29 + $0xa8] sm:$0xff] }
 0x30c   :  { %8665 = vmatprep.mubr.msk.f32.mxu0 %vm1624_vm5, %v1586_v16  ;;  %9615 = vmatpush3.bf16.msra.mxu0 %v9612_v30  ;;  %v1592_v30 = vmul.f32 %v1560_v46, %v11373_v47  ;;  %v1593_v54 = vmul.f32 %v1561_v40, %v11384_v50  ;;  %v1563_v15 = vadd.f32 %v11305_v11, %v1522_v10  ;;  %v11464_v36 = vld [vmem:[%s10539_s17 + $0x98] sm:$0xff]  ;;  %v11471_v10 = vld [vmem:[%s10539_s17 + $0xa0] sm:$0xff] }
 0x30d   :  { %9617 = vmatprep.subr.bf16.mxu0 %v9616_v12  ;;  %v1594_v58 = vmul.f32 %v1562_v51, %v11389_v32  ;;  %v1564_v17 = vadd.f32 %v11305_v11, %v1523_v52  ;;  %v1565_v14 = vadd.f32 %v11305_v11, %v1524_v0  ;;  %v1566_v16 = vadd.f32 %v11305_v11, %v1525_v13  ;;  %v11467_v51 = vpop.permute.xlu1 %862  ;;  %v11482_v0 = vld [vmem:[%s10539_s17 + $0xa8] sm:$0xff] }
 0x30e   :  { %v1595_v35 = vmul.f32 %v1563_v15, %v11400_v59  ;;  %v1526_v21 = vmul.f32 %v11296_v8, %v1485_v23  ;;  %v1528_v34 = vmul.f32 %v11296_v8, %v1487_v24  ;;  %v1531_v46 = vmul.f32 %v11296_v8, %v1490_v39  ;;  %v11487_v23 = vld [vmem:[%s10539_s17 + $0xb0] sm:$0xff] }
 0x30f   :  { %8666 = vmatmul.mubr.msk.f32.gmra.mrb[2].mxu0 %vm1624_vm5, %v1587_v2  ;;  %v1596_v4 = vmul.f32 %v1564_v17, %v11405_v18  ;;  %v1488_v2 = vld [vmem:[%s10554_s29 + $0x90] sm:$0xff]  ;;  %v1598_v27 = vmul.f32 %v1566_v16, %v11421_v20  ;;  %v1532_v52 = vmul.f32 %v11296_v8, %v1491_v7 }
 0x310   :  { %8668 = vmatprep.mubr.msk.f32.mxu0 %vm1624_vm5, %v1588_v63  ;;  %9619 = vmatpush3.bf16.msra.mxu0 %v9616_v12  ;;  %v11416_v12 = vld [vmem:[%s10539_s17 + $0x68] sm:$0xff]  ;;  %v1567_v26 = vadd.f32 %v11305_v11, %v1526_v21  ;;  %v11437_v63 = vld [vmem:[%s10539_s17 + $0x80] sm:$0xff]  ;;  %v1529_v5 = vmul.f32 %v11296_v8, %v1488_v2  ;;  %v1569_v38 = vadd.f32 %v11305_v11, %v1528_v34  ;;  %v1496_v24 = vld [vmem:[%s10554_s29 + $0xd0] sm:$0xff] }
 0x311   :  { %9621 = vmatprep.subr.bf16.mxu0 %v9620_v31  ;;  %v1597_v25 = vmul.f32 %v1565_v14, %v11416_v12  ;;  %v1573_v57 = vadd.f32 %v11305_v11, %v1532_v52  ;;  %v855_v14 = vld [vmem:[%s10544_s21 + $0xf8] sm:$0xff]  ;;  %v11494_v16 = vpop.permute.xlu1 %903 }
 0x312   :  { %v1599_v29 = vmul.f32 %v1567_v26, %v11432_v28  ;;  %v1570_v43 = vadd.f32 %v11305_v11, %v1529_v5  ;;  %v1601_v48 = vmul.f32 %v1569_v38, %v11448_v42  ;;  %v11501_v26 = vld [vmem:[%s10539_s17 + $0xb8] sm:$0xff]  ;;  %v1537_v5 = vmul.f32 %v11296_v8, %v1496_v24  ;;  %v11554_v24 = vld [vmem:[%s10539_s17 + $0xe8] sm:$0xff] }
 0x313   :  { %8669 = vmatmul.mubr.msk.f32.gmra.mrb[4].mxu0 %vm1624_vm5, %v1589_v41  ;;  %v1605_v21 = vmul.f32 %v1573_v57, %v11482_v0  ;;  %v11538_v57 = vld [vmem:[%s10539_s17 + $0xd8] sm:$0xff] }
 0x314   :  { %8671 = vmatprep.mubr.msk.f32.mxu0 %vm1624_vm5, %v1590_v45  ;;  %9623 = vmatpush3.bf16.msra.mxu0 %v9620_v31  ;;  %v1568_v31 = vadd.f32 %v11305_v11, %v1527_v22  ;;  %v1530_v45 = vmul.f32 %v11296_v8, %v1489_v1  ;;  %v1497_v1 = vld [vmem:[%s10554_s29 + $0xd8] sm:$0xff]  ;;  %v1578_v7 = vadd.f32 %v11305_v11, %v1537_v5  ;;  %v825_v5 = vld [vmem:[%s10544_s21 + $0x8] sm:$0xff] }
 0x315   :  { %9625 = vmatprep.subr.bf16.mxu0 %v9624_v44 }
 0x316   :  { %v1600_v41 = vmul.f32 %v1568_v31, %v11437_v63  ;;  %v1571_v49 = vadd.f32 %v11305_v11, %v1530_v45  ;;  %v11507_v31 = vld [vmem:[%s10539_s17 + $0xc0] sm:$0xff] }
 0x317   :  { %8672 = vmatmul.mubr.msk.f32.gmra.mrb[6].mxu0 %vm1624_vm5, %v1591_v33  ;;  %v1492_v33 = vld [vmem:[%s10554_s29 + $0xb0] sm:$0xff] }
 0x318   :  { %8674 = vmatprep.mubr.msk.f32.mxu0 %vm1624_vm5, %v1592_v30  ;;  %9627 = vmatpush3.bf16.msra.mxu0 %v9624_v44  ;;  %v11453_v44 = vld [vmem:[%s10539_s17 + $0x90] sm:$0xff]  ;;  %v1572_v30 = vadd.f32 %v11305_v11, %v1531_v46  ;;  %v1533_v53 = vmul.f32 %v11296_v8, %v1492_v33  ;;  %v1603_v15 = vmul.f32 %v1571_v49, %v11464_v36  ;;  %v11520_v46 = vld [vmem:[%s10539_s17 + $0xc8] sm:$0xff] }
 0x319   :  { %v1602_v40 = vmul.f32 %v1570_v43, %v11453_v44  ;;  %v329_v43 = vld [vmem:[%s10539_s17 + $0xf8] sm:$0xff]  ;;  %v11527_v49 = vld [vmem:[%s10539_s17 + $0xd0] sm:$0xff]  ;;  %v1538_v33 = vmul.f32 %v11296_v8, %v1497_v1 }
 0x31a   :  { %v1604_v17 = vmul.f32 %v1572_v30, %v11471_v10  ;;  %v1574_v13 = vadd.f32 %v11305_v11, %v1533_v53  ;;  %v1499_v30 = vld [vmem:[%s10554_s29 + $0xe8] sm:$0xff] }
 0x31b   :  { %8675 = vmatmul.mubr.msk.f32.gmra.mrb[8].mxu0 %vm1624_vm5, %v1593_v54  ;;  %v1493_v54 = vld [vmem:[%s10554_s29 + $0xb8] sm:$0xff]  ;;  %v1579_v53 = vadd.f32 %v11305_v11, %v1538_v33 }
 0x31c   :  { %8677 = vmatprep.mubr.msk.f32.mxu0 %vm1624_vm5, %v1594_v58  ;;  %v1494_v58 = vld [vmem:[%s10554_s29 + $0xc0] sm:$0xff] }
 0x31d   :  { %v1535_v3 = vmul.f32 %v11296_v8, %v1494_v58 }
 0x31f   :  { %8678 = vmatmul.mubr.msk.f32.gmra.mrb[10].mxu0 %vm1624_vm5, %v1595_v35  ;;  %v1534_v35 = vmul.f32 %v11296_v8, %v1493_v54  ;;  %v1576_v2 = vadd.f32 %v11305_v11, %v1535_v3  ;;  %v1500_v54 = vld [vmem:[%s10554_s29 + $0xf0] sm:$0xff]  ;;  %v1611_v3 = vmul.f32 %v1579_v53, %v11538_v57 }
 0x320   :  { %8680 = vmatprep.mubr.msk.f32.mxu0 %vm1624_vm5, %v1596_v4  ;;  %v1495_v4 = vld [vmem:[%s10554_s29 + $0xc8] sm:$0xff] }
 0x321   :  { %v1575_v22 = vadd.f32 %v11305_v11, %v1534_v35  ;;  %v1536_v34 = vmul.f32 %v11296_v8, %v1495_v4  ;;  %v1608_v45 = vmul.f32 %v1576_v2, %v11507_v31  ;;  %v1541_v35 = vmul.f32 %v11296_v8, %v1500_v54  ;;  %v11559_v2 = vld [vmem:[%s10539_s17 + $0xf0] sm:$0xff] }
 0x323   :  { %8681 = vmatmul.mubr.msk.f32.gmra.mrb[12].mxu0 %vm1624_vm5, %v1597_v25  ;;  %v1606_v25 = vmul.f32 %v1574_v13, %v11487_v23  ;;  %v1607_v38 = vmul.f32 %v1575_v22, %v11501_v26  ;;  %v1577_v39 = vadd.f32 %v11305_v11, %v1536_v34  ;;  %v1540_v13 = vmul.f32 %v11296_v8, %v1499_v30 }
 0x324   :  { %8683 = vmatprep.mubr.msk.f32.mxu0 %vm1624_vm5, %v1598_v27  ;;  %v896_v27 = vmul.f32 %v11467_v51, %v855_v14  ;;  %v1501_v14 = vld [vmem:[%s10554_s29 + $0xf8] sm:$0xff] }
 0x325   :  { %v1609_v52 = vmul.f32 %v1577_v39, %v11520_v46  ;;  %v1581_v4 = vadd.f32 %v11305_v11, %v1540_v13  ;;  %v830_v13 = vld [vmem:[%s10544_s21 + $0x30] sm:$0xff] }
 0x327   :  { %8684 = vmatmul.mubr.msk.f32.gmra.mrb[14].mxu0 %vm1624_vm5, %v1599_v29  ;;  %v937_v29 = vadd.f32 %v11494_v16, %v896_v27  ;;  %v1542_v27 = vmul.f32 %v11296_v8, %v1501_v14  ;;  %v1613_v1 = vmul.f32 %v1581_v4, %v11554_v24  ;;  %v831_v4 = vld [vmem:[%s10544_s21 + $0x38] sm:$0xff] }
 0x328   :  { %8686 = vmatprep.mubr.msk.f32.mxu0 %vm1624_vm5, %v1600_v41  ;;  %v1498_v41 = vld [vmem:[%s10554_s29 + $0xe0] sm:$0xff]  ;;  %s13023_s29 = sld [smem:[#allocation21_spill]] }
 0x32b   :  { %8687 = vmatmul.mubr.msk.f32.gmra.mrb[16].mxu0 %vm1624_vm5, %v1601_v48  ;;  %v11523_v48 = vmul.f32 %v937_v29, %v329_v43  ;;  %v1583_v29 = vadd.f32 %v11305_v11, %v1542_v27  ;;  %v872_v27 = vmul.f32 %v11467_v51, %v831_v4  ;;  %v841_v4 = vld [vmem:[%s10544_s21 + $0x88] sm:$0xff] }
 0x32c   :  { %8689 = vmatprep.mubr.msk.f32.mxu0 %vm1624_vm5, %v1602_v40  ;;  %v1539_v40 = vmul.f32 %v11296_v8, %v1498_v41  ;;  %v866_v8 = vmul.f32 %v11467_v51, %v825_v5  ;;  %v833_v5 = vld [vmem:[%s10544_s21 + $0x48] sm:$0xff] }
 0x32d   :  { %v1615_v33 = vmul.f32 %v1583_v29, %v329_v43  ;;  %v834_v29 = vld [vmem:[%s10544_s21 + $0x50] sm:$0xff] }
 0x32e   :  { %v1580_v58 = vadd.f32 %v11305_v11, %v1539_v40  ;;  %v907_v40 = vadd.f32 %v11494_v16, %v866_v8  ;;  %v835_v8 = vld [vmem:[%s10544_s21 + $0x58] sm:$0xff] }
 0x32f   :  { %8690 = vmatmul.mubr.msk.f32.gmra.mrb[18].mxu0 %vm1624_vm5, %v1603_v15  ;;  %v1610_v15 = vmul.f32 %v1578_v7, %v11527_v49  ;;  %v827_v7 = vld [vmem:[%s10544_s21 + $0x18] sm:$0xff] }
 0x330   :  { %8692 = vmatprep.mubr.msk.f32.mxu0 %vm1624_vm5, %v1604_v17  ;;  %v11543_v17 = vld [vmem:[%s10539_s17 + $0xe0] sm:$0xff]  ;;  %v868_v53 = vmul.f32 %v11467_v51, %v827_v7  ;;  %v939_v43 = vmul.f32 %v907_v40, %v11311_v56  ;;  %v876_v40 = vmul.f32 %v11467_v51, %v835_v8  ;;  %s13020_s17 = sld [smem:[#allocation19_spill]] }
 0x331   :  { %v1612_v22 = vmul.f32 %v1580_v58, %v11543_v17  ;;  %v836_v7 = vld [vmem:[%s10544_s21 + $0x60] sm:$0xff] }
 0x332   :  { %v909_v58 = vadd.f32 %v11494_v16, %v868_v53  ;;  %v838_v53 = vld [vmem:[%s10544_s21 + $0x70] sm:$0xff] }
 0x333   :  { %8693 = vmatmul.mubr.msk.f32.gmra.mrb[20].mxu0 %vm1624_vm5, %v1605_v21  ;;  %v824_v21 = vld [vmem:[%s10544_s21] sm:$0xff] }
 0x334   :  { %8695 = vmatprep.mubr.msk.f32.mxu0 %vm1624_vm5, %v1606_v25  ;;  %v1582_v25 = vadd.f32 %v11305_v11, %v1541_v35  ;;  %v865_v34 = vmul.f32 %v11467_v51, %v824_v21  ;;  %v828_v11 = vld [vmem:[%s10544_s21 + $0x20] sm:$0xff]  ;;  %v941_v56 = vmul.f32 %v909_v58, %v11332_v19  ;;  %v839_v58 = vld [vmem:[%s10544_s21 + $0x78] sm:$0xff] }
 0x335   :  { %v869_v54 = vmul.f32 %v11467_v51, %v828_v11  ;;  %v877_v11 = vmul.f32 %v11467_v51, %v836_v7 }
 0x336   :  { %v1614_v39 = vmul.f32 %v1582_v25, %v11559_v2  ;;  %v906_v41 = vadd.f32 %v11494_v16, %v865_v34 }
 0x337   :  { %8696 = vmatmul.mubr.msk.f32.gmra.mrb[22].mxu0 %vm1624_vm5, %v1607_v38  ;;  %v826_v38 = vld [vmem:[%s10544_s21 + $0x10] sm:$0xff]  ;;  %v910_v35 = vadd.f32 %v11494_v16, %v869_v54  ;;  %v918_v54 = vadd.f32 %v11494_v16, %v877_v11 }
 0x338   :  { %8698 = vmatprep.mubr.msk.f32.mxu0 %vm1624_vm5, %v1608_v45  ;;  %v867_v45 = vmul.f32 %v11467_v51, %v826_v38  ;;  %v938_v30 = vmul.f32 %v906_v41, %v11308_v55  ;;  %v875_v41 = vmul.f32 %v11467_v51, %v834_v29 }
 0x33b   :  { %8699 = vmatmul.mubr.msk.f32.gmra.mrb[24].mxu0 %vm1624_vm5, %v1609_v52  ;;  %v908_v52 = vadd.f32 %v11494_v16, %v867_v45 }
 0x33c   :  { %8701 = vmatprep.mubr.msk.f32.mxu0 %vm1624_vm5, %v1610_v15  ;;  %v829_v15 = vld [vmem:[%s10544_s21 + $0x28] sm:$0xff] }
 0x33d   :  { %v940_v55 = vmul.f32 %v908_v52, %v11320_v62  ;;  %v870_v14 = vmul.f32 %v11467_v51, %v829_v15  ;;  %v942_v62 = vmul.f32 %v910_v35, %v11339_v9  ;;  %v917_v52 = vadd.f32 %v11494_v16, %v876_v40 }
 0x33f   :  { %8702 = vmatmul.mubr.msk.f32.gmra.mrb[26].mxu0 %vm1624_vm5, %v1611_v3  ;;  %v871_v3 = vmul.f32 %v11467_v51, %v830_v13  ;;  %v911_v21 = vadd.f32 %v11494_v16, %v870_v14  ;;  %v880_v14 = vmul.f32 %v11467_v51, %v839_v58  ;;  %v852_v58 = vld [vmem:[%s10544_s21 + $0xe0] sm:$0xff] }
 0x340   :  { %8704 = vmatprep.mubr.msk.f32.mxu0 %vm1624_vm5, %v1612_v22  ;;  %v832_v22 = vld [vmem:[%s10544_s21 + $0x40] sm:$0xff] }
 0x341   :  { %v912_v25 = vadd.f32 %v11494_v16, %v871_v3  ;;  %v873_v34 = vmul.f32 %v11467_v51, %v832_v22  ;;  %v943_v19 = vmul.f32 %v911_v21, %v11350_v61  ;;  %v842_v21 = vld [vmem:[%s10544_s21 + $0x90] sm:$0xff] }
 0x343   :  { %8705 = vmatmul.mubr.msk.f32.gmra.mrb[28].mxu0 %vm1624_vm5, %v1613_v1  ;;  %v913_v1 = vadd.f32 %v11494_v16, %v872_v27  ;;  %v944_v9 = vmul.f32 %v912_v25, %v11357_v37  ;;  %v914_v38 = vadd.f32 %v11494_v16, %v873_v34  ;;  %v883_v25 = vmul.f32 %v11467_v51, %v842_v21  ;;  %v843_v27 = vld [vmem:[%s10544_s21 + $0x98] sm:$0xff] }
 0x344   :  { %8707 = vmatprep.mubr.msk.f32.mxu0 %vm1624_vm5, %v1614_v39  ;;  %v874_v39 = vmul.f32 %v11467_v51, %v833_v5  ;;  %v844_v5 = vld [vmem:[%s10544_s21 + $0xa0] sm:$0xff] }
 0x345   :  { %v945_v61 = vmul.f32 %v913_v1, %v11368_v60  ;;  %v946_v37 = vmul.f32 %v914_v38, %v11373_v47  ;;  %v884_v1 = vmul.f32 %v11467_v51, %v843_v27  ;;  %v885_v29 = vmul.f32 %v11467_v51, %v844_v5 }
 0x346   :  { %v915_v45 = vadd.f32 %v11494_v16, %v874_v39  ;;  %v846_v39 = vld [vmem:[%s10544_s21 + $0xb0] sm:$0xff] }
 0x347   :  { %8708 = vmatmul.mubr.msk.f32.gmra.mrb[30].mxu0 %vm1624_vm5, %v1615_v33  ;;  %v916_v33 = vadd.f32 %v11494_v16, %v875_v41  ;;  %v925_v38 = vadd.f32 %v11494_v16, %v884_v1  ;;  %v926_v41 = vadd.f32 %v11494_v16, %v885_v29 }
 0x348   :  { %8726 = vmatprep.mubr.msk.f32.mxu0 %vm1624_vm5, %v938_v30  ;;  %v837_v30 = vld [vmem:[%s10544_s21 + $0x68] sm:$0xff]  ;;  %v947_v60 = vmul.f32 %v915_v45, %v11384_v50  ;;  %v949_v50 = vmul.f32 %v917_v52, %v11400_v59  ;;  %v847_v45 = vld [vmem:[%s10544_s21 + $0xb8] sm:$0xff]  ;;  %v850_v52 = vld [vmem:[%s10544_s21 + $0xd0] sm:$0xff] }
 0x349   :  { %v948_v47 = vmul.f32 %v916_v33, %v11389_v32  ;;  %v878_v15 = vmul.f32 %v11467_v51, %v837_v30  ;;  %v950_v32 = vmul.f32 %v918_v54, %v11405_v18  ;;  %v888_v40 = vmul.f32 %v11467_v51, %v847_v45  ;;  %v849_v30 = vld [vmem:[%s10544_s21 + $0xc8] sm:$0xff] }
 0x34a   :  { %v891_v54 = vmul.f32 %v11467_v51, %v850_v52 }
 0x34b   :  { %8727 = vmatmul.mubr.msk.f32.vlgmr.msra.gmra.mrb[0].mxu0 %vm1624_vm5, %v939_v43  ;;  %v879_v43 = vmul.f32 %v11467_v51, %v838_v53  ;;  %v919_v13 = vadd.f32 %v11494_v16, %v878_v15  ;;  %v851_v15 = vld [vmem:[%s10544_s21 + $0xd8] sm:$0xff] }
 0x34c   :  { %8729 = vmatprep.mubr.msk.f32.mxu0 %vm1624_vm5, %v940_v55  ;;  %v840_v55 = vld [vmem:[%s10544_s21 + $0x80] sm:$0xff] }
 0x34d   :  { %v920_v35 = vadd.f32 %v11494_v16, %v879_v43  ;;  %v881_v3 = vmul.f32 %v11467_v51, %v840_v55  ;;  %v951_v59 = vmul.f32 %v919_v13, %v11416_v12  ;;  %v892_v13 = vmul.f32 %v11467_v51, %v851_v15 }
 0x34e   :  { %v893_v55 = vmul.f32 %v11467_v51, %v852_v58 }
 0x34f   :  { %8730 = vmatmul.mubr.msk.f32.gmra.mrb[2].mxu0 %vm1624_vm5, %v941_v56  ;;  %v921_v56 = vadd.f32 %v11494_v16, %v880_v14  ;;  %v952_v18 = vmul.f32 %v920_v35, %v11421_v20  ;;  %v922_v22 = vadd.f32 %v11494_v16, %v881_v3  ;;  %v854_v14 = vld [vmem:[%s10544_s21 + $0xf0] sm:$0xff] }
 0x350   :  { %8732 = vmatprep.mubr.msk.f32.mxu0 %vm1624_vm5, %v942_v62  ;;  %v882_v62 = vmul.f32 %v11467_v51, %v841_v4 }
 0x351   :  { %v953_v12 = vmul.f32 %v921_v56, %v11432_v28  ;;  %v954_v20 = vmul.f32 %v922_v22, %v11437_v63 }
 0x352   :  { %v923_v34 = vadd.f32 %v11494_v16, %v882_v62 }
 0x353   :  { %8733 = vmatmul.mubr.msk.f32.gmra.mrb[4].mxu0 %vm1624_vm5, %v943_v19  ;;  %v924_v19 = vadd.f32 %v11494_v16, %v883_v25 }
 0x354   :  { %8735 = vmatprep.mubr.msk.f32.mxu0 %vm1624_vm5, %v944_v9  ;;  %v845_v9 = vld [vmem:[%s10544_s21 + $0xa8] sm:$0xff]  ;;  %v955_v28 = vmul.f32 %v923_v34, %v11448_v42  ;;  %v957_v42 = vmul.f32 %v925_v38, %v11464_v36 }
 0x355   :  { %v956_v63 = vmul.f32 %v924_v19, %v11453_v44  ;;  %v886_v8 = vmul.f32 %v11467_v51, %v845_v9  ;;  %v958_v44 = vmul.f32 %v926_v41, %v11471_v10 }
 0x357   :  { %8736 = vmatmul.mubr.msk.f32.gmra.mrb[6].mxu0 %vm1624_vm5, %v945_v61  ;;  %v887_v61 = vmul.f32 %v11467_v51, %v846_v39  ;;  %v927_v7 = vadd.f32 %v11494_v16, %v886_v8 }
 0x358   :  { %8738 = vmatprep.mubr.msk.f32.mxu0 %vm1624_vm5, %v946_v37  ;;  %v848_v37 = vld [vmem:[%s10544_s21 + $0xc0] sm:$0xff] }
 0x359   :  { %v928_v33 = vadd.f32 %v11494_v16, %v887_v61  ;;  %v889_v11 = vmul.f32 %v11467_v51, %v848_v37  ;;  %v959_v36 = vmul.f32 %v927_v7, %v11482_v0 }
 0x35b   :  { %8739 = vmatmul.mubr.msk.f32.gmra.mrb[8].mxu0 %vm1624_vm5, %v947_v60  ;;  %v929_v60 = vadd.f32 %v11494_v16, %v888_v40  ;;  %v960_v10 = vmul.f32 %v928_v33, %v11487_v23  ;;  %v930_v53 = vadd.f32 %v11494_v16, %v889_v11 }
 0x35c   :  { %8741 = vmatprep.mubr.msk.f32.mxu0 %vm1624_vm5, %v948_v47  ;;  %v890_v47 = vmul.f32 %v11467_v51, %v849_v30 }
 0x35d   :  { %v961_v0 = vmul.f32 %v929_v60, %v11501_v26  ;;  %v962_v23 = vmul.f32 %v930_v53, %v11507_v31  ;;  %v933_v26 = vadd.f32 %v11494_v16, %v892_v13  ;;  %v934_v31 = vadd.f32 %v11494_v16, %v893_v55 }
 0x35e   :  { %v931_v43 = vadd.f32 %v11494_v16, %v890_v47 }
 0x35f   :  { %8742 = vmatmul.mubr.msk.f32.gmra.mrb[10].mxu0 %vm1624_vm5, %v949_v50  ;;  %v932_v50 = vadd.f32 %v11494_v16, %v891_v54  ;;  %v965_v56 = vmul.f32 %v933_v26, %v11538_v57  ;;  %v966_v21 = vmul.f32 %v934_v31, %v11543_v17 }
 0x360   :  { %8744 = vmatprep.mubr.msk.f32.mxu0 %vm1624_vm5, %v950_v32  ;;  %v853_v32 = vld [vmem:[%s10544_s21 + $0xe8] sm:$0xff]  ;;  %v963_v35 = vmul.f32 %v931_v43, %v11520_v46  ;;  %s13021_s21 = sld [smem:[#allocation20_spill]] }
 0x361   :  { %v964_v3 = vmul.f32 %v932_v50, %v11527_v49  ;;  %v894_v4 = vmul.f32 %v11467_v51, %v853_v32 }
 0x363   :  { %8745 = vmatmul.mubr.msk.f32.gmra.mrb[12].mxu0 %vm1624_vm5, %v951_v59  ;;  %v895_v59 = vmul.f32 %v11467_v51, %v854_v14  ;;  %v935_v46 = vadd.f32 %v11494_v16, %v894_v4  ;;  %v2270_v51 = vld [vmem:[%s10574_s19 + $0x8] sm:$0xff] }
 0x364   :  { %8747 = vmatprep.mubr.msk.f32.mxu0 %vm1624_vm5, %v952_v18  ;;  %2615 = vmatprep.mubr.f32.mxu1 %v2270_v51 }
 0x365   :  { %v936_v18 = vadd.f32 %v11494_v16, %v895_v59  ;;  %v967_v49 = vmul.f32 %v935_v46, %v11554_v24 }
 0x367   :  { %8748 = vmatmul.mubr.msk.f32.gmra.mrb[14].mxu0 %vm1624_vm5, %v953_v12  ;;  %v968_v22 = vmul.f32 %v936_v18, %v11559_v2 }
 0x368   :  { %8750 = vmatprep.mubr.msk.f32.mxu0 %vm1624_vm5, %v954_v20 }
 0x36b   :  { %8751 = vmatmul.mubr.msk.f32.gmra.mrb[16].mxu0 %vm1624_vm5, %v955_v28 }
 0x36c   :  { %8753 = vmatprep.mubr.msk.f32.mxu0 %vm1624_vm5, %v956_v63 }
 0x36f   :  { %8754 = vmatmul.mubr.msk.f32.gmra.mrb[18].mxu0 %vm1624_vm5, %v957_v42 }
 0x370   :  { %8756 = vmatprep.mubr.msk.f32.mxu0 %vm1624_vm5, %v958_v44 }
 0x373   :  { %8757 = vmatmul.mubr.msk.f32.gmra.mrb[20].mxu0 %vm1624_vm5, %v959_v36 }
 0x374   :  { %8759 = vmatprep.mubr.msk.f32.mxu0 %vm1624_vm5, %v960_v10 }
 0x377   :  { %8760 = vmatmul.mubr.msk.f32.gmra.mrb[22].mxu0 %vm1624_vm5, %v961_v0 }
 0x378   :  { %8762 = vmatprep.mubr.msk.f32.mxu0 %vm1624_vm5, %v962_v23 }
 0x37b   :  { %8763 = vmatmul.mubr.msk.f32.gmra.mrb[24].mxu0 %vm1624_vm5, %v963_v35 }
 0x37c   :  { %8765 = vmatprep.mubr.msk.f32.mxu0 %vm1624_vm5, %v964_v3 }
 0x37f   :  { %8766 = vmatmul.mubr.msk.f32.gmra.mrb[26].mxu0 %vm1624_vm5, %v965_v56 }
 0x380   :  { %8768 = vmatprep.mubr.msk.f32.mxu0 %vm1624_vm5, %v966_v21 }
 0x383   :  { %8769 = vmatmul.mubr.msk.f32.gmra.mrb[28].mxu0 %vm1624_vm5, %v967_v49 }
 0x384   :  { %8771 = vmatprep.mubr.msk.f32.mxu0 %vm1624_vm5, %v968_v22 }
 0x387   :  { %8772 = vmatmul.mubr.msk.f32.gmra.mrb[30].mxu0 %vm1624_vm5, %v11523_v48 }
 0x41e   :  { %v11726_v57 = vpop.f32.mrb[0].mxu0 }
 0x41f   :  { %v2335_v16 = vsel %vm2333_vm6, %v11726_v57, 0.0  ;;  %v11730_v17 = vpop.f32.mrb[1].mxu0 }
 0x420   :  { %v2334_v24 = vsel %vm2333_vm6, %v11730_v17, 0.0  ;;  %v11736_v2 = vpack.c.bf16 %v11726_v57, %v11730_v17 }
 0x421   :  { %v2336_v62 = vadd.f32 %v2335_v16, %v2334_v24 }
 0x422   :  { %v11738_v25 = vpop.f32.mrb[2].mxu0 }
 0x423   :  { %v11740_v48 = vpop.f32.mrb[3].mxu0  ;;  %v2339_v5 = vsel %vm2333_vm6, %v11738_v25, 0.0 }
 0x424   :  { %v2337_v27 = vsel %vm2333_vm6, %v11740_v48, 0.0  ;;  %v11746_v12 = vpack.c.bf16 %v11738_v25, %v11740_v48 }
 0x425   :  { %v2338_v34 = vadd.f32 %v2337_v27, %v2336_v62 }
 0x426   :  { %v11750_v20 = vpop.f32.mrb[4].mxu0 }
 0x427   :  { %v11752_v19 = vpop.f32.mrb[5].mxu0  ;;  %v2340_v1 = vadd.f32 %v2339_v5, %v2338_v34  ;;  %v2343_v38 = vsel %vm2333_vm6, %v11750_v20, 0.0 }
 0x428   :  { %v2341_v29 = vsel %vm2333_vm6, %v11752_v19, 0.0  ;;  %v11758_v9 = vpack.c.bf16 %v11750_v20, %v11752_v19 }
 0x429   :  { %v2342_v28 = vadd.f32 %v2341_v29, %v2340_v1 }
 0x42a   :  { %v11762_v39 = vpop.f32.mrb[6].mxu0 }
 0x42b   :  { %v11764_v63 = vpop.f32.mrb[7].mxu0  ;;  %v2344_v41 = vadd.f32 %v2343_v38, %v2342_v28  ;;  %v2347_v42 = vsel %vm2333_vm6, %v11762_v39, 0.0 }
 0x42c   :  { %v2345_v8 = vsel %vm2333_vm6, %v11764_v63, 0.0  ;;  %v11770_v61 = vpack.c.bf16 %v11762_v39, %v11764_v63 }
 0x42d   :  { %v2346_v45 = vadd.f32 %v2345_v8, %v2344_v41 }
 0x42e   :  { %v11774_v7 = vpop.f32.mrb[8].mxu0 }
 0x42f   :  { %v11776_v37 = vpop.f32.mrb[9].mxu0  ;;  %v2348_v44 = vadd.f32 %v2347_v42, %v2346_v45  ;;  %v2351_v30 = vsel %vm2333_vm6, %v11774_v7, 0.0 }
 0x430   :  { %v2349_v33 = vsel %vm2333_vm6, %v11776_v37, 0.0  ;;  %v11782_v40 = vpack.c.bf16 %v11774_v7, %v11776_v37 }
 0x431   :  { %v2350_v11 = vadd.f32 %v2349_v33, %v2348_v44 }
 0x432   :  { %v11786_v36 = vpop.f32.mrb[10].mxu0 }
 0x433   :  { %v11788_v60 = vpop.f32.mrb[11].mxu0  ;;  %v2352_v52 = vadd.f32 %v2351_v30, %v2350_v11  ;;  %v2355_v54 = vsel %vm2333_vm6, %v11786_v36, 0.0 }
 0x434   :  { %v2353_v10 = vsel %vm2333_vm6, %v11788_v60, 0.0  ;;  %v11794_v53 = vpack.c.bf16 %v11786_v36, %v11788_v60 }
 0x435   :  { %v2354_v47 = vadd.f32 %v2353_v10, %v2352_v52 }
 0x436   :  { %v11798_v15 = vpop.f32.mrb[12].mxu0 }
 0x437   :  { %v11800_v0 = vpop.f32.mrb[13].mxu0  ;;  %v2356_v43 = vadd.f32 %v2355_v54, %v2354_v47  ;;  %v2359_v13 = vsel %vm2333_vm6, %v11798_v15, 0.0 }
 0x438   :  { %v2357_v58 = vsel %vm2333_vm6, %v11800_v0, 0.0  ;;  %v11806_v23 = vpack.c.bf16 %v11798_v15, %v11800_v0 }
 0x439   :  { %v2358_v50 = vadd.f32 %v2357_v58, %v2356_v43 }
 0x43a   :  { %v11810_v55 = vpop.f32.mrb[14].mxu0 }
 0x43b   :  { %v11812_v32 = vpop.f32.mrb[15].mxu0  ;;  %v2360_v35 = vadd.f32 %v2359_v13, %v2358_v50  ;;  %v2363_v31 = vsel %vm2333_vm6, %v11810_v55, 0.0 }
 0x43c   :  { %v2361_v26 = vsel %vm2333_vm6, %v11812_v32, 0.0  ;;  %v11818_v14 = vpack.c.bf16 %v11810_v55, %v11812_v32 }
 0x43d   :  { %v2362_v3 = vadd.f32 %v2361_v26, %v2360_v35 }
 0x43e   :  { %v11822_v4 = vpop.f32.mrb[16].mxu0 }
 0x43f   :  { %v11824_v59 = vpop.f32.mrb[17].mxu0  ;;  %v2364_v56 = vadd.f32 %v2363_v31, %v2362_v3  ;;  %v2367_v49 = vsel %vm2333_vm6, %v11822_v4, 0.0 }
 0x440   :  { %v2365_v46 = vsel %vm2333_vm6, %v11824_v59, 0.0  ;;  %v11830_v21 = vpack.c.bf16 %v11822_v4, %v11824_v59 }
 0x441   :  { %v2366_v18 = vadd.f32 %v2365_v46, %v2364_v56 }
 0x442   :  { %v11834_v22 = vpop.f32.mrb[18].mxu0  ;;  %9629 = vmatprep.subr.bf16.mxu1 %v11830_v21 }
 0x443   :  { %v11837_v51 = vpop.f32.mrb[19].mxu0  ;;  %v2368_v16 = vadd.f32 %v2367_v49, %v2366_v18  ;;  %9631 = vmatpush3.bf16.msra.mxu1 %v11736_v2  ;;  %v2371_v34 = vsel %vm2333_vm6, %v11834_v22, 0.0 }
 0x444   :  { %v2369_v24 = vsel %vm2333_vm6, %v11837_v51, 0.0  ;;  %v11844_v62 = vpack.c.bf16 %v11834_v22, %v11837_v51 }
 0x445   :  { %v2370_v27 = vadd.f32 %v2369_v24, %v2368_v16 }
 0x446   :  { %v11848_v5 = vpop.f32.mrb[20].mxu0  ;;  %9633 = vmatprep.subr.bf16.mxu1 %v11844_v62 }
 0x447   :  { %v11851_v1 = vpop.f32.mrb[21].mxu0  ;;  %v2372_v29 = vadd.f32 %v2371_v34, %v2370_v27  ;;  %9635 = vmatpush3.bf16.msra.mxu1 %v11746_v12  ;;  %v2375_v8 = vsel %vm2333_vm6, %v11848_v5, 0.0 }
 0x448   :  { %v2373_v28 = vsel %vm2333_vm6, %v11851_v1, 0.0  ;;  %v11858_v38 = vpack.c.bf16 %v11848_v5, %v11851_v1 }
 0x449   :  { %v2374_v41 = vadd.f32 %v2373_v28, %v2372_v29 }
 0x44a   :  { %v11862_v45 = vpop.f32.mrb[22].mxu0  ;;  %9637 = vmatprep.subr.bf16.mxu1 %v11858_v38 }
 0x44b   :  { %v11865_v42 = vpop.f32.mrb[23].mxu0  ;;  %v2376_v44 = vadd.f32 %v2375_v8, %v2374_v41  ;;  %9639 = vmatpush3.bf16.msra.mxu1 %v11758_v9  ;;  %v2379_v52 = vsel %vm2333_vm6, %v11862_v45, 0.0 }
 0x44c   :  { %v2377_v33 = vsel %vm2333_vm6, %v11865_v42, 0.0  ;;  %v11872_v11 = vpack.c.bf16 %v11862_v45, %v11865_v42 }
 0x44d   :  { %v2378_v30 = vadd.f32 %v2377_v33, %v2376_v44 }
 0x44e   :  { %v11876_v10 = vpop.f32.mrb[24].mxu0  ;;  %9641 = vmatprep.subr.bf16.mxu1 %v11872_v11 }
 0x44f   :  { %v11879_v47 = vpop.f32.mrb[25].mxu0  ;;  %v2380_v54 = vadd.f32 %v2379_v52, %v2378_v30  ;;  %9643 = vmatpush3.bf16.msra.mxu1 %v11770_v61  ;;  %v2383_v13 = vsel %vm2333_vm6, %v11876_v10, 0.0 }
 0x450   :  { %v2381_v43 = vsel %vm2333_vm6, %v11879_v47, 0.0  ;;  %v9644_v58 = vpack.c.bf16 %v11876_v10, %v11879_v47 }
 0x451   :  { %v2382_v50 = vadd.f32 %v2381_v43, %v2380_v54 }
 0x452   :  { %v11888_v35 = vpop.f32.mrb[26].mxu0  ;;  %9645 = vmatprep.subr.bf16.mxu1 %v9644_v58 }
 0x453   :  { %v11890_v26 = vpop.f32.mrb[27].mxu0  ;;  %v2384_v3 = vadd.f32 %v2383_v13, %v2382_v50  ;;  %9647 = vmatpush3.bf16.msra.mxu1 %v11782_v40  ;;  %v2387_v18 = vsel %vm2333_vm6, %v11888_v35, 0.0  ;;  %v2269_v50 = vld [vmem:[%s10574_s19] sm:$0xff]  ;;  %v2272_v13 = vld [vmem:[%s10574_s19 + $0x18] sm:$0xff] }
 0x454   :  { %v2385_v31 = vsel %vm2333_vm6, %v11890_v26, 0.0  ;;  %v9648_v56 = vpack.c.bf16 %v11888_v35, %v11890_v26 }
 0x455   :  { %v2386_v46 = vadd.f32 %v2385_v31, %v2384_v3 }
 0x456   :  { %v11899_v49 = vpop.f32.mrb[28].mxu0  ;;  %9649 = vmatprep.subr.bf16.mxu1 %v9648_v56 }
 0x457   :  { %v11901_v16 = vpop.f32.mrb[29].mxu0  ;;  %v2388_v24 = vadd.f32 %v2387_v18, %v2386_v46  ;;  %9651 = vmatpush3.bf16.msra.mxu1 %v11794_v53  ;;  %v2391_v28 = vsel %vm2333_vm6, %v11899_v49, 0.0  ;;  %v2271_v46 = vld [vmem:[%s10574_s19 + $0x10] sm:$0xff]  ;;  %v2274_v18 = vld [vmem:[%s10574_s19 + $0x28] sm:$0xff] }
 0x458   :  { %v2389_v27 = vsel %vm2333_vm6, %v11901_v16, 0.0  ;;  %v9652_v34 = vpack.c.bf16 %v11899_v49, %v11901_v16 }
 0x459   :  { %v2390_v29 = vadd.f32 %v2389_v27, %v2388_v24 }
 0x45a   :  { %v11910_v41 = vpop.f32.mrb[30].mxu0  ;;  %9653 = vmatprep.subr.bf16.mxu1 %v9652_v34 }
 0x45b   :  { %v11912_v8 = vpop.f32.mrb[31].mxu0  ;;  %v2392_v44 = vadd.f32 %v2391_v28, %v2390_v29  ;;  %9655 = vmatpush3.bf16.msra.mxu1 %v11806_v23  ;;  %v2395_v54 = vsel %vm2333_vm6, %v11910_v41, 0.0  ;;  %v2276_v29 = vld [vmem:[%s10574_s19 + $0x38] sm:$0xff]  ;;  %v2278_v28 = vld [vmem:[%s10574_s19 + $0x48] sm:$0xff] }
 0x45c   :  { %v2393_v33 = vsel %vm2333_vm6, %v11912_v8, 0.0  ;;  %v9656_v30 = vpack.c.bf16 %v11910_v41, %v11912_v8 }
 0x45d   :  { %v2394_v52 = vadd.f32 %v2393_v33, %v2392_v44 }
 0x45e   :  { %9657 = vmatprep.subr.bf16.mxu1 %v9656_v30 }
 0x45f   :  { %v2396_v43 = vadd.f32 %v2395_v54, %v2394_v52  ;;  %9659 = vmatpush3.bf16.msra.mxu1 %v11818_v14  ;;  %v2281_v52 = vld [vmem:[%s10574_s19 + $0x60] sm:$0xff] }
 0x460   :  { %9661 = vmatprep.subr.bf16.mxu1 %v11830_v21  ;;  %v2273_v21 = vld [vmem:[%s10574_s19 + $0x20] sm:$0xff] }
 0x461   :  { %v2397_v3 = vrot.slane %v2396_v43, 4 }
 0x462   :  { %2616 = vmatmul.mubr.f32.vlgmr.msra.gmra.mrb[0].mxu1 %v2269_v50 }
 0x463   :  { %v2398_v31 = vadd.f32 %v2397_v3, %v2396_v43  ;;  %9663 = vmatpush3.bf16.msra.mxu1 %v11736_v2  ;;  %2620 = vmatprep.mubr.f32.mxu1 %v2272_v13 }
 0x464   :  { %9665 = vmatprep.subr.bf16.mxu1 %v11844_v62  ;;  %v2275_v62 = vld [vmem:[%s10574_s19 + $0x30] sm:$0xff] }
 0x465   :  { %v2399_v24 = vrot.slane %v2398_v31, 2 }
 0x466   :  { %2621 = vmatmul.mubr.f32.gmra.mrb[2].mxu1 %v2271_v46 }
 0x467   :  { %v2400_v27 = vadd.f32 %v2399_v24, %v2398_v31  ;;  %9667 = vmatpush3.bf16.msra.mxu1 %v11746_v12  ;;  %2625 = vmatprep.mubr.f32.mxu1 %v2274_v18  ;;  %v2277_v12 = vld [vmem:[%s10574_s19 + $0x40] sm:$0xff]  ;;  %v2288_v31 = vld [vmem:[%s10574_s19 + $0x98] sm:$0xff] }
 0x468   :  { %9669 = vmatprep.subr.bf16.mxu1 %v11858_v38  ;;  %v2280_v38 = vld [vmem:[%s10574_s19 + $0x58] sm:$0xff] }
 0x469   :  { %v2401_v2 = vrot.slane %v2400_v27, 1 }
 0x46a   :  { %2626 = vmatmul.mubr.f32.gmra.mrb[4].mxu1 %v2273_v21  ;;  %v2287_v21 = vld [vmem:[%s10574_s19 + $0x90] sm:$0xff] }
 0x46b   :  { %9671 = vmatpush3.bf16.msra.mxu1 %v11758_v9  ;;  %2630 = vmatprep.mubr.f32.mxu1 %v2276_v29  ;;  %v2402_v44 = vadd.f32 %v2401_v2, %v2400_v27  ;;  %v2279_v9 = vld [vmem:[%s10574_s19 + $0x50] sm:$0xff]  ;;  %v2290_v2 = vld [vmem:[%s10574_s19 + $0xa8] sm:$0xff] }
 0x46c   :  { %9673 = vmatprep.subr.bf16.mxu1 %v11872_v11  ;;  %v2282_v11 = vld [vmem:[%s10574_s19 + $0x68] sm:$0xff] }
 0x46d   :  { %v11940_v33 = vmul.f32 0.00390625, %v2402_v44 }
 0x46e   :  { %2631 = vmatmul.mubr.f32.gmra.mrb[6].mxu1 %v2275_v62 }
 0x46f   :  { %9675 = vmatpush3.bf16.msra.mxu1 %v11770_v61  ;;  %2635 = vmatprep.mubr.f32.mxu1 %v2278_v28  ;;  %v2405_v61 = vsub.f32 %v11730_v17, %v11940_v33  ;;  %v2408_v54 = vsub.f32 %v11738_v25, %v11940_v33  ;;  %v2286_v17 = vld [vmem:[%s10574_s19 + $0x88] sm:$0xff]  ;;  %v2412_v24 = vsub.f32 %v11762_v39, %v11940_v33 }
 0x470   :  { %9677 = vmatprep.subr.bf16.mxu1 %v9644_v58  ;;  %v2406_v58 = vsub.f32 %v11726_v57, %v11940_v33  ;;  %v2283_v57 = vld [vmem:[%s10574_s19 + $0x70] sm:$0xff]  ;;  %v2414_v39 = vsub.f32 %v11774_v7, %v11940_v33  ;;  %v2416_v7 = vsub.f32 %v11786_v36, %v11940_v33  ;;  %v2418_v36 = vsub.f32 %v11798_v15, %v11940_v33 }
 0x471   :  { %v2437_v43 = vmul.f32 %v2405_v61, %v2405_v61  ;;  %v2440_v13 = vmul.f32 %v2408_v54, %v2408_v54  ;;  %v2292_v61 = vld [vmem:[%s10574_s19 + $0xb8] sm:$0xff]  ;;  %v2420_v15 = vsub.f32 %v11810_v55, %v11940_v33  ;;  %v2422_v55 = vsub.f32 %v11822_v4, %v11940_v33 }
 0x472   :  { %2636 = vmatmul.mubr.f32.gmra.mrb[8].mxu1 %v2277_v12  ;;  %v2438_v50 = vmul.f32 %v2406_v58, %v2406_v58  ;;  %v2444_v12 = vmul.f32 %v2412_v24, %v2412_v24  ;;  %v2424_v4 = vsub.f32 %v11834_v22, %v11940_v33  ;;  %v2426_v22 = vsub.f32 %v11848_v5, %v11940_v33 }
 0x473   :  { %9679 = vmatpush3.bf16.msra.mxu1 %v11782_v40  ;;  %2640 = vmatprep.mubr.f32.mxu1 %v2280_v38  ;;  %v2407_v40 = vsub.f32 %v11740_v48, %v11940_v33  ;;  %v2410_v48 = vsub.f32 %v11750_v20, %v11940_v33  ;;  %v2469_v25 = vsel %vm2333_vm6, %v2437_v43, 0.0  ;;  %v2291_v43 = vld [vmem:[%s10574_s19 + $0xb0] sm:$0xff]  ;;  %v2428_v5 = vsub.f32 %v11862_v45, %v11940_v33 }
 0x474   :  { %9681 = vmatprep.subr.bf16.mxu1 %v9648_v56  ;;  %v2284_v56 = vld [vmem:[%s10574_s19 + $0x78] sm:$0xff]  ;;  %v2470_v3 = vsel %vm2333_vm6, %v2438_v50, 0.0  ;;  %v2482_v54 = vsel %vm2333_vm6, %v2444_v12, 0.0  ;;  %v2430_v45 = vsub.f32 %v11876_v10, %v11940_v33  ;;  %v2432_v10 = vsub.f32 %v11888_v35, %v11940_v33 }
 0x475   :  { %v2442_v27 = vmul.f32 %v2410_v48, %v2410_v48  ;;  %v2448_v48 = vmul.f32 %v2416_v7, %v2416_v7  ;;  %v2434_v35 = vsub.f32 %v11899_v49, %v11940_v33  ;;  %v2436_v49 = vsub.f32 %v11910_v41, %v11940_v33  ;;  %v2313_v41 = vld [vmem:[%s10579_s23 + $0x60] sm:$0xff] }
 0x476   :  { %2641 = vmatmul.mubr.f32.gmra.mrb[10].mxu1 %v2279_v9  ;;  %v2289_v9 = vld [vmem:[%s10574_s19 + $0xa0] sm:$0xff] }
 0x477   :  { %9683 = vmatpush3.bf16.msra.mxu1 %v11794_v53  ;;  %2645 = vmatprep.mubr.f32.mxu1 %v2282_v11  ;;  %v2409_v53 = vsub.f32 %v11752_v19, %v11940_v33  ;;  %v2411_v19 = vsub.f32 %v11764_v63, %v11940_v33  ;;  %v2413_v63 = vsub.f32 %v11776_v37, %v11940_v33  ;;  %v2478_v38 = vsel %vm2333_vm6, %v2442_v27, 0.0  ;;  %v2298_v27 = vld [vmem:[%s10574_s19 + $0xe8] sm:$0xff] }
 0x478   :  { %9685 = vmatprep.subr.bf16.mxu1 %v9652_v34  ;;  %v2439_v34 = vmul.f32 %v2407_v40, %v2407_v40  ;;  %v2415_v37 = vsub.f32 %v11788_v60, %v11940_v33  ;;  %v2417_v60 = vsub.f32 %v11800_v0, %v11940_v33  ;;  %v2419_v0 = vsub.f32 %v11812_v32, %v11940_v33 }
 0x479   :  { %v2441_v46 = vmul.f32 %v2409_v53, %v2409_v53  ;;  %v2443_v62 = vmul.f32 %v2411_v19, %v2411_v19  ;;  %v2445_v58 = vmul.f32 %v2413_v63, %v2413_v63  ;;  %v2421_v32 = vsub.f32 %v11824_v59, %v11940_v33 }
 0x47a   :  { %2646 = vmatmul.mubr.f32.gmra.mrb[12].mxu1 %v2281_v52  ;;  %v2472_v18 = vsel %vm2333_vm6, %v2439_v34, 0.0  ;;  %v2423_v59 = vsub.f32 %v11837_v51, %v11940_v33  ;;  %v2425_v51 = vsub.f32 %v11851_v1, %v11940_v33  ;;  %v2427_v1 = vsub.f32 %v11865_v42, %v11940_v33 }
 0x47b   :  { %9687 = vmatpush3.bf16.msra.mxu1 %v11806_v23  ;;  %2650 = vmatprep.mubr.f32.mxu1 %v2284_v56  ;;  %v2285_v23 = vld [vmem:[%s10574_s19 + $0x80] sm:$0xff]  ;;  %v2476_v28 = vsel %vm2333_vm6, %v2441_v46, 0.0  ;;  %v2480_v52 = vsel %vm2333_vm6, %v2443_v62, 0.0  ;;  %v2446_v56 = vmul.f32 %v2414_v39, %v2414_v39  ;;  %v2484_v53 = vsel %vm2333_vm6, %v2445_v58, 0.0  ;;  %v2302_v58 = vld [vmem:[%s10579_s23 + $0x8] sm:$0xff] }
 0x47c   :  { %9689 = vmatprep.subr.bf16.mxu1 %v9656_v30  ;;  %v2471_v30 = vadd.f32 %v2470_v3, %v2469_v25  ;;  %v2293_v25 = vld [vmem:[%s10574_s19 + $0xc0] sm:$0xff]  ;;  %v2450_v46 = vmul.f32 %v2418_v36, %v2418_v36  ;;  %v2453_v39 = vmul.f32 %v2421_v32, %v2421_v32  ;;  %v2429_v42 = vsub.f32 %v11879_v47, %v11940_v33 }
 0x47d   :  { %v2297_v62 = vld [vmem:[%s10574_s19 + $0xe0] sm:$0xff]  ;;  %v2431_v47 = vsub.f32 %v11890_v26, %v11940_v33  ;;  %v2433_v26 = vsub.f32 %v11901_v16, %v11940_v33  ;;  %v2435_v16 = vsub.f32 %v11912_v8, %v11940_v33 }
 0x47e   :  { %2651 = vmatmul.mubr.f32.gmra.mrb[14].mxu1 %v2283_v57  ;;  %v2473_v20 = vadd.f32 %v2472_v18, %v2471_v30  ;;  %v2294_v57 = vld [vmem:[%s10574_s19 + $0xc8] sm:$0xff]  ;;  %v2449_v30 = vmul.f32 %v2417_v60, %v2417_v60  ;;  %v2490_v18 = vsel %vm2333_vm6, %v2448_v48, 0.0  ;;  %v2494_v63 = vsel %vm2333_vm6, %v2450_v46, 0.0  ;;  %v2303_v48 = vld [vmem:[%s10579_s23 + $0x10] sm:$0xff]  ;;  %v2308_v46 = vld [vmem:[%s10579_s23 + $0x38] sm:$0xff] }
 0x47f   :  { %9691 = vmatpush3.bf16.msra.mxu1 %v11818_v14  ;;  %2655 = vmatprep.mubr.f32.mxu1 %v2286_v17  ;;  %v2474_v14 = vsel %vm2333_vm6, %v2440_v13, 0.0  ;;  %v2447_v17 = vmul.f32 %v2415_v37, %v2415_v37  ;;  %v2486_v13 = vsel %vm2333_vm6, %v2446_v56, 0.0  ;;  %v2456_v56 = vmul.f32 %v2424_v4, %v2424_v4 }
 0x480   :  { %v2475_v29 = vadd.f32 %v2474_v14, %v2473_v20  ;;  %v2295_v20 = vld [vmem:[%s10574_s19 + $0xd0] sm:$0xff]  ;;  %v2451_v14 = vmul.f32 %v2419_v0, %v2419_v0  ;;  %v2457_v60 = vmul.f32 %v2425_v51, %v2425_v51  ;;  %v2467_v51 = vmul.f32 %v2435_v16, %v2435_v16 }
 0x481   :  { %v2506_v36 = vsel %vm2333_vm6, %v2456_v56, 0.0  ;;  %v2316_v56 = vld [vmem:[%s10579_s23 + $0x78] sm:$0xff] }
 0x482   :  { %2656 = vmatmul.mubr.f32.gmra.mrb[16].mxu1 %v2285_v23  ;;  %v2477_v44 = vadd.f32 %v2476_v28, %v2475_v29  ;;  %v2296_v23 = vld [vmem:[%s10574_s19 + $0xd8] sm:$0xff]  ;;  %v2496_v12 = vsel %vm2333_vm6, %v2451_v14, 0.0  ;;  %v2307_v14 = vld [vmem:[%s10579_s23 + $0x30] sm:$0xff] }
 0x483   :  { %2660 = vmatprep.mubr.f32.mxu1 %v2288_v31  ;;  %v2488_v31 = vsel %vm2333_vm6, %v2447_v17, 0.0 }
 0x484   :  { %v2479_v11 = vadd.f32 %v2478_v38, %v2477_v44  ;;  %v2300_v44 = vld [vmem:[%s10574_s19 + $0xf8] sm:$0xff] }
 0x486   :  { %2661 = vmatmul.mubr.f32.gmra.mrb[18].mxu1 %v2287_v21  ;;  %v2481_v40 = vadd.f32 %v2480_v52, %v2479_v11  ;;  %v2492_v21 = vsel %vm2333_vm6, %v2449_v30, 0.0  ;;  %v2455_v52 = vmul.f32 %v2423_v59, %v2423_v59  ;;  %v2460_v30 = vmul.f32 %v2428_v5, %v2428_v5  ;;  %v2319_v5 = vld [vmem:[%s10579_s23 + $0x90] sm:$0xff] }
 0x487   :  { %2665 = vmatprep.mubr.f32.mxu1 %v2290_v2  ;;  %v2452_v2 = vmul.f32 %v2420_v15, %v2420_v15 }
 0x488   :  { %v2483_v50 = vadd.f32 %v2482_v54, %v2481_v40  ;;  %v2500_v40 = vsel %vm2333_vm6, %v2453_v39, 0.0  ;;  %v2504_v17 = vsel %vm2333_vm6, %v2455_v52, 0.0  ;;  %v2514_v32 = vsel %vm2333_vm6, %v2460_v30, 0.0  ;;  %v2312_v39 = vld [vmem:[%s10579_s23 + $0x58] sm:$0xff] }
 0x489   :  { %v2498_v11 = vsel %vm2333_vm6, %v2452_v2, 0.0  ;;  %v2332_v30 = vld [vmem:[%s10579_s23 + $0xf8] sm:$0xff] }
 0x48a   :  { %2666 = vmatmul.mubr.f32.gmra.mrb[20].mxu1 %v2289_v9  ;;  %v2485_v34 = vadd.f32 %v2484_v53, %v2483_v50  ;;  %v2454_v9 = vmul.f32 %v2422_v55, %v2422_v55  ;;  %v2463_v55 = vmul.f32 %v2431_v47, %v2431_v47 }
 0x48b   :  { %2670 = vmatprep.mubr.f32.mxu1 %v2292_v61  ;;  %v2299_v61 = vld [vmem:[%s10574_s19 + $0xf0] sm:$0xff]  ;;  %s13027_s19 = sld [smem:[#allocation26_spill]] }
 0x48c   :  { %v2487_v3 = vadd.f32 %v2486_v13, %v2485_v34  ;;  %v2502_v54 = vsel %vm2333_vm6, %v2454_v9, 0.0  ;;  %v2458_v34 = vmul.f32 %v2426_v22, %v2426_v22  ;;  %v2466_v9 = vmul.f32 %v2434_v35, %v2434_v35  ;;  %v2268_v35 = vld [vmem:[%s10569_s14] sm:$0x1]  ;;  %s13026_s14 = sld [smem:[#allocation28_spill]] }
 0x48e   :  { %2671 = vmatmul.mubr.f32.gmra.mrb[22].mxu1 %v2291_v43  ;;  %v2489_v19 = vadd.f32 %v2488_v31, %v2487_v3  ;;  %v2301_v43 = vld [vmem:[%s10579_s23] sm:$0xff]  ;;  %v2459_v3 = vmul.f32 %v2427_v1, %v2427_v1  ;;  %v2510_v31 = vsel %vm2333_vm6, %v2458_v34, 0.0  ;;  %v2322_v34 = vld [vmem:[%s10579_s23 + $0xa8] sm:$0xff] }
 0x48f   :  { %2675 = vmatprep.mubr.f32.mxu1 %v2294_v57  ;;  %v2304_v57 = vld [vmem:[%s10579_s23 + $0x18] sm:$0xff] }
 0x490   :  { %v2491_v24 = vadd.f32 %v2490_v18, %v2489_v19  ;;  %v2305_v19 = vld [vmem:[%s10579_s23 + $0x20] sm:$0xff]  ;;  %v2461_v18 = vmul.f32 %v2429_v42, %v2429_v42 }
 0x491   :  { %v2325_v42 = vld [vmem:[%s10579_s23 + $0xc0] sm:$0xff] }
 0x492   :  { %2676 = vmatmul.mubr.f32.gmra.mrb[24].mxu1 %v2293_v25  ;;  %v2493_v29 = vadd.f32 %v2492_v21, %v2491_v24  ;;  %v2306_v25 = vld [vmem:[%s10579_s23 + $0x28] sm:$0xff]  ;;  %v2516_v2 = vsel %vm2333_vm6, %v2461_v18, 0.0 }
 0x493   :  { %2680 = vmatprep.mubr.f32.mxu1 %v2296_v23  ;;  %v2508_v23 = vsel %vm2333_vm6, %v2457_v60, 0.0  ;;  %v2318_v60 = vld [vmem:[%s10579_s23 + $0x88] sm:$0xff] }
 0x494   :  { %v2495_v28 = vadd.f32 %v2494_v63, %v2493_v29  ;;  %v2310_v29 = vld [vmem:[%s10579_s23 + $0x48] sm:$0xff] }
 0x496   :  { %2681 = vmatmul.mubr.f32.gmra.mrb[26].mxu1 %v2295_v20  ;;  %v2497_v38 = vadd.f32 %v2496_v12, %v2495_v28  ;;  %v2512_v20 = vsel %vm2333_vm6, %v2459_v3, 0.0  ;;  %v2465_v12 = vmul.f32 %v2433_v26, %v2433_v26  ;;  %v2328_v3 = vld [vmem:[%s10579_s23 + $0xd8] sm:$0xff] }
 0x497   :  { %2685 = vmatprep.mubr.f32.mxu1 %v2298_v27  ;;  %v2462_v27 = vmul.f32 %v2430_v45, %v2430_v45  ;;  %v2329_v45 = vld [vmem:[%s10579_s23 + $0xe0] sm:$0xff] }
 0x498   :  { %v2499_v37 = vadd.f32 %v2498_v11, %v2497_v38  ;;  %v2520_v38 = vsel %vm2333_vm6, %v2463_v55, 0.0  ;;  %v2524_v8 = vsel %vm2333_vm6, %v2465_v12, 0.0  ;;  %v2267_v55 = vld [vmem:[%s10564_s8] sm:$0x1]  ;;  %s13025_s8 = sld [smem:[#allocation25_spill]] }
 0x499   :  { %v2518_v28 = vsel %vm2333_vm6, %v2462_v27, 0.0 }
 0x49a   :  { %2686 = vmatmul.mubr.f32.gmra.mrb[28].mxu1 %v2297_v62  ;;  %v2501_v7 = vadd.f32 %v2500_v40, %v2499_v37  ;;  %v2464_v62 = vmul.f32 %v2432_v10, %v2432_v10  ;;  %v2468_v40 = vmul.f32 %v2436_v49, %v2436_v49 }
 0x49b   :  { %2690 = vmatprep.mubr.f32.mxu1 %v2300_v44  ;;  %v2309_v44 = vld [vmem:[%s10579_s23 + $0x40] sm:$0xff] }
 0x49c   :  { %v2503_v50 = vadd.f32 %v2502_v54, %v2501_v7  ;;  %v2522_v11 = vsel %vm2333_vm6, %v2464_v62, 0.0  ;;  %v2526_v7 = vsel %vm2333_vm6, %v2466_v9, 0.0  ;;  %v2528_v54 = vsel %vm2333_vm6, %v2467_v51, 0.0 }
 0x49e   :  { %2691 = vmatmul.mubr.f32.gmra.mrb[30].mxu1 %v2299_v61  ;;  %v2505_v53 = vadd.f32 %v2504_v17, %v2503_v50  ;;  %v2311_v61 = vld [vmem:[%s10579_s23 + $0x50] sm:$0xff]  ;;  %v2530_v50 = vsel %vm2333_vm6, %v2468_v40, 0.0  ;;  %v2317_v17 = vld [vmem:[%s10579_s23 + $0x80] sm:$0xff] }
 0x49f   :  { %2760 = vmatprep.mubr.f32.mxu1 %v2302_v58  ;;  %v2314_v58 = vld [vmem:[%s10579_s23 + $0x68] sm:$0xff] }
 0x4a0   :  { %v2507_v13 = vadd.f32 %v2506_v36, %v2505_v53  ;;  %v2320_v53 = vld [vmem:[%s10579_s23 + $0x98] sm:$0xff]  ;;  %v2321_v36 = vld [vmem:[%s10579_s23 + $0xa0] sm:$0xff] }
 0x4a2   :  { %2761 = vmatmul.mubr.f32.vlgmr.msra.gmra.mrb[32].mxu1 %v2301_v43  ;;  %v2509_v0 = vadd.f32 %v2508_v23, %v2507_v13  ;;  %v2323_v13 = vld [vmem:[%s10579_s23 + $0xb0] sm:$0xff] }
 0x4a3   :  { %2765 = vmatprep.mubr.f32.mxu1 %v2304_v57  ;;  %v2315_v57 = vld [vmem:[%s10579_s23 + $0x70] sm:$0xff] }
 0x4a4   :  { %v2511_v15 = vadd.f32 %v2510_v31, %v2509_v0  ;;  %v2327_v23 = vld [vmem:[%s10579_s23 + $0xd0] sm:$0xff]  ;;  %v2330_v0 = vld [vmem:[%s10579_s23 + $0xe8] sm:$0xff] }
 0x4a5   :  { %v2331_v31 = vld [vmem:[%s10579_s23 + $0xf0] sm:$0xff] }
 0x4a6   :  { %2766 = vmatmul.mubr.f32.gmra.mrb[34].mxu1 %v2303_v48  ;;  %v2513_v24 = vadd.f32 %v2512_v20, %v2511_v15  ;;  %v2324_v48 = vld [vmem:[%s10579_s23 + $0xb8] sm:$0xff] }
 0x4a7   :  { %2770 = vmatprep.mubr.f32.mxu1 %v2306_v25  ;;  %v2326_v25 = vld [vmem:[%s10579_s23 + $0xc8] sm:$0xff]  ;;  %s13028_s23 = sld [smem:[#allocation22_spill]] }
 0x4a8   :  { %v2515_v21 = vadd.f32 %v2514_v32, %v2513_v24 }
 0x4aa   :  { %2771 = vmatmul.mubr.f32.gmra.mrb[36].mxu1 %v2305_v19  ;;  %v2517_v63 = vadd.f32 %v2516_v2, %v2515_v21 }
 0x4ab   :  { %2775 = vmatprep.mubr.f32.mxu1 %v2308_v46 }
 0x4ac   :  { %v2519_v59 = vadd.f32 %v2518_v28, %v2517_v63 }
 0x4ae   :  { %2776 = vmatmul.mubr.f32.gmra.mrb[38].mxu1 %v2307_v14  ;;  %v2521_v4 = vadd.f32 %v2520_v38, %v2519_v59 }
 0x4af   :  { %2780 = vmatprep.mubr.f32.mxu1 %v2310_v29 }
 0x4b0   :  { %v2523_v37 = vadd.f32 %v2522_v11, %v2521_v4 }
 0x4b2   :  { %2781 = vmatmul.mubr.f32.gmra.mrb[40].mxu1 %v2309_v44  ;;  %v2525_v52 = vadd.f32 %v2524_v8, %v2523_v37 }
 0x4b3   :  { %2785 = vmatprep.mubr.f32.mxu1 %v2312_v39 }
 0x4b4   :  { %v2527_v22 = vadd.f32 %v2526_v7, %v2525_v52  ;;  %v3112_v52 = vld [vmem:[%s13018_s5] sm:$0xff] }
 0x4b6   :  { %2786 = vmatmul.mubr.f32.gmra.mrb[42].mxu1 %v2311_v61  ;;  %v2529_v43 = vadd.f32 %v2528_v54, %v2527_v22 }
 0x4b7   :  { %2790 = vmatprep.mubr.f32.mxu1 %v2314_v58 }
 0x4b8   :  { %v2531_v1 = vadd.f32 %v2530_v50, %v2529_v43 }
 0x4ba   :  { %2791 = vmatmul.mubr.f32.gmra.mrb[44].mxu1 %v2313_v41  ;;  %v2532_v19 = vrot.slane %v2531_v1, 4 }
 0x4bb   :  { %2795 = vmatprep.mubr.f32.mxu1 %v2316_v56 }
 0x4bc   :  { %v2533_v15 = vadd.f32 %v2532_v19, %v2531_v1 }
 0x4be   :  { %2796 = vmatmul.mubr.f32.gmra.mrb[46].mxu1 %v2315_v57  ;;  %v2534_v46 = vrot.slane %v2533_v15, 2 }
 0x4bf   :  { %2800 = vmatprep.mubr.f32.mxu1 %v2318_v60 }
 0x4c0   :  { %v2535_v47 = vadd.f32 %v2534_v46, %v2533_v15 }
 0x4c2   :  { %2801 = vmatmul.mubr.f32.gmra.mrb[48].mxu1 %v2317_v17  ;;  %v2536_v18 = vrot.slane %v2535_v47, 1 }
 0x4c3   :  { %2805 = vmatprep.mubr.f32.mxu1 %v2320_v53 }
 0x4c4   :  { %v2537_v20 = vadd.f32 %v2536_v18, %v2535_v47 }
 0x4c6   :  { %2806 = vmatmul.mubr.f32.gmra.mrb[50].mxu1 %v2319_v5  ;;  %v2538_v24 = vmul.f32 0.00390625, %v2537_v20 }
 0x4c7   :  { %2810 = vmatprep.mubr.f32.mxu1 %v2322_v34 }
 0x4c8   :  { %v2539_v10 = vadd.f32 1e-05, %v2538_v24 }
 0x4ca   :  { %2811 = vmatmul.mubr.f32.gmra.mrb[52].mxu1 %v2321_v36  ;;  %10333 = vrsqrt.f32 %v2539_v10  ;;  %vm2542_vm7 = vcmp.eq.f32.partialorder %v2539_v10, inf  ;;  %v2545_v21 = vand.u32 2147483648, %v2539_v10  ;;  %vm2544_vm8 = vcmp.eq.f32.partialorder %v2539_v10, 0.0 }
 0x4cb   :  { %2815 = vmatprep.mubr.f32.mxu1 %v2324_v48 }
 0x4ce   :  { %2816 = vmatmul.mubr.f32.gmra.mrb[54].mxu1 %v2323_v13 }
 0x4cf   :  { %2820 = vmatprep.mubr.f32.mxu1 %v2326_v25 }
 0x4d2   :  { %2821 = vmatmul.mubr.f32.gmra.mrb[56].mxu1 %v2325_v42 }
 0x4d3   :  { %2825 = vmatprep.mubr.f32.mxu1 %v2328_v3 }
 0x4d4   :  { %v10334_v27 = vpop.eup %10333 }
 0x4d5   :  { %v2541_v32 = vmul.f32 %v10334_v27, %v2539_v10 }
 0x4d6   :  { %2826 = vmatmul.mubr.f32.gmra.mrb[58].mxu1 %v2327_v23 }
 0x4d7   :  { %2830 = vmatprep.mubr.f32.mxu1 %v2330_v0  ;;  %v2543_v14 = vsel %vm2542_vm7, %v2539_v10, %v2541_v32 }
 0x4d8   :  { %v2546_v29 = vsel %vm2544_vm8, %v2545_v21, %v2543_v14 }
 0x4d9   :  { %10335 = vrcp.f32 %v2546_v29  ;;  %v2949_v29 = vld [vmem:[%s13019_s13] sm:$0xff] }
 0x4da   :  { %2831 = vmatmul.mubr.f32.gmra.mrb[60].mxu1 %v2329_v45  ;;  %8806 = vmatprep.mubr.f32.mxu0 %v2949_v29 }
 0x4db   :  { %2835 = vmatprep.mubr.f32.mxu1 %v2332_v30 }
 0x4de   :  { %2836 = vmatmul.mubr.f32.gmra.mrb[62].mxu1 %v2331_v31 }
 0x4df   :  { %8862 = vmatprep.mubr.f32.mxu1 %v3112_v52 }
 0x4e3   :  { %v10336_v26 = vpop.eup %10335 }
 0x4e4   :  { %v2548_v2 = vmul.f32 %v10336_v26, %v2267_v55 }
 0x4e6   :  { %v2549_v63 = vmul.f32 %v2548_v2, %v11940_v33  ;;  %v12099_v59 = vrot.slane %v2548_v2, %v10842_v6 }
 0x4e8   :  { %v2550_v62 = vsub.f32 %v2268_v35, %v2549_v63 }
 0x4ea   :  { %v12102_v16 = vrot.slane %v2550_v62, %v10842_v6 }
 0x535   :  { %v8059_v28 = vpop.f32.mrb[0].mxu1 }
 0x536   :  { %v8060_v44 = vpop.f32.mrb[1].mxu1 }
 0x537   :  { %v8061_v39 = vadd.f32 %v8060_v44, %v8059_v28 }
 0x539   :  { %v2847_v12 = vmul.f32 %v8061_v39, %v12099_v59  ;;  %v8062_v38 = vpop.f32.mrb[2].mxu1 }
 0x53a   :  { %v8063_v4 = vpop.f32.mrb[3].mxu1 }
 0x53b   :  { %v12106_v49 = vadd.f32 %v12102_v16, %v2847_v12  ;;  %v8064_v33 = vadd.f32 %v8063_v4, %v8062_v38 }
 0x53d   :  { %v2848_v9 = vmul.f32 %v8064_v33, %v12099_v59  ;;  %v8065_v11 = vpop.f32.mrb[4].mxu1 }
 0x53e   :  { %v8066_v61 = vpop.f32.mrb[5].mxu1 }
 0x53f   :  { %v12110_v37 = vadd.f32 %v12102_v16, %v2848_v9  ;;  %v8067_v58 = vadd.f32 %v8066_v61, %v8065_v11 }
 0x541   :  { %v2849_v51 = vmul.f32 %v8067_v58, %v12099_v59  ;;  %v8068_v8 = vpop.f32.mrb[6].mxu1 }
 0x542   :  { %v8069_v40 = vpop.f32.mrb[7].mxu1 }
 0x543   :  { %v12115_v7 = vadd.f32 %v12102_v16, %v2849_v51  ;;  %v8070_v41 = vadd.f32 %v8069_v40, %v8068_v8 }
 0x545   :  { %v2850_v22 = vmul.f32 %v8070_v41, %v12099_v59  ;;  %v8071_v56 = vpop.f32.mrb[8].mxu1 }
 0x546   :  { %v8072_v54 = vpop.f32.mrb[9].mxu1 }
 0x547   :  { %v12119_v43 = vadd.f32 %v12102_v16, %v2850_v22  ;;  %v8073_v50 = vadd.f32 %v8072_v54, %v8071_v56 }
 0x549   :  { %v2851_v57 = vmul.f32 %v8073_v50, %v12099_v59  ;;  %v8074_v1 = vpop.f32.mrb[10].mxu1 }
 0x54a   :  { %v8075_v60 = vpop.f32.mrb[11].mxu1 }
 0x54b   :  { %v12123_v17 = vadd.f32 %v12102_v16, %v2851_v57  ;;  %v8076_v53 = vadd.f32 %v8075_v60, %v8074_v1 }
 0x54d   :  { %v2852_v5 = vmul.f32 %v8076_v53, %v12099_v59  ;;  %v8077_v34 = vpop.f32.mrb[12].mxu1 }
 0x54e   :  { %v8078_v36 = vpop.f32.mrb[13].mxu1 }
 0x54f   :  { %v12127_v48 = vadd.f32 %v12102_v16, %v2852_v5  ;;  %v8079_v13 = vadd.f32 %v8078_v36, %v8077_v34 }
 0x551   :  { %v2853_v25 = vmul.f32 %v8079_v13, %v12099_v59  ;;  %v8080_v42 = vpop.f32.mrb[14].mxu1 }
 0x552   :  { %v8081_v3 = vpop.f32.mrb[15].mxu1 }
 0x553   :  { %v12131_v23 = vadd.f32 %v12102_v16, %v2853_v25  ;;  %v8082_v0 = vadd.f32 %v8081_v3, %v8080_v42 }
 0x555   :  { %v2854_v45 = vmul.f32 %v8082_v0, %v12099_v59  ;;  %v8083_v30 = vpop.f32.mrb[16].mxu1 }
 0x556   :  { %v8084_v31 = vpop.f32.mrb[17].mxu1 }
 0x557   :  { %v12135_v19 = vadd.f32 %v12102_v16, %v2854_v45  ;;  %v8085_v15 = vadd.f32 %v8084_v31, %v8083_v30 }
 0x559   :  { %v2855_v46 = vmul.f32 %v8085_v15, %v12099_v59  ;;  %v8086_v47 = vpop.f32.mrb[18].mxu1 }
 0x55a   :  { %v8087_v18 = vpop.f32.mrb[19].mxu1 }
 0x55b   :  { %v12139_v20 = vadd.f32 %v12102_v16, %v2855_v46  ;;  %v8088_v24 = vadd.f32 %v8087_v18, %v8086_v47 }
 0x55d   :  { %v2856_v10 = vmul.f32 %v8088_v24, %v12099_v59  ;;  %v8089_v27 = vpop.f32.mrb[20].mxu1 }
 0x55e   :  { %v8090_v32 = vpop.f32.mrb[21].mxu1 }
 0x55f   :  { %v12143_v14 = vadd.f32 %v12102_v16, %v2856_v10  ;;  %v8091_v21 = vadd.f32 %v8090_v32, %v8089_v27 }
 0x561   :  { %v2857_v26 = vmul.f32 %v8091_v21, %v12099_v59  ;;  %v8092_v55 = vpop.f32.mrb[22].mxu1 }
 0x562   :  { %v8093_v2 = vpop.f32.mrb[23].mxu1 }
 0x563   :  { %v12148_v63 = vadd.f32 %v12102_v16, %v2857_v26  ;;  %v8094_v35 = vadd.f32 %v8093_v2, %v8092_v55 }
 0x565   :  { %v2858_v62 = vmul.f32 %v8094_v35, %v12099_v59  ;;  %v8095_v28 = vpop.f32.mrb[24].mxu1 }
 0x566   :  { %v8096_v44 = vpop.f32.mrb[25].mxu1 }
 0x567   :  { %v12152_v39 = vadd.f32 %v12102_v16, %v2858_v62  ;;  %v8097_v12 = vadd.f32 %v8096_v44, %v8095_v28 }
 0x569   :  { %v2859_v38 = vmul.f32 %v8097_v12, %v12099_v59  ;;  %v8098_v4 = vpop.f32.mrb[26].mxu1 }
 0x56a   :  { %v8099_v33 = vpop.f32.mrb[27].mxu1 }
 0x56b   :  { %v12156_v9 = vadd.f32 %v12102_v16, %v2859_v38  ;;  %v8100_v11 = vadd.f32 %v8099_v33, %v8098_v4 }
 0x56d   :  { %v2860_v61 = vmul.f32 %v8100_v11, %v12099_v59  ;;  %v8101_v58 = vpop.f32.mrb[28].mxu1 }
 0x56e   :  { %v8102_v51 = vpop.f32.mrb[29].mxu1 }
 0x56f   :  { %v12160_v8 = vadd.f32 %v12102_v16, %v2860_v61  ;;  %v8103_v52 = vadd.f32 %v8102_v51, %v8101_v58 }
 0x571   :  { %v2861_v40 = vmul.f32 %v8103_v52, %v12099_v59  ;;  %v8104_v41 = vpop.f32.mrb[30].mxu1 }
 0x572   :  { %v8105_v22 = vpop.f32.mrb[31].mxu1 }
 0x573   :  { %v12164_v56 = vadd.f32 %v12102_v16, %v2861_v40  ;;  %v8106_v54 = vadd.f32 %v8105_v22, %v8104_v41 }
 0x575   :  { %v2862_v50 = vmul.f32 %v8106_v54, %v12099_v59  ;;  %v8139_v57 = vpop.f32.mrb[32].mxu1 }
 0x576   :  { %v8140_v1 = vpop.f32.mrb[33].mxu1 }
 0x577   :  { %v12168_v60 = vadd.f32 %v12102_v16, %v2862_v50  ;;  %v8141_v53 = vadd.f32 %v8140_v1, %v8139_v57 }
 0x579   :  { %v2885_v5 = vmul.f32 %v8141_v53, %v12099_v59  ;;  %v8142_v34 = vpop.f32.mrb[34].mxu1 }
 0x57a   :  { %v8143_v36 = vpop.f32.mrb[35].mxu1 }
 0x57b   :  { %v2901_v13 = vadd.f32 %v2885_v5, %v12102_v16  ;;  %v8144_v25 = vadd.f32 %v8143_v36, %v8142_v34 }
 0x57d   :  { %v2917_v42 = vmax.f32 %v12106_v49, %v2901_v13  ;;  %v2886_v3 = vmul.f32 %v8144_v25, %v12099_v59  ;;  %v8145_v0 = vpop.f32.mrb[36].mxu1 }
 0x57e   :  { %v8146_v45 = vpop.f32.mrb[37].mxu1 }
 0x57f   :  { %v2902_v30 = vadd.f32 %v2886_v3, %v12102_v16  ;;  %v8147_v31 = vadd.f32 %v8146_v45, %v8145_v0  ;;  %v2933_v24 = vmax.f32 %v2917_v42, 0.0 }
 0x581   :  { %v2918_v15 = vmax.f32 %v12110_v37, %v2902_v30  ;;  %v2887_v46 = vmul.f32 %v8147_v31, %v12099_v59  ;;  %v8148_v47 = vpop.f32.mrb[38].mxu1 }
 0x582   :  { %v8149_v18 = vpop.f32.mrb[39].mxu1 }
 0x583   :  { %v2934_v10 = vmax.f32 %v2918_v15, 0.0  ;;  %v2903_v27 = vadd.f32 %v2887_v46, %v12102_v16  ;;  %v8150_v32 = vadd.f32 %v8149_v18, %v8148_v47 }
 0x585   :  { %v12178_v21 = vpack.c.bf16 %v2934_v10, %v2933_v24  ;;  %v2919_v49 = vmax.f32 %v12115_v7, %v2903_v27  ;;  %v2888_v29 = vmul.f32 %v8150_v32, %v12099_v59  ;;  %v8151_v26 = vpop.f32.mrb[40].mxu1 }
 0x586   :  { %v8152_v55 = vpop.f32.mrb[41].mxu1 }
 0x587   :  { %v2904_v2 = vadd.f32 %v2888_v29, %v12102_v16  ;;  %v8153_v37 = vadd.f32 %v8152_v55, %v8151_v26  ;;  %9693 = vmatprep.subr.bf16.mxu0 %v12178_v21  ;;  %9725 = vmatprep.subr.bf16.mxu1 %v12178_v21  ;;  %v2935_v44 = vmax.f32 %v2919_v49, 0.0 }
 0x588   :  { %9695 = vmatpush3.bf16.msra.mxu0 %v12178_v21  ;;  %9727 = vmatpush3.bf16.msra.mxu1 %v12178_v21 }
 0x589   :  { %v2920_v35 = vmax.f32 %v12119_v43, %v2904_v2  ;;  %v2889_v62 = vmul.f32 %v8153_v37, %v12099_v59  ;;  %v8154_v7 = vpop.f32.mrb[42].mxu1 }
 0x58a   :  { %v8155_v28 = vpop.f32.mrb[43].mxu1 }
 0x58b   :  { %v2936_v12 = vmax.f32 %v2920_v35, 0.0  ;;  %v2905_v38 = vadd.f32 %v2889_v62, %v12102_v16  ;;  %v8156_v4 = vadd.f32 %v8155_v28, %v8154_v7 }
 0x58d   :  { %v12190_v33 = vpack.c.bf16 %v2936_v12, %v2935_v44  ;;  %v2921_v11 = vmax.f32 %v12123_v17, %v2905_v38  ;;  %v2890_v61 = vmul.f32 %v8156_v4, %v12099_v59  ;;  %v8157_v58 = vpop.f32.mrb[44].mxu1 }
 0x58e   :  { %v8158_v51 = vpop.f32.mrb[45].mxu1 }
 0x58f   :  { %v2906_v52 = vadd.f32 %v2890_v61, %v12102_v16  ;;  %v8159_v43 = vadd.f32 %v8158_v51, %v8157_v58  ;;  %9697 = vmatprep.subr.bf16.mxu0 %v12190_v33  ;;  %9729 = vmatprep.subr.bf16.mxu1 %v12190_v33  ;;  %v2937_v54 = vmax.f32 %v2921_v11, 0.0 }
 0x590   :  { %9699 = vmatpush3.bf16.msra.mxu0 %v12190_v33  ;;  %9731 = vmatpush3.bf16.msra.mxu1 %v12190_v33 }
 0x591   :  { %v2922_v40 = vmax.f32 %v12127_v48, %v2906_v52  ;;  %v2891_v41 = vmul.f32 %v8159_v43, %v12099_v59  ;;  %v8160_v17 = vpop.f32.mrb[46].mxu1 }
 0x592   :  { %v8161_v22 = vpop.f32.mrb[47].mxu1 }
 0x593   :  { %v2938_v50 = vmax.f32 %v2922_v40, 0.0  ;;  %v2907_v57 = vadd.f32 %v2891_v41, %v12102_v16  ;;  %v8162_v1 = vadd.f32 %v8161_v22, %v8160_v17 }
 0x595   :  { %v12202_v53 = vpack.c.bf16 %v2938_v50, %v2937_v54  ;;  %v2923_v5 = vmax.f32 %v12131_v23, %v2907_v57  ;;  %v2892_v34 = vmul.f32 %v8162_v1, %v12099_v59  ;;  %v8163_v36 = vpop.f32.mrb[48].mxu1 }
 0x596   :  { %v8164_v13 = vpop.f32.mrb[49].mxu1 }
 0x597   :  { %v2908_v25 = vadd.f32 %v2892_v34, %v12102_v16  ;;  %v8165_v48 = vadd.f32 %v8164_v13, %v8163_v36  ;;  %9701 = vmatprep.subr.bf16.mxu0 %v12202_v53  ;;  %9733 = vmatprep.subr.bf16.mxu1 %v12202_v53  ;;  %v2939_v45 = vmax.f32 %v2923_v5, 0.0 }
 0x598   :  { %9703 = vmatpush3.bf16.msra.mxu0 %v12202_v53  ;;  %9735 = vmatpush3.bf16.msra.mxu1 %v12202_v53 }
 0x599   :  { %v2924_v42 = vmax.f32 %v12135_v19, %v2908_v25  ;;  %v2893_v3 = vmul.f32 %v8165_v48, %v12099_v59  ;;  %v8166_v23 = vpop.f32.mrb[50].mxu1 }
 0x59a   :  { %v8167_v0 = vpop.f32.mrb[51].mxu1 }
 0x59b   :  { %v2940_v30 = vmax.f32 %v2924_v42, 0.0  ;;  %v2909_v31 = vadd.f32 %v2893_v3, %v12102_v16  ;;  %v8168_v15 = vadd.f32 %v8167_v0, %v8166_v23  ;;  %v3273_v23 = vld [vmem:[%s13020_s17] sm:$0xff] }
 0x59d   :  { %v12214_v46 = vpack.c.bf16 %v2940_v30, %v2939_v45  ;;  %v2925_v47 = vmax.f32 %v12139_v20, %v2909_v31  ;;  %v2894_v18 = vmul.f32 %v8168_v15, %v12099_v59  ;;  %v8169_v24 = vpop.f32.mrb[52].mxu1  ;;  %v2950_v30 = vld [vmem:[%s13019_s13 + $0x8] sm:$0xff]  ;;  %v3114_v31 = vld [vmem:[%s13018_s5 + $0x10] sm:$0xff] }
 0x59e   :  { %v8170_v10 = vpop.f32.mrb[53].mxu1  ;;  %v2951_v15 = vld [vmem:[%s13019_s13 + $0x10] sm:$0xff] }
 0x59f   :  { %v2910_v27 = vadd.f32 %v2894_v18, %v12102_v16  ;;  %v8171_v19 = vadd.f32 %v8170_v10, %v8169_v24  ;;  %9705 = vmatprep.subr.bf16.mxu0 %v12214_v46  ;;  %9737 = vmatprep.subr.bf16.mxu1 %v12214_v46  ;;  %v2941_v26 = vmax.f32 %v2925_v47, 0.0  ;;  %v3115_v47 = vld [vmem:[%s13018_s5 + $0x18] sm:$0xff]  ;;  %v3116_v24 = vld [vmem:[%s13018_s5 + $0x20] sm:$0xff] }
 0x5a0   :  { %9707 = vmatpush3.bf16.msra.mxu0 %v12214_v46  ;;  %9739 = vmatpush3.bf16.msra.mxu1 %v12214_v46  ;;  %v2952_v18 = vld [vmem:[%s13019_s13 + $0x18] sm:$0xff]  ;;  %v2953_v10 = vld [vmem:[%s13019_s13 + $0x20] sm:$0xff] }
 0x5a1   :  { %v2926_v32 = vmax.f32 %v12143_v14, %v2910_v27  ;;  %v2895_v49 = vmul.f32 %v8171_v19, %v12099_v59  ;;  %v8172_v20 = vpop.f32.mrb[54].mxu1  ;;  %v2954_v27 = vld [vmem:[%s13019_s13 + $0x28] sm:$0xff]  ;;  %v3118_v19 = vld [vmem:[%s13018_s5 + $0x30] sm:$0xff] }
 0x5a2   :  { %v8173_v29 = vpop.f32.mrb[55].mxu1 }
 0x5a3   :  { %v2942_v55 = vmax.f32 %v2926_v32, 0.0  ;;  %v2911_v2 = vadd.f32 %v2895_v49, %v12102_v16  ;;  %v8174_v37 = vadd.f32 %v8173_v29, %v8172_v20  ;;  %v2955_v32 = vld [vmem:[%s13019_s13 + $0x30] sm:$0xff]  ;;  %v3119_v49 = vld [vmem:[%s13018_s5 + $0x38] sm:$0xff]  ;;  %v3120_v20 = vld [vmem:[%s13018_s5 + $0x40] sm:$0xff] }
 0x5a4   :  { %v2957_v29 = vld [vmem:[%s13019_s13 + $0x40] sm:$0xff] }
 0x5a5   :  { %v12226_v35 = vpack.c.bf16 %v2942_v55, %v2941_v26  ;;  %v2927_v62 = vmax.f32 %v12148_v63, %v2911_v2  ;;  %v2896_v7 = vmul.f32 %v8174_v37, %v12099_v59  ;;  %v8175_v28 = vpop.f32.mrb[56].mxu1  ;;  %v3121_v26 = vld [vmem:[%s13018_s5 + $0x48] sm:$0xff]  ;;  %v3122_v55 = vld [vmem:[%s13018_s5 + $0x50] sm:$0xff]  ;;  %v3123_v37 = vld [vmem:[%s13018_s5 + $0x58] sm:$0xff] }
 0x5a6   :  { %v8176_v44 = vpop.f32.mrb[57].mxu1  ;;  %v2959_v2 = vld [vmem:[%s13019_s13 + $0x50] sm:$0xff] }
 0x5a7   :  { %v2912_v12 = vadd.f32 %v2896_v7, %v12102_v16  ;;  %v8177_v14 = vadd.f32 %v8176_v44, %v8175_v28  ;;  %9709 = vmatprep.subr.bf16.mxu0 %v12226_v35  ;;  %9741 = vmatprep.subr.bf16.mxu1 %v12226_v35  ;;  %v2943_v61 = vmax.f32 %v2927_v62, 0.0  ;;  %v3124_v62 = vld [vmem:[%s13018_s5 + $0x60] sm:$0xff]  ;;  %v3125_v28 = vld [vmem:[%s13018_s5 + $0x68] sm:$0xff] }
 0x5a8   :  { %9711 = vmatpush3.bf16.msra.mxu0 %v12226_v35  ;;  %9743 = vmatpush3.bf16.msra.mxu1 %v12226_v35  ;;  %v2961_v7 = vld [vmem:[%s13019_s13 + $0x60] sm:$0xff]  ;;  %v2962_v44 = vld [vmem:[%s13019_s13 + $0x68] sm:$0xff] }
 0x5a9   :  { %v2928_v38 = vmax.f32 %v12152_v39, %v2912_v12  ;;  %v2897_v4 = vmul.f32 %v8177_v14, %v12099_v59  ;;  %v8178_v63 = vpop.f32.mrb[58].mxu1  ;;  %v2963_v12 = vld [vmem:[%s13019_s13 + $0x70] sm:$0xff]  ;;  %v3127_v14 = vld [vmem:[%s13018_s5 + $0x78] sm:$0xff] }
 0x5aa   :  { %v8179_v11 = vpop.f32.mrb[59].mxu1 }
 0x5ab   :  { %v2944_v58 = vmax.f32 %v2928_v38, 0.0  ;;  %v2913_v51 = vadd.f32 %v2897_v4, %v12102_v16  ;;  %v8180_v52 = vadd.f32 %v8179_v11, %v8178_v63  ;;  %v2964_v38 = vld [vmem:[%s13019_s13 + $0x78] sm:$0xff]  ;;  %v3661_v4 = vld [vmem:[%s13021_s21] sm:$0xff]  ;;  %v3662_v63 = vld [vmem:[%s13021_s21 + $0x8] sm:$0xff] }
 0x5ac   :  { %v3663_v11 = vld [vmem:[%s13021_s21 + $0x10] sm:$0xff] }
 0x5ad   :  { %v12238_v43 = vpack.c.bf16 %v2944_v58, %v2943_v61  ;;  %v2929_v40 = vmax.f32 %v12156_v9, %v2913_v51  ;;  %v2898_v41 = vmul.f32 %v8180_v52, %v12099_v59  ;;  %v8181_v17 = vpop.f32.mrb[60].mxu1  ;;  %v3664_v61 = vld [vmem:[%s13021_s21 + $0x18] sm:$0xff]  ;;  %v3665_v58 = vld [vmem:[%s13021_s21 + $0x20] sm:$0xff]  ;;  %v3666_v51 = vld [vmem:[%s13021_s21 + $0x28] sm:$0xff] }
 0x5ae   :  { %v8182_v22 = vpop.f32.mrb[61].mxu1  ;;  %v3667_v52 = vld [vmem:[%s13021_s21 + $0x30] sm:$0xff] }
 0x5af   :  { %v2914_v54 = vadd.f32 %v2898_v41, %v12102_v16  ;;  %v8183_v39 = vadd.f32 %v8182_v22, %v8181_v17  ;;  %9713 = vmatprep.subr.bf16.mxu0 %v12238_v43  ;;  %9745 = vmatprep.subr.bf16.mxu1 %v12238_v43  ;;  %v2945_v5 = vmax.f32 %v2929_v40, 0.0  ;;  %v3669_v40 = vld [vmem:[%s13021_s21 + $0x40] sm:$0xff]  ;;  %v3670_v41 = vld [vmem:[%s13021_s21 + $0x48] sm:$0xff]  ;;  %v3671_v17 = vld [vmem:[%s13021_s21 + $0x50] sm:$0xff] }
 0x5b0   :  { %9715 = vmatpush3.bf16.msra.mxu0 %v12238_v43  ;;  %9747 = vmatpush3.bf16.msra.mxu1 %v12238_v43  ;;  %v3672_v22 = vld [vmem:[%s13021_s21 + $0x58] sm:$0xff] }
 0x5b1   :  { %v2930_v50 = vmax.f32 %v12160_v8, %v2914_v54  ;;  %v2899_v57 = vmul.f32 %v8183_v39, %v12099_v59  ;;  %v8184_v9 = vpop.f32.mrb[62].mxu1  ;;  %v3673_v54 = vld [vmem:[%s13021_s21 + $0x60] sm:$0xff]  ;;  %v3674_v39 = vld [vmem:[%s13021_s21 + $0x68] sm:$0xff] }
 0x5b2   :  { %v8185_v1 = vpop.f32.mrb[63].mxu1 }
 0x5b3   :  { %v2946_v34 = vmax.f32 %v2930_v50, 0.0  ;;  %v2915_v36 = vadd.f32 %v2899_v57, %v12102_v16  ;;  %v8186_v13 = vadd.f32 %v8185_v1, %v8184_v9  ;;  %v3675_v50 = vld [vmem:[%s13021_s21 + $0x70] sm:$0xff]  ;;  %v3676_v57 = vld [vmem:[%s13021_s21 + $0x78] sm:$0xff]  ;;  %v3110_v9 = vld [vmem:[%s13022_s25] sm:$0xff] }
 0x5b4   :  { %v3111_v1 = vld [vmem:[%s13022_s25 + $0x8] sm:$0xff]  ;;  %s13052_s25 = sld [smem:[#allocation47_spill]] }
 0x5b5   :  { %v12250_v25 = vpack.c.bf16 %v2946_v34, %v2945_v5  ;;  %v2931_v48 = vmax.f32 %v12164_v56, %v2915_v36  ;;  %v2900_v42 = vmul.f32 %v8186_v13, %v12099_v59  ;;  %v3274_v56 = vld [vmem:[%s13020_s17 + $0x8] sm:$0xff]  ;;  %v9760_v5 = vpack.c.bf16 %v3111_v1, %v3110_v9  ;;  %v3822_v34 = vld [vmem:[%s13023_s29] sm:$0xff]  ;;  %s13050_s17 = sld [smem:[#allocation49_spill]] }
 0x5b6   :  { %v3823_v36 = vld [vmem:[%s13023_s29 + $0x8] sm:$0xff]  ;;  %s13053_s29 = sld [smem:[#allocation51_spill]] }
 0x5b7   :  { %v2916_v3 = vadd.f32 %v2900_v42, %v12102_v16  ;;  %9717 = vmatprep.subr.bf16.mxu0 %v12250_v25  ;;  %9749 = vmatprep.subr.bf16.mxu1 %v12250_v25  ;;  %v2947_v0 = vmax.f32 %v2931_v48, 0.0  ;;  %v9756_v16 = vpack.c.bf16 %v3274_v56, %v3273_v23 }
 0x5b8   :  { %9719 = vmatpush3.bf16.msra.mxu0 %v12250_v25  ;;  %9751 = vmatpush3.bf16.msra.mxu1 %v12250_v25 }
 0x5b9   :  { %v2932_v8 = vmax.f32 %v12168_v60, %v2916_v3  ;;  %v3113_v60 = vld [vmem:[%s13018_s5 + $0x8] sm:$0xff]  ;;  %v9796_v3 = vpack.c.bf16 %v3823_v36, %v3822_v34 }
 0x5bb   :  { %v2948_v59 = vmax.f32 %v2932_v8, 0.0 }
 0x5bd   :  { %v12262_v45 = vpack.c.bf16 %v2948_v59, %v2947_v0 }
 0x5bf   :  { %9721 = vmatprep.subr.bf16.mxu0 %v12262_v45  ;;  %9753 = vmatprep.subr.bf16.mxu1 %v12262_v45 }
 0x5c0   :  { %9723 = vmatpush3.bf16.msra.mxu0 %v12262_v45  ;;  %9755 = vmatpush3.bf16.msra.mxu1 %v12262_v45 }
 0x5c1   :  { %9765 = vmatprep.subr.bf16.mxu1 %v12178_v21  ;;  %9757 = vmatprep.subr.bf16.mxu0 %v9756_v16 }
 0x5c3   :  { %8863 = vmatmul.mubr.f32.vlgmr.msra.gmra.mrb[64].mxu1 %v3113_v60  ;;  %8807 = vmatmul.mubr.f32.vlgmr.msra.gmra.mrb[32].mxu0 %v2950_v30 }
 0x5c4   :  { %9767 = vmatpush3.bf16.msra.mxu1 %v12178_v21  ;;  %8865 = vmatprep.mubr.f32.mxu1 %v3114_v31  ;;  %v3117_v21 = vld [vmem:[%s13018_s5 + $0x28] sm:$0xff] }
 0x5c5   :  { %9769 = vmatprep.subr.bf16.mxu1 %v12190_v33  ;;  %8809 = vmatprep.mubr.f32.mxu0 %v2951_v15 }
 0x5c6   :  { %9759 = vmatpush3.bf16.msra.mxu0 %v9756_v16 }
 0x5c7   :  { %8866 = vmatmul.mubr.f32.gmra.mrb[66].mxu1 %v3115_v47  ;;  %8810 = vmatmul.mubr.f32.gmra.mrb[34].mxu0 %v2952_v18 }
 0x5c8   :  { %9771 = vmatpush3.bf16.msra.mxu1 %v12190_v33  ;;  %8868 = vmatprep.mubr.f32.mxu1 %v3116_v24  ;;  %v2956_v33 = vld [vmem:[%s13019_s13 + $0x38] sm:$0xff] }
 0x5c9   :  { %9773 = vmatprep.subr.bf16.mxu1 %v12202_v53  ;;  %8812 = vmatprep.mubr.f32.mxu0 %v2953_v10 }
 0x5ca   :  { %9761 = vmatprep.subr.bf16.mxu0 %v9760_v5 }
 0x5cb   :  { %8869 = vmatmul.mubr.f32.gmra.mrb[68].mxu1 %v3117_v21  ;;  %8813 = vmatmul.mubr.f32.gmra.mrb[36].mxu0 %v2954_v27 }
 0x5cc   :  { %9775 = vmatpush3.bf16.msra.mxu1 %v12202_v53  ;;  %8871 = vmatprep.mubr.f32.mxu1 %v3118_v19  ;;  %v2958_v53 = vld [vmem:[%s13019_s13 + $0x48] sm:$0xff] }
 0x5cd   :  { %9777 = vmatprep.subr.bf16.mxu1 %v12214_v46  ;;  %8815 = vmatprep.mubr.f32.mxu0 %v2955_v32 }
 0x5cf   :  { %8872 = vmatmul.mubr.f32.gmra.mrb[70].mxu1 %v3119_v49  ;;  %8816 = vmatmul.mubr.f32.gmra.mrb[38].mxu0 %v2956_v33 }
 0x5d0   :  { %9779 = vmatpush3.bf16.msra.mxu1 %v12214_v46  ;;  %8874 = vmatprep.mubr.f32.mxu1 %v3120_v20  ;;  %v2960_v46 = vld [vmem:[%s13019_s13 + $0x58] sm:$0xff]  ;;  %s13049_s13 = sld [smem:[#allocation43_spill]] }
 0x5d1   :  { %9781 = vmatprep.subr.bf16.mxu1 %v12226_v35  ;;  %8818 = vmatprep.mubr.f32.mxu0 %v2957_v29 }
 0x5d3   :  { %8875 = vmatmul.mubr.f32.gmra.mrb[72].mxu1 %v3121_v26  ;;  %8819 = vmatmul.mubr.f32.gmra.mrb[40].mxu0 %v2958_v53 }
 0x5d4   :  { %9783 = vmatpush3.bf16.msra.mxu1 %v12226_v35  ;;  %8877 = vmatprep.mubr.f32.mxu1 %v3122_v55  ;;  %v3126_v35 = vld [vmem:[%s13018_s5 + $0x70] sm:$0xff]  ;;  %s13048_s5 = sld [smem:[#allocation50_spill]] }
 0x5d5   :  { %9785 = vmatprep.subr.bf16.mxu1 %v12238_v43  ;;  %8821 = vmatprep.mubr.f32.mxu0 %v2959_v2 }
 0x5d7   :  { %8878 = vmatmul.mubr.f32.gmra.mrb[74].mxu1 %v3123_v37  ;;  %8822 = vmatmul.mubr.f32.gmra.mrb[42].mxu0 %v2960_v46 }
 0x5d8   :  { %9787 = vmatpush3.bf16.msra.mxu1 %v12238_v43  ;;  %8880 = vmatprep.mubr.f32.mxu1 %v3124_v62  ;;  %v3668_v43 = vld [vmem:[%s13021_s21 + $0x38] sm:$0xff]  ;;  %s13051_s21 = sld [smem:[#allocation48_spill]] }
 0x5d9   :  { %9789 = vmatprep.subr.bf16.mxu1 %v12250_v25  ;;  %8824 = vmatprep.mubr.f32.mxu0 %v2961_v7 }
 0x5db   :  { %8881 = vmatmul.mubr.f32.gmra.mrb[76].mxu1 %v3125_v28  ;;  %8825 = vmatmul.mubr.f32.gmra.mrb[44].mxu0 %v2962_v44 }
 0x5dc   :  { %9791 = vmatpush3.bf16.msra.mxu1 %v12250_v25  ;;  %8883 = vmatprep.mubr.f32.mxu1 %v3126_v35 }
 0x5dd   :  { %9793 = vmatprep.subr.bf16.mxu1 %v12262_v45  ;;  %8827 = vmatprep.mubr.f32.mxu0 %v2963_v12 }
 0x5df   :  { %8884 = vmatmul.mubr.f32.gmra.mrb[78].mxu1 %v3127_v14  ;;  %8828 = vmatmul.mubr.f32.gmra.mrb[46].mxu0 %v2964_v38 }
 0x5e0   :  { %9795 = vmatpush3.bf16.msra.mxu1 %v12262_v45  ;;  %8974 = vmatprep.mubr.f32.mxu1 %v3661_v4 }
 0x5e3   :  { %8975 = vmatmul.mubr.f32.vlgmr.msra.gmra.mrb[80].mxu1 %v3662_v63 }
 0x5e4   :  { %8977 = vmatprep.mubr.f32.mxu1 %v3663_v11 }
 0x5e7   :  { %8978 = vmatmul.mubr.f32.gmra.mrb[82].mxu1 %v3664_v61 }
 0x5e8   :  { %8980 = vmatprep.mubr.f32.mxu1 %v3665_v58 }
 0x5eb   :  { %8981 = vmatmul.mubr.f32.gmra.mrb[84].mxu1 %v3666_v51 }
 0x5ec   :  { %8983 = vmatprep.mubr.f32.mxu1 %v3667_v52 }
 0x5ef   :  { %8984 = vmatmul.mubr.f32.gmra.mrb[86].mxu1 %v3668_v43  ;;  %v4035_v43 = vld [vmem:[%s13024_s3] sm:$0xff] }
 0x5f0   :  { %8986 = vmatprep.mubr.f32.mxu1 %v3669_v40 }
 0x5f3   :  { %8987 = vmatmul.mubr.f32.gmra.mrb[88].mxu1 %v3670_v41 }
 0x5f4   :  { %8989 = vmatprep.mubr.f32.mxu1 %v3671_v17 }
 0x5f7   :  { %8990 = vmatmul.mubr.f32.gmra.mrb[90].mxu1 %v3672_v22 }
 0x5f8   :  { %8992 = vmatprep.mubr.f32.mxu1 %v3673_v54 }
 0x5fb   :  { %8993 = vmatmul.mubr.f32.gmra.mrb[92].mxu1 %v3674_v39 }
 0x5fc   :  { %8995 = vmatprep.mubr.f32.mxu1 %v3675_v50 }
 0x5ff   :  { %8996 = vmatmul.mubr.f32.gmra.mrb[94].mxu1 %v3676_v57 }
 0x600   :  { %9058 = vmatprep.mubr.f32.mxu1 %v4035_v43 }
 0x696   :  { %v8864_v13 = vpop.f32.mrb[64].mxu1  ;;  %v8808_v25 = vpop.f32.mrb[32].mxu0 }
 0x697   :  { %v3194_v48 = vpop.f32.mrb[65].mxu1  ;;  %v3031_v42 = vpop.f32.mrb[33].mxu0 }
 0x698   :  { %8890 = vmatprep.mubr.msk.f32.mxu0 %vm2333_vm6, %v3194_v48 }
 0x699   :  { %8891 = vmatmul.mubr.msk.f32.vlgmr.msra.gmra.mrb[48].mxu0 %vm2333_vm6, %v8864_v13 }
 0x69a   :  { %v8867_v8 = vpop.f32.mrb[66].mxu1  ;;  %9763 = vmatpush3.bf16.msra.mxu0 %v9760_v5  ;;  %v8811_v23 = vpop.f32.mrb[34].mxu0 }
 0x69b   :  { %v3204_v56 = vpop.f32.mrb[67].mxu1  ;;  %v3041_v0 = vpop.f32.mrb[35].mxu0  ;;  %9797 = vmatprep.subr.bf16.mxu0 %v9796_v3 }
 0x69c   :  { %8893 = vmatprep.mubr.msk.f32.mxu0 %vm2333_vm6, %v3204_v56 }
 0x69d   :  { %8894 = vmatmul.mubr.msk.f32.gmra.mrb[50].mxu0 %vm2333_vm6, %v8867_v8 }
 0x69e   :  { %v8870_v59 = vpop.f32.mrb[68].mxu1  ;;  %v8814_v45 = vpop.f32.mrb[36].mxu0 }
 0x69f   :  { %v3214_v16 = vpop.f32.mrb[69].mxu1  ;;  %v3051_v60 = vpop.f32.mrb[37].mxu0 }
 0x6a0   :  { %8896 = vmatprep.mubr.msk.f32.mxu0 %vm2333_vm6, %v3214_v16 }
 0x6a1   :  { %8897 = vmatmul.mubr.msk.f32.gmra.mrb[52].mxu0 %vm2333_vm6, %v8870_v59 }
 0x6a2   :  { %v8873_v30 = vpop.f32.mrb[70].mxu1  ;;  %v8817_v31 = vpop.f32.mrb[38].mxu0 }
 0x6a3   :  { %v3224_v15 = vpop.f32.mrb[71].mxu1  ;;  %v3061_v47 = vpop.f32.mrb[39].mxu0 }
 0x6a4   :  { %8899 = vmatprep.mubr.msk.f32.mxu0 %vm2333_vm6, %v3224_v15 }
 0x6a5   :  { %8900 = vmatmul.mubr.msk.f32.gmra.mrb[54].mxu0 %vm2333_vm6, %v8873_v30 }
 0x6a6   :  { %v8876_v18 = vpop.f32.mrb[72].mxu1  ;;  %v8820_v24 = vpop.f32.mrb[40].mxu0 }
 0x6a7   :  { %v3234_v10 = vpop.f32.mrb[73].mxu1  ;;  %v3071_v21 = vpop.f32.mrb[41].mxu0 }
 0x6a8   :  { %8902 = vmatprep.mubr.msk.f32.mxu0 %vm2333_vm6, %v3234_v10 }
 0x6a9   :  { %8903 = vmatmul.mubr.msk.f32.gmra.mrb[56].mxu0 %vm2333_vm6, %v8876_v18 }
 0x6aa   :  { %v8879_v27 = vpop.f32.mrb[74].mxu1  ;;  %v8823_v19 = vpop.f32.mrb[42].mxu0 }
 0x6ab   :  { %v3244_v32 = vpop.f32.mrb[75].mxu1  ;;  %v3081_v49 = vpop.f32.mrb[43].mxu0 }
 0x6ac   :  { %8905 = vmatprep.mubr.msk.f32.mxu0 %vm2333_vm6, %v3244_v32 }
 0x6ad   :  { %8906 = vmatmul.mubr.msk.f32.gmra.mrb[58].mxu0 %vm2333_vm6, %v8879_v27 }
 0x6ae   :  { %v8882_v33 = vpop.f32.mrb[76].mxu1  ;;  %v8826_v20 = vpop.f32.mrb[44].mxu0 }
 0x6af   :  { %v3254_v29 = vpop.f32.mrb[77].mxu1  ;;  %v3091_v26 = vpop.f32.mrb[45].mxu0 }
 0x6b0   :  { %8908 = vmatprep.mubr.msk.f32.mxu0 %vm2333_vm6, %v3254_v29 }
 0x6b1   :  { %8909 = vmatmul.mubr.msk.f32.gmra.mrb[60].mxu0 %vm2333_vm6, %v8882_v33 }
 0x6b2   :  { %v8885_v53 = vpop.f32.mrb[78].mxu1  ;;  %v8829_v55 = vpop.f32.mrb[46].mxu0 }
 0x6b3   :  { %v3264_v2 = vpop.f32.mrb[79].mxu1  ;;  %v3101_v37 = vpop.f32.mrb[47].mxu0 }
 0x6b4   :  { %8911 = vmatprep.mubr.msk.f32.mxu0 %vm2333_vm6, %v3264_v2 }
 0x6b5   :  { %8912 = vmatmul.mubr.msk.f32.gmra.mrb[62].mxu0 %vm2333_vm6, %v8885_v53 }
 0x6b6   :  { %8918 = vmatprep.mubr.msk.f32.mxu0 %vm2333_vm6, %v3031_v42  ;;  %v8976_v46 = vpop.f32.mrb[80].mxu1 }
 0x6b7   :  { %v3743_v62 = vpop.f32.mrb[81].mxu1 }
 0x6b9   :  { %8919 = vmatmul.mubr.msk.f32.vlgmr.msra.gmra.mrb[48].mxu0 %vm2333_vm6, %v8808_v25 }
 0x6ba   :  { %8921 = vmatprep.mubr.msk.f32.mxu0 %vm2333_vm6, %v3041_v0  ;;  %9799 = vmatpush3.bf16.msra.mxu0 %v9796_v3  ;;  %v8979_v7 = vpop.f32.mrb[82].mxu1 }
 0x6bb   :  { %v3753_v28 = vpop.f32.mrb[83].mxu1 }
 0x6bd   :  { %8922 = vmatmul.mubr.msk.f32.gmra.mrb[50].mxu0 %vm2333_vm6, %v8811_v23 }
 0x6be   :  { %8924 = vmatprep.mubr.msk.f32.mxu0 %vm2333_vm6, %v3051_v60  ;;  %v8982_v44 = vpop.f32.mrb[84].mxu1 }
 0x6bf   :  { %v3763_v35 = vpop.f32.mrb[85].mxu1 }
 0x6c1   :  { %8925 = vmatmul.mubr.msk.f32.gmra.mrb[52].mxu0 %vm2333_vm6, %v8814_v45 }
 0x6c2   :  { %8927 = vmatprep.mubr.msk.f32.mxu0 %vm2333_vm6, %v3061_v47  ;;  %v8985_v12 = vpop.f32.mrb[86].mxu1 }
 0x6c3   :  { %v3773_v14 = vpop.f32.mrb[87].mxu1 }
 0x6c5   :  { %8928 = vmatmul.mubr.msk.f32.gmra.mrb[54].mxu0 %vm2333_vm6, %v8817_v31 }
 0x6c6   :  { %8930 = vmatprep.mubr.msk.f32.mxu0 %vm2333_vm6, %v3071_v21  ;;  %v8988_v38 = vpop.f32.mrb[88].mxu1 }
 0x6c7   :  { %v3783_v4 = vpop.f32.mrb[89].mxu1 }
 0x6c9   :  { %8931 = vmatmul.mubr.msk.f32.gmra.mrb[56].mxu0 %vm2333_vm6, %v8820_v24 }
 0x6ca   :  { %8933 = vmatprep.mubr.msk.f32.mxu0 %vm2333_vm6, %v3081_v49  ;;  %v8991_v63 = vpop.f32.mrb[90].mxu1 }
 0x6cb   :  { %v3793_v11 = vpop.f32.mrb[91].mxu1 }
 0x6cd   :  { %8934 = vmatmul.mubr.msk.f32.gmra.mrb[58].mxu0 %vm2333_vm6, %v8823_v19 }
 0x6ce   :  { %8936 = vmatprep.mubr.msk.f32.mxu0 %vm2333_vm6, %v3091_v26  ;;  %v8994_v61 = vpop.f32.mrb[92].mxu1 }
 0x6cf   :  { %v3803_v58 = vpop.f32.mrb[93].mxu1 }
 0x6d1   :  { %8937 = vmatmul.mubr.msk.f32.gmra.mrb[60].mxu0 %vm2333_vm6, %v8826_v20 }
 0x6d2   :  { %8939 = vmatprep.mubr.msk.f32.mxu0 %vm2333_vm6, %v3101_v37  ;;  %v8997_v51 = vpop.f32.mrb[94].mxu1 }
 0x6d3   :  { %v3813_v52 = vpop.f32.mrb[95].mxu1 }
 0x6d5   :  { %8940 = vmatmul.mubr.msk.f32.gmra.mrb[62].mxu0 %vm2333_vm6, %v8829_v55 }
 0x6d6   :  { %9002 = vmatprep.mubr.msk.f32.mxu0 %vm2333_vm6, %v3743_v62 }
 0x6d9   :  { %9003 = vmatmul.mubr.msk.f32.vlgmr.msra.gmra.mrb[48].mxu0 %vm2333_vm6, %v8976_v46 }
 0x6da   :  { %9005 = vmatprep.mubr.msk.f32.mxu0 %vm2333_vm6, %v3753_v28 }
 0x6dd   :  { %9006 = vmatmul.mubr.msk.f32.gmra.mrb[50].mxu0 %vm2333_vm6, %v8979_v7 }
 0x6de   :  { %9008 = vmatprep.mubr.msk.f32.mxu0 %vm2333_vm6, %v3763_v35 }
 0x6e1   :  { %9009 = vmatmul.mubr.msk.f32.gmra.mrb[52].mxu0 %vm2333_vm6, %v8982_v44 }
 0x6e2   :  { %9011 = vmatprep.mubr.msk.f32.mxu0 %vm2333_vm6, %v3773_v14 }
 0x6e5   :  { %9012 = vmatmul.mubr.msk.f32.gmra.mrb[54].mxu0 %vm2333_vm6, %v8985_v12 }
 0x6e6   :  { %9014 = vmatprep.mubr.msk.f32.mxu0 %vm2333_vm6, %v3783_v4  ;;  %v4036_v4 = vld [vmem:[%s13024_s3 + $0x8] sm:$0xff] }
 0x6e9   :  { %9015 = vmatmul.mubr.msk.f32.gmra.mrb[56].mxu0 %vm2333_vm6, %v8988_v38 }
 0x6ea   :  { %9017 = vmatprep.mubr.msk.f32.mxu0 %vm2333_vm6, %v3793_v11 }
 0x6ed   :  { %9018 = vmatmul.mubr.msk.f32.gmra.mrb[58].mxu0 %vm2333_vm6, %v8991_v63  ;;  %v4037_v63 = vld [vmem:[%s13024_s3 + $0x10] sm:$0xff] }
 0x6ee   :  { %9020 = vmatprep.mubr.msk.f32.mxu0 %vm2333_vm6, %v3803_v58  ;;  %v4038_v58 = vld [vmem:[%s13024_s3 + $0x18] sm:$0xff] }
 0x6f1   :  { %9021 = vmatmul.mubr.msk.f32.gmra.mrb[60].mxu0 %vm2333_vm6, %v8994_v61 }
 0x6f2   :  { %9023 = vmatprep.mubr.msk.f32.mxu0 %vm2333_vm6, %v3813_v52 }
 0x6f5   :  { %9024 = vmatmul.mubr.msk.f32.gmra.mrb[62].mxu0 %vm2333_vm6, %v8997_v51  ;;  %v4039_v51 = vld [vmem:[%s13024_s3 + $0x20] sm:$0xff] }
 0x7ac   :  { %v12383_v40 = vpop.f32.mrb[48].mxu0 }
 0x7ad   :  { %v4053_v41 = vsel %vm4051_vm9, %v12383_v40, 0.0  ;;  %v12387_v17 = vpop.f32.mrb[49].mxu0 }
 0x7ae   :  { %v4052_v22 = vsel %vm4051_vm9, %v12387_v17, 0.0  ;;  %v12393_v54 = vpack.c.bf16 %v12383_v40, %v12387_v17 }
 0x7af   :  { %v4054_v39 = vadd.f32 %v4053_v41, %v4052_v22  ;;  %v4040_v41 = vld [vmem:[%s13024_s3 + $0x28] sm:$0xff]  ;;  %v4041_v22 = vld [vmem:[%s13024_s3 + $0x30] sm:$0xff] }
 0x7b0   :  { %v12395_v50 = vpop.f32.mrb[50].mxu0  ;;  %9801 = vmatprep.subr.bf16.mxu1 %v12393_v54 }
 0x7b1   :  { %v12398_v57 = vpop.f32.mrb[51].mxu0  ;;  %9803 = vmatpush3.bf16.msra.mxu1 %v12393_v54  ;;  %v4057_v34 = vsel %vm4051_vm9, %v12395_v50, 0.0 }
 0x7b2   :  { %v4055_v9 = vsel %vm4051_vm9, %v12398_v57, 0.0  ;;  %v12405_v1 = vpack.c.bf16 %v12395_v50, %v12398_v57 }
 0x7b3   :  { %v4056_v5 = vadd.f32 %v4055_v9, %v4054_v39  ;;  %v4042_v9 = vld [vmem:[%s13024_s3 + $0x38] sm:$0xff]  ;;  %s13054_s3 = sld [smem:[#allocation52_spill]] }
 0x7b4   :  { %v12409_v36 = vpop.f32.mrb[52].mxu0  ;;  %9805 = vmatprep.subr.bf16.mxu1 %v12405_v1 }
 0x7b5   :  { %v12412_v13 = vpop.f32.mrb[53].mxu0  ;;  %v4058_v25 = vadd.f32 %v4057_v34, %v4056_v5  ;;  %9807 = vmatpush3.bf16.msra.mxu1 %v12405_v1  ;;  %v4061_v8 = vsel %vm4051_vm9, %v12409_v36, 0.0  ;;  %v4043_v34 = vld [vmem:[%s13025_s8] sm:$0xff] }
 0x7b6   :  { %v4059_v48 = vsel %vm4051_vm9, %v12412_v13, 0.0  ;;  %v12419_v42 = vpack.c.bf16 %v12409_v36, %v12412_v13 }
 0x7b7   :  { %v4060_v3 = vadd.f32 %v4059_v48, %v4058_v25 }
 0x7b8   :  { %v12423_v23 = vpop.f32.mrb[54].mxu0  ;;  %9809 = vmatprep.subr.bf16.mxu1 %v12419_v42 }
 0x7b9   :  { %v12426_v56 = vpop.f32.mrb[55].mxu0  ;;  %v4062_v0 = vadd.f32 %v4061_v8, %v4060_v3  ;;  %9811 = vmatpush3.bf16.msra.mxu1 %v12419_v42  ;;  %v4065_v60 = vsel %vm4051_vm9, %v12423_v23, 0.0 }
 0x7ba   :  { %v4063_v59 = vsel %vm4051_vm9, %v12426_v56, 0.0  ;;  %v12433_v45 = vpack.c.bf16 %v12423_v23, %v12426_v56 }
 0x7bb   :  { %v4064_v16 = vadd.f32 %v4063_v59, %v4062_v0 }
 0x7bc   :  { %v12437_v30 = vpop.f32.mrb[56].mxu0  ;;  %9813 = vmatprep.subr.bf16.mxu1 %v12433_v45 }
 0x7bd   :  { %v12440_v31 = vpop.f32.mrb[57].mxu0  ;;  %v4066_v15 = vadd.f32 %v4065_v60, %v4064_v16  ;;  %9815 = vmatpush3.bf16.msra.mxu1 %v12433_v45  ;;  %v4069_v10 = vsel %vm4051_vm9, %v12437_v30, 0.0 }
 0x7be   :  { %v4067_v47 = vsel %vm4051_vm9, %v12440_v31, 0.0  ;;  %v12447_v18 = vpack.c.bf16 %v12437_v30, %v12440_v31 }
 0x7bf   :  { %v4068_v24 = vadd.f32 %v4067_v47, %v4066_v15 }
 0x7c0   :  { %v12451_v21 = vpop.f32.mrb[58].mxu0  ;;  %9817 = vmatprep.subr.bf16.mxu1 %v12447_v18 }
 0x7c1   :  { %v12454_v27 = vpop.f32.mrb[59].mxu0  ;;  %v4070_v19 = vadd.f32 %v4069_v10, %v4068_v24  ;;  %9819 = vmatpush3.bf16.msra.mxu1 %v12447_v18  ;;  %v4073_v20 = vsel %vm4051_vm9, %v12451_v21, 0.0 }
 0x7c2   :  { %v4071_v32 = vsel %vm4051_vm9, %v12454_v27, 0.0  ;;  %v12461_v49 = vpack.c.bf16 %v12451_v21, %v12454_v27 }
 0x7c3   :  { %v4072_v33 = vadd.f32 %v4071_v32, %v4070_v19 }
 0x7c4   :  { %v12465_v29 = vpop.f32.mrb[60].mxu0  ;;  %9821 = vmatprep.subr.bf16.mxu1 %v12461_v49 }
 0x7c5   :  { %v12468_v26 = vpop.f32.mrb[61].mxu0  ;;  %v4074_v53 = vadd.f32 %v4073_v20, %v4072_v33  ;;  %9823 = vmatpush3.bf16.msra.mxu1 %v12461_v49  ;;  %v4077_v46 = vsel %vm4051_vm9, %v12465_v29, 0.0  ;;  %v4044_v20 = vld [vmem:[%s13025_s8 + $0x8] sm:$0xff] }
 0x7c6   :  { %v4075_v55 = vsel %vm4051_vm9, %v12468_v26, 0.0  ;;  %v12475_v2 = vpack.c.bf16 %v12465_v29, %v12468_v26 }
 0x7c7   :  { %v4076_v37 = vadd.f32 %v4075_v55, %v4074_v53  ;;  %v4045_v55 = vld [vmem:[%s13025_s8 + $0x10] sm:$0xff] }
 0x7c8   :  { %v12479_v62 = vpop.f32.mrb[62].mxu0  ;;  %9825 = vmatprep.subr.bf16.mxu1 %v12475_v2 }
 0x7c9   :  { %v12482_v7 = vpop.f32.mrb[63].mxu0  ;;  %v4078_v28 = vadd.f32 %v4077_v46, %v4076_v37  ;;  %9827 = vmatpush3.bf16.msra.mxu1 %v12475_v2  ;;  %v4081_v14 = vsel %vm4051_vm9, %v12479_v62, 0.0 }
 0x7ca   :  { %v4079_v44 = vsel %vm4051_vm9, %v12482_v7, 0.0  ;;  %v12489_v35 = vpack.c.bf16 %v12479_v62, %v12482_v7 }
 0x7cb   :  { %v4080_v12 = vadd.f32 %v4079_v44, %v4078_v28 }
 0x7cc   :  { %9829 = vmatprep.subr.bf16.mxu1 %v12489_v35 }
 0x7cd   :  { %v4082_v38 = vadd.f32 %v4081_v14, %v4080_v12  ;;  %9831 = vmatpush3.bf16.msra.mxu1 %v12489_v35  ;;  %v4047_v14 = vld [vmem:[%s13025_s8 + $0x20] sm:$0xff] }
 0x7ce   :  { %9833 = vmatprep.subr.bf16.mxu1 %v12393_v54 }
 0x7cf   :  { %v4083_v11 = vrot.slane %v4082_v38, 4 }
 0x7d0   :  { %9059 = vmatmul.mubr.f32.vlgmr.msra.gmra.mrb[96].mxu1 %v4036_v4 }
 0x7d1   :  { %v4084_v61 = vadd.f32 %v4083_v11, %v4082_v38  ;;  %9835 = vmatpush3.bf16.msra.mxu1 %v12393_v54  ;;  %9061 = vmatprep.mubr.f32.mxu1 %v4037_v63 }
 0x7d2   :  { %9837 = vmatprep.subr.bf16.mxu1 %v12405_v1 }
 0x7d3   :  { %v4085_v52 = vrot.slane %v4084_v61, 2 }
 0x7d4   :  { %9062 = vmatmul.mubr.f32.gmra.mrb[98].mxu1 %v4038_v58  ;;  %v4048_v58 = vld [vmem:[%s13025_s8 + $0x28] sm:$0xff] }
 0x7d5   :  { %v4086_v43 = vadd.f32 %v4085_v52, %v4084_v61  ;;  %9839 = vmatpush3.bf16.msra.mxu1 %v12405_v1  ;;  %9064 = vmatprep.mubr.f32.mxu1 %v4039_v51  ;;  %v4049_v52 = vld [vmem:[%s13025_s8 + $0x30] sm:$0xff] }
 0x7d6   :  { %9841 = vmatprep.subr.bf16.mxu1 %v12419_v42 }
 0x7d7   :  { %v4087_v39 = vrot.slane %v4086_v43, 1 }
 0x7d8   :  { %9065 = vmatmul.mubr.f32.gmra.mrb[100].mxu1 %v4040_v41 }
 0x7d9   :  { %v4088_v54 = vadd.f32 %v4087_v39, %v4086_v43  ;;  %9843 = vmatpush3.bf16.msra.mxu1 %v12419_v42  ;;  %9067 = vmatprep.mubr.f32.mxu1 %v4041_v22 }
 0x7da   :  { %9845 = vmatprep.subr.bf16.mxu1 %v12433_v45 }
 0x7db   :  { %v12509_v5 = vmul.f32 0.0078125, %v4088_v54 }
 0x7dc   :  { %9068 = vmatmul.mubr.f32.gmra.mrb[102].mxu1 %v4042_v9  ;;  %v4050_v9 = vld [vmem:[%s13025_s8 + $0x38] sm:$0xff] }
 0x7dd   :  { %v4091_v1 = vsub.f32 %v12387_v17, %v12509_v5  ;;  %v4092_v25 = vsub.f32 %v12383_v40, %v12509_v5  ;;  %9847 = vmatpush3.bf16.msra.mxu1 %v12433_v45  ;;  %v4093_v48 = vsub.f32 %v12398_v57, %v12509_v5  ;;  %9102 = vmatprep.mubr.f32.mxu1 %v4043_v34 }
 0x7de   :  { %9849 = vmatprep.subr.bf16.mxu1 %v12447_v18  ;;  %v4094_v42 = vsub.f32 %v12395_v50, %v12509_v5  ;;  %v4095_v40 = vsub.f32 %v12412_v13, %v12509_v5  ;;  %v4096_v0 = vsub.f32 %v12409_v36, %v12509_v5  ;;  %v4097_v16 = vsub.f32 %v12426_v56, %v12509_v5 }
 0x7df   :  { %v4107_v3 = vmul.f32 %v4091_v1, %v4091_v1  ;;  %v4108_v8 = vmul.f32 %v4092_v25, %v4092_v25  ;;  %v4109_v17 = vmul.f32 %v4093_v48, %v4093_v48  ;;  %v4098_v36 = vsub.f32 %v12423_v23, %v12509_v5 }
 0x7e0   :  { %v4110_v59 = vmul.f32 %v4094_v42, %v4094_v42  ;;  %v4111_v60 = vmul.f32 %v4095_v40, %v4095_v40  ;;  %v4112_v47 = vmul.f32 %v4096_v0, %v4096_v0  ;;  %v4099_v56 = vsub.f32 %v12440_v31, %v12509_v5 }
 0x7e1   :  { %9851 = vmatpush3.bf16.msra.mxu1 %v12447_v18  ;;  %v4123_v57 = vsel %vm4051_vm9, %v4107_v3, 0.0  ;;  %v4124_v45 = vsel %vm4051_vm9, %v4108_v8, 0.0  ;;  %v4126_v13 = vsel %vm4051_vm9, %v4109_v17, 0.0  ;;  %v4113_v10 = vmul.f32 %v4097_v16, %v4097_v16 }
 0x7e2   :  { %9853 = vmatprep.subr.bf16.mxu1 %v12461_v49  ;;  %v4125_v50 = vadd.f32 %v4124_v45, %v4123_v57  ;;  %v4128_v18 = vsel %vm4051_vm9, %v4110_v59, 0.0  ;;  %v4130_v19 = vsel %vm4051_vm9, %v4111_v60, 0.0  ;;  %v4114_v23 = vmul.f32 %v4098_v36, %v4098_v36  ;;  %v4584_v45 = vld [vmem:[%s13026_s14] sm:$0xff] }
 0x7e3   :  { %v4132_v33 = vsel %vm4051_vm9, %v4112_v47, 0.0  ;;  %v4101_v31 = vsub.f32 %v12454_v27, %v12509_v5  ;;  %v4134_v37 = vsel %vm4051_vm9, %v4113_v10, 0.0  ;;  %v4103_v27 = vsub.f32 %v12468_v26, %v12509_v5 }
 0x7e4   :  { %v4127_v15 = vadd.f32 %v4126_v13, %v4125_v50  ;;  %v4136_v44 = vsel %vm4051_vm9, %v4114_v23, 0.0  ;;  %v4105_v43 = vsub.f32 %v12482_v7, %v12509_v5  ;;  %v4106_v39 = vsub.f32 %v12479_v62, %v12509_v5 }
 0x7e5   :  { %9855 = vmatpush3.bf16.msra.mxu1 %v12461_v49  ;;  %v4100_v49 = vsub.f32 %v12437_v30, %v12509_v5  ;;  %v4102_v30 = vsub.f32 %v12451_v21, %v12509_v5  ;;  %v4117_v38 = vmul.f32 %v4101_v31, %v4101_v31  ;;  %v4104_v21 = vsub.f32 %v12465_v29, %v12509_v5 }
 0x7e6   :  { %9857 = vmatprep.subr.bf16.mxu1 %v12475_v2  ;;  %v4129_v24 = vadd.f32 %v4128_v18, %v4127_v15  ;;  %v4119_v26 = vmul.f32 %v4103_v27, %v4103_v27  ;;  %v4121_v1 = vmul.f32 %v4105_v43, %v4105_v43  ;;  %v4122_v7 = vmul.f32 %v4106_v39, %v4106_v39  ;;  %v4443_v15 = vld [vmem:[%s13027_s19] sm:$0xff] }
 0x7e7   :  { %v4116_v28 = vmul.f32 %v4100_v49, %v4100_v49  ;;  %v4118_v11 = vmul.f32 %v4102_v30, %v4102_v30  ;;  %v4142_v41 = vsel %vm4051_vm9, %v4117_v38, 0.0  ;;  %v4120_v29 = vmul.f32 %v4104_v21, %v4104_v21  ;;  %9130 = vmatprep.mubr.msk.f32.mxu0 %vm1624_vm5, %v4443_v15 }
 0x7e8   :  { %v4131_v32 = vadd.f32 %v4130_v19, %v4129_v24  ;;  %v4146_v25 = vsel %vm4051_vm9, %v4119_v26, 0.0  ;;  %v4150_v8 = vsel %vm4051_vm9, %v4121_v1, 0.0  ;;  %v4152_v40 = vsel %vm4051_vm9, %v4122_v7, 0.0 }
 0x7e9   :  { %9859 = vmatpush3.bf16.msra.mxu1 %v12475_v2  ;;  %v4115_v2 = vmul.f32 %v4099_v56, %v4099_v56  ;;  %v4140_v61 = vsel %vm4051_vm9, %v4116_v28, 0.0  ;;  %v4144_v54 = vsel %vm4051_vm9, %v4118_v11, 0.0  ;;  %v4148_v42 = vsel %vm4051_vm9, %v4120_v29, 0.0 }
 0x7ea   :  { %9861 = vmatprep.subr.bf16.mxu1 %v12489_v35  ;;  %v4133_v53 = vadd.f32 %v4132_v33, %v4131_v32  ;;  %v4033_v32 = vld [vmem:[%s13028_s23] sm:$0x1]  ;;  %s13058_s23 = sld [smem:[#allocation57_spill]] }
 0x7eb   :  { %v4138_v4 = vsel %vm4051_vm9, %v4115_v2, 0.0  ;;  %v4034_v33 = vld [vmem:[%s13029_s24] sm:$0x1]  ;;  %s13059_s24 = sld [smem:[#allocation56_spill]] }
 0x7ec   :  { %v4135_v46 = vadd.f32 %v4134_v37, %v4133_v53 }
 0x7ed   :  { %9863 = vmatpush3.bf16.msra.mxu1 %v12489_v35  ;;  %v4046_v35 = vld [vmem:[%s13025_s8 + $0x18] sm:$0xff]  ;;  %s13055_s8 = sld [smem:[#allocation53_spill]] }
 0x7ee   :  { %v4137_v12 = vadd.f32 %v4136_v44, %v4135_v46 }
 0x7f0   :  { %9103 = vmatmul.mubr.f32.vlgmr.msra.gmra.mrb[104].mxu1 %v4044_v20  ;;  %v4139_v63 = vadd.f32 %v4138_v4, %v4137_v12 }
 0x7f1   :  { %9105 = vmatprep.mubr.f32.mxu1 %v4045_v55 }
 0x7f2   :  { %v4141_v51 = vadd.f32 %v4140_v61, %v4139_v63 }
 0x7f4   :  { %9106 = vmatmul.mubr.f32.gmra.mrb[106].mxu1 %v4046_v35  ;;  %v4143_v22 = vadd.f32 %v4142_v41, %v4141_v51 }
 0x7f5   :  { %9108 = vmatprep.mubr.f32.mxu1 %v4047_v14 }
 0x7f6   :  { %v4145_v34 = vadd.f32 %v4144_v54, %v4143_v22 }
 0x7f8   :  { %9109 = vmatmul.mubr.f32.gmra.mrb[108].mxu1 %v4048_v58  ;;  %v4147_v48 = vadd.f32 %v4146_v25, %v4145_v34 }
 0x7f9   :  { %9111 = vmatprep.mubr.f32.mxu1 %v4049_v52 }
 0x7fa   :  { %v4149_v3 = vadd.f32 %v4148_v42, %v4147_v48 }
 0x7fc   :  { %9112 = vmatmul.mubr.f32.gmra.mrb[110].mxu1 %v4050_v9  ;;  %v4151_v62 = vadd.f32 %v4150_v8, %v4149_v3 }
 0x7fd   :  { %9158 = vmatprep.mubr.msk.f32.mxu1 %vm1624_vm5, %v4584_v45 }
 0x7fe   :  { %v4153_v17 = vadd.f32 %v4152_v40, %v4151_v62 }
 0x800   :  { %v4154_v0 = vrot.slane %v4153_v17, 4 }
 0x802   :  { %v4155_v59 = vadd.f32 %v4154_v0, %v4153_v17 }
 0x804   :  { %v4156_v57 = vrot.slane %v4155_v59, 2 }
 0x806   :  { %v4157_v50 = vadd.f32 %v4156_v57, %v4155_v59 }
 0x808   :  { %v4158_v16 = vrot.slane %v4157_v50, 1 }
 0x80a   :  { %v4159_v60 = vadd.f32 %v4158_v16, %v4157_v50 }
 0x80c   :  { %v4160_v13 = vmul.f32 0.0078125, %v4159_v60 }
 0x80e   :  { %v4161_v36 = vadd.f32 1e-05, %v4160_v13 }
 0x810   :  { %10337 = vrsqrt.f32 %v4161_v36  ;;  %vm4164_vm10 = vcmp.eq.f32.partialorder %v4161_v36, inf  ;;  %v4167_v56 = vand.u32 2147483648, %v4161_v36  ;;  %vm4166_vm11 = vcmp.eq.f32.partialorder %v4161_v36, 0.0 }
 0x81a   :  { %v10338_v47 = vpop.eup %10337 }
 0x81b   :  { %v4163_v18 = vmul.f32 %v10338_v47, %v4161_v36 }
 0x81d   :  { %v4165_v24 = vsel %vm4164_vm10, %v4161_v36, %v4163_v18  ;;  %vm7167_vm10 = vcmask 48128  }
 0x81e   :  { %v4168_v10 = vsel %vm4166_vm11, %v4167_v56, %v4165_v24  ;;  %vm7645_vm11 = vcmask 74752  }
 0x81f   :  { %10339 = vrcp.f32 %v4168_v10 }
 0x829   :  { %v10340_v19 = vpop.eup %10339 }
 0x82a   :  { %v4170_v49 = vmul.f32 %v10340_v19, %v4033_v32 }
 0x82c   :  { %v4171_v23 = vmul.f32 %v4170_v49, %v12509_v5  ;;  %v12584_v53 = vrot.slane %v4170_v49, %v10842_v6 }
 0x82e   :  { %v4172_v20 = vsub.f32 %v4034_v33, %v4171_v23 }
 0x830   :  { %v12587_v31 = vrot.slane %v4172_v20, %v10842_v6 }
 0x8a3   :  { %v9060_v55 = vpop.f32.mrb[96].mxu1 }
 0x8a4   :  { %v4390_v2 = vmul.f32 %v9060_v55, %v12584_v53  ;;  %v4239_v37 = vpop.f32.mrb[97].mxu1 }
 0x8a5   :  { %v4389_v46 = vmul.f32 %v12584_v53, %v4239_v37 }
 0x8a6   :  { %v4404_v30 = vadd.f32 %v12587_v31, %v4390_v2 }
 0x8a7   :  { %v4403_v28 = vadd.f32 %v12587_v31, %v4389_v46  ;;  %v9063_v44 = vpop.f32.mrb[98].mxu1 }
 0x8a8   :  { %v4392_v5 = vmul.f32 %v9063_v44, %v12584_v53  ;;  %v4249_v35 = vpop.f32.mrb[99].mxu1  ;;  %v4722_v44 = vld [vmem:[%s13030_s10 + $0x8] sm:$0xff] }
 0x8a9   :  { %v4391_v12 = vmul.f32 %v12584_v53, %v4249_v35  ;;  %v4585_v35 = vld [vmem:[%s13026_s14 + $0x8] sm:$0xff] }
 0x8aa   :  { %v4406_v14 = vadd.f32 %v12587_v31, %v4392_v5 }
 0x8ab   :  { %v4405_v27 = vadd.f32 %v12587_v31, %v4391_v12  ;;  %v9066_v38 = vpop.f32.mrb[100].mxu1  ;;  %v4444_v12 = vld [vmem:[%s13027_s19 + $0x8] sm:$0xff] }
 0x8ac   :  { %v4394_v4 = vmul.f32 %v9066_v38, %v12584_v53  ;;  %v4259_v63 = vpop.f32.mrb[101].mxu1  ;;  %v4723_v38 = vld [vmem:[%s13030_s10 + $0x10] sm:$0xff] }
 0x8ad   :  { %v4393_v21 = vmul.f32 %v12584_v53, %v4259_v63  ;;  %v4587_v63 = vld [vmem:[%s13026_s14 + $0x18] sm:$0xff] }
 0x8ae   :  { %v4408_v11 = vadd.f32 %v12587_v31, %v4394_v4  ;;  %v4724_v4 = vld [vmem:[%s13030_s10 + $0x18] sm:$0xff] }
 0x8af   :  { %v4407_v61 = vadd.f32 %v12587_v31, %v4393_v21  ;;  %v9069_v58 = vpop.f32.mrb[102].mxu1  ;;  %v4446_v21 = vld [vmem:[%s13027_s19 + $0x18] sm:$0xff] }
 0x8b0   :  { %v4396_v51 = vmul.f32 %v9069_v58, %v12584_v53  ;;  %v4269_v52 = vpop.f32.mrb[103].mxu1  ;;  %v9900_v58 = vpack.c.bf16 %v4724_v4, %v4723_v38 }
 0x8b1   :  { %v4395_v43 = vmul.f32 %v12584_v53, %v4269_v52  ;;  %v4448_v52 = vld [vmem:[%s13027_s19 + $0x28] sm:$0xff] }
 0x8b2   :  { %v4410_v26 = vadd.f32 %v12587_v31, %v4396_v51  ;;  %v4589_v51 = vld [vmem:[%s13026_s14 + $0x28] sm:$0xff] }
 0x8b3   :  { %v4409_v41 = vadd.f32 %v12587_v31, %v4395_v43  ;;  %v4590_v43 = vld [vmem:[%s13026_s14 + $0x30] sm:$0xff] }
 0x8c3   :  { %v9104_v22 = vpop.f32.mrb[104].mxu1 }
 0x8c4   :  { %v4412_v39 = vmul.f32 %v9104_v22, %v12584_v53  ;;  %v4344_v29 = vpop.f32.mrb[105].mxu1  ;;  %v4450_v22 = vld [vmem:[%s13027_s19 + $0x38] sm:$0xff] }
 0x8c5   :  { %v4411_v54 = vmul.f32 %v12584_v53, %v4344_v29  ;;  %v4984_v29 = vld [vmem:[%s13031_s2 + $0x8] sm:$0xff] }
 0x8c6   :  { %v4420_v9 = vadd.f32 %v4412_v39, %v12587_v31  ;;  %v4983_v39 = vld [vmem:[%s13031_s2] sm:$0xff] }
 0x8c7   :  { %v4419_v34 = vadd.f32 %v4411_v54, %v12587_v31  ;;  %v9107_v1 = vpop.f32.mrb[106].mxu1  ;;  %v4985_v54 = vld [vmem:[%s13031_s2 + $0x10] sm:$0xff] }
 0x8c8   :  { %v4428_v25 = vmax.f32 %v4404_v30, %v4420_v9  ;;  %v4414_v48 = vmul.f32 %v9107_v1, %v12584_v53  ;;  %v4354_v7 = vpop.f32.mrb[107].mxu1  ;;  %v4986_v9 = vld [vmem:[%s13031_s2 + $0x18] sm:$0xff]  ;;  %v4988_v1 = vld [vmem:[%s13031_s2 + $0x28] sm:$0xff] }
 0x8c9   :  { %v4427_v42 = vmax.f32 %v4403_v28, %v4419_v34  ;;  %v4413_v3 = vmul.f32 %v12584_v53, %v4354_v7  ;;  %v4721_v28 = vld [vmem:[%s13030_s10] sm:$0xff]  ;;  %s13060_s10 = sld [smem:[#allocation59_spill]] }
 0x8ca   :  { %v4436_v8 = vmax.f32 %v4428_v25, 0.0  ;;  %v4422_v62 = vadd.f32 %v4414_v48, %v12587_v31  ;;  %v9896_v5 = vpack.c.bf16 %v4722_v44, %v4721_v28  ;;  %v4987_v34 = vld [vmem:[%s13031_s2 + $0x20] sm:$0xff]  ;;  %v4989_v25 = vld [vmem:[%s13031_s2 + $0x30] sm:$0xff]  ;;  %v4990_v48 = vld [vmem:[%s13031_s2 + $0x38] sm:$0xff]  ;;  %s13061_s2 = sld [smem:[#allocation58_spill]] }
 0x8cb   :  { %v4435_v40 = vmax.f32 %v4427_v42, 0.0  ;;  %v4421_v17 = vadd.f32 %v4413_v3, %v12587_v31  ;;  %v9110_v0 = vpop.f32.mrb[108].mxu1  ;;  %v4580_v7 = vld [vmem:[%s13032_s7] sm:$0xff]  ;;  %v4581_v42 = vld [vmem:[%s13032_s7 + $0x8] sm:$0xff] }
 0x8cc   :  { %v4430_v59 = vmax.f32 %v4406_v14, %v4422_v62  ;;  %v4416_v57 = vmul.f32 %v9110_v0, %v12584_v53  ;;  %v4364_v45 = vpop.f32.mrb[109].mxu1  ;;  %v4586_v14 = vld [vmem:[%s13026_s14 + $0x10] sm:$0xff]  ;;  %v9904_v3 = vpack.c.bf16 %v4581_v42, %v4580_v7  ;;  %v4583_v62 = vld [vmem:[%s13032_s7 + $0x18] sm:$0xff]  ;;  %v5264_v42 = vld [vmem:[%s13034_s15 + $0x8] sm:$0xff] }
 0x8cd   :  { %v9864_v50 = vpack.c.bf16 %v4436_v8, %v4435_v40  ;;  %v4429_v16 = vmax.f32 %v4405_v27, %v4421_v17  ;;  %v4415_v60 = vmul.f32 %v12584_v53, %v4364_v45  ;;  %v4445_v27 = vld [vmem:[%s13027_s19 + $0x10] sm:$0xff]  ;;  %v5120_v45 = vld [vmem:[%s13033_s12] sm:$0xff] }
 0x8ce   :  { %v4438_v13 = vmax.f32 %v4430_v59, 0.0  ;;  %v4424_v15 = vadd.f32 %v4416_v57, %v12587_v31  ;;  %v4582_v8 = vld [vmem:[%s13032_s7 + $0x10] sm:$0xff]  ;;  %s10517_s7 = smov [#allocation12]  }
 0x8cf   :  { %v4437_v36 = vmax.f32 %v4429_v16, 0.0  ;;  %v4423_v47 = vadd.f32 %v4415_v60, %v12587_v31  ;;  %v9113_v18 = vpop.f32.mrb[110].mxu1  ;;  %9865 = vmatprep.subr.bf16.mxu0 %v9864_v50  ;;  %9881 = vmatprep.subr.bf16.mxu1 %v9864_v50  ;;  %v9908_v59 = vpack.c.bf16 %v4583_v62, %v4582_v8 }
 0x8d0   :  { %v4432_v24 = vmax.f32 %v4408_v11, %v4424_v15  ;;  %v4418_v56 = vmul.f32 %v9113_v18, %v12584_v53  ;;  %v4374_v10 = vpop.f32.mrb[111].mxu1  ;;  %9867 = vmatpush3.bf16.msra.mxu0 %v9864_v50  ;;  %9883 = vmatpush3.bf16.msra.mxu1 %v9864_v50  ;;  %v4588_v11 = vld [vmem:[%s13026_s14 + $0x20] sm:$0xff] }
 0x8d1   :  { %v9868_v19 = vpack.c.bf16 %v4438_v13, %v4437_v36  ;;  %v4431_v32 = vmax.f32 %v4407_v61, %v4423_v47  ;;  %v4417_v49 = vmul.f32 %v12584_v53, %v4374_v10  ;;  %v4447_v61 = vld [vmem:[%s13027_s19 + $0x20] sm:$0xff] }
 0x8d2   :  { %v4440_v23 = vmax.f32 %v4432_v24, 0.0  ;;  %v4426_v33 = vadd.f32 %v4418_v56, %v12587_v31 }
 0x8d3   :  { %v4439_v20 = vmax.f32 %v4431_v32, 0.0  ;;  %v4425_v55 = vadd.f32 %v4417_v49, %v12587_v31  ;;  %9869 = vmatprep.subr.bf16.mxu0 %v9868_v19  ;;  %9885 = vmatprep.subr.bf16.mxu1 %v9868_v19 }
 0x8d4   :  { %v4434_v2 = vmax.f32 %v4410_v26, %v4426_v33  ;;  %9871 = vmatpush3.bf16.msra.mxu0 %v9868_v19  ;;  %9887 = vmatpush3.bf16.msra.mxu1 %v9868_v19  ;;  %v4449_v26 = vld [vmem:[%s13027_s19 + $0x30] sm:$0xff]  ;;  %v5123_v33 = vld [vmem:[%s13033_s12 + $0x18] sm:$0xff]  ;;  %s13057_s19 = sld [smem:[#allocation54_spill]] }
 0x8d5   :  { %v9872_v37 = vpack.c.bf16 %v4440_v23, %v4439_v20  ;;  %v4433_v46 = vmax.f32 %v4409_v41, %v4425_v55  ;;  %v4591_v41 = vld [vmem:[%s13026_s14 + $0x38] sm:$0xff]  ;;  %v5122_v23 = vld [vmem:[%s13033_s12 + $0x10] sm:$0xff]  ;;  %s13056_s14 = sld [smem:[#allocation55_spill]] }
 0x8d6   :  { %v4442_v30 = vmax.f32 %v4434_v2, 0.0  ;;  %v9932_v55 = vpack.c.bf16 %v5123_v33, %v5122_v23 }
 0x8d7   :  { %v4441_v53 = vmax.f32 %v4433_v46, 0.0  ;;  %9873 = vmatprep.subr.bf16.mxu0 %v9872_v37  ;;  %9889 = vmatprep.subr.bf16.mxu1 %v9872_v37 }
 0x8d8   :  { %9875 = vmatpush3.bf16.msra.mxu0 %v9872_v37  ;;  %9891 = vmatpush3.bf16.msra.mxu1 %v9872_v37 }
 0x8d9   :  { %v9876_v31 = vpack.c.bf16 %v4442_v30, %v4441_v53 }
 0x8db   :  { %9877 = vmatprep.subr.bf16.mxu0 %v9876_v31  ;;  %9893 = vmatprep.subr.bf16.mxu1 %v9876_v31 }
 0x8dc   :  { %9879 = vmatpush3.bf16.msra.mxu0 %v9876_v31  ;;  %9895 = vmatpush3.bf16.msra.mxu1 %v9876_v31 }
 0x8dd   :  { %9913 = vmatprep.subr.bf16.mxu1 %v9864_v50  ;;  %9897 = vmatprep.subr.bf16.mxu0 %v9896_v5 }
 0x8df   :  { %9159 = vmatmul.mubr.msk.f32.vlgmr.msra.gmra.mrb[112].mxu1 %vm1624_vm5, %v4585_v35  ;;  %9131 = vmatmul.mubr.msk.f32.vlgmr.msra.gmra.mrb[64].mxu0 %vm1624_vm5, %v4444_v12 }
 0x8e0   :  { %9915 = vmatpush3.bf16.msra.mxu1 %v9864_v50  ;;  %9161 = vmatprep.mubr.msk.f32.mxu1 %vm1624_vm5, %v4586_v14  ;;  %v5121_v50 = vld [vmem:[%s13033_s12 + $0x8] sm:$0xff]  ;;  %s7653_s12 = sshll.u32 %s10517_s7, 4  ;;  %s7654_s12 = int_to_ptr.vmem [resolvable:$true] %s7653_s12 }
 0x8e1   :  { %9917 = vmatprep.subr.bf16.mxu1 %v9868_v19  ;;  %9133 = vmatprep.mubr.msk.f32.mxu0 %vm1624_vm5, %v4445_v27  ;;  %v9928_v36 = vpack.c.bf16 %v5121_v50, %v5120_v45  ;;  %p10424_p11 = scmp.lt.s32.totalorder %s7654_s12, %s7654_s12 }
 0x8e2   :  { %9899 = vmatpush3.bf16.msra.mxu0 %v9896_v5 }
 0x8e3   :  { %9162 = vmatmul.mubr.msk.f32.gmra.mrb[114].mxu1 %vm1624_vm5, %v4587_v63  ;;  %9134 = vmatmul.mubr.msk.f32.gmra.mrb[66].mxu0 %vm1624_vm5, %v4446_v21 }
 0x8e4   :  { %9919 = vmatpush3.bf16.msra.mxu1 %v9868_v19  ;;  %9164 = vmatprep.mubr.msk.f32.mxu1 %vm1624_vm5, %v4588_v11 }
 0x8e5   :  { %9921 = vmatprep.subr.bf16.mxu1 %v9872_v37  ;;  %9136 = vmatprep.mubr.msk.f32.mxu0 %vm1624_vm5, %v4447_v61 }
 0x8e6   :  { %9901 = vmatprep.subr.bf16.mxu0 %v9900_v58 }
 0x8e7   :  { %9165 = vmatmul.mubr.msk.f32.gmra.mrb[116].mxu1 %vm1624_vm5, %v4589_v51  ;;  %9137 = vmatmul.mubr.msk.f32.gmra.mrb[68].mxu0 %vm1624_vm5, %v4448_v52 }
 0x8e8   :  { %9923 = vmatpush3.bf16.msra.mxu1 %v9872_v37  ;;  %9167 = vmatprep.mubr.msk.f32.mxu1 %vm1624_vm5, %v4590_v43 }
 0x8e9   :  { %9925 = vmatprep.subr.bf16.mxu1 %v9876_v31  ;;  %9139 = vmatprep.mubr.msk.f32.mxu0 %vm1624_vm5, %v4449_v26 }
 0x8ea   :  { %9903 = vmatpush3.bf16.msra.mxu0 %v9900_v58 }
 0x8eb   :  { %9168 = vmatmul.mubr.msk.f32.gmra.mrb[118].mxu1 %vm1624_vm5, %v4591_v41  ;;  %9140 = vmatmul.mubr.msk.f32.gmra.mrb[70].mxu0 %vm1624_vm5, %v4450_v22 }
 0x8ec   :  { %9927 = vmatpush3.bf16.msra.mxu1 %v9876_v31  ;;  %9226 = vmatprep.mubr.msk.f32.mxu1 %vm1624_vm5, %v4983_v39  ;;  %v5263_v31 = vld [vmem:[%s13034_s15] sm:$0xff] }
 0x8ed   :  { %9905 = vmatprep.subr.bf16.mxu0 %v9904_v3 }
 0x8ef   :  { %9227 = vmatmul.mubr.msk.f32.vlgmr.msra.gmra.mrb[120].mxu1 %vm1624_vm5, %v4984_v29 }
 0x8f0   :  { %9229 = vmatprep.mubr.msk.f32.mxu1 %vm1624_vm5, %v4985_v54 }
 0x8f3   :  { %9230 = vmatmul.mubr.msk.f32.gmra.mrb[122].mxu1 %vm1624_vm5, %v4986_v9 }
 0x8f4   :  { %9232 = vmatprep.mubr.msk.f32.mxu1 %vm1624_vm5, %v4987_v34 }
 0x8f7   :  { %9233 = vmatmul.mubr.msk.f32.gmra.mrb[124].mxu1 %vm1624_vm5, %v4988_v1 }
 0x8f8   :  { %9235 = vmatprep.mubr.msk.f32.mxu1 %vm1624_vm5, %v4989_v25 }
 0x8fb   :  { %9236 = vmatmul.mubr.msk.f32.gmra.mrb[126].mxu1 %vm1624_vm5, %v4990_v48 }
 0x8fc   :  { %9274 = vmatprep.mubr.msk.f32.mxu1 %vm1624_vm5, %v5263_v31 }
 0x9b2   :  { %v9160_v40 = vpop.f32.mrb[112].mxu1  ;;  %v9132_v17 = vpop.f32.mrb[64].mxu0 }
 0x9b3   :  { %v4682_v0 = vpop.f32.mrb[113].mxu1  ;;  %v4541_v57 = vpop.f32.mrb[65].mxu0 }
 0x9b4   :  { %9178 = vmatprep.mubr.msk.f32.mxu0 %vm4051_vm9, %v4682_v0 }
 0x9b5   :  { %9179 = vmatmul.mubr.msk.f32.vlgmr.msra.gmra.mrb[72].mxu0 %vm4051_vm9, %v9160_v40  ;;  %v5266_v40 = vld [vmem:[%s13034_s15 + $0x18] sm:$0xff] }
 0x9b6   :  { %v9163_v16 = vpop.f32.mrb[114].mxu1  ;;  %9907 = vmatpush3.bf16.msra.mxu0 %v9904_v3  ;;  %v9135_v60 = vpop.f32.mrb[66].mxu0  ;;  %v5265_v3 = vld [vmem:[%s13034_s15 + $0x10] sm:$0xff]  ;;  %s10419_s15 = scalar_lea.vmem %s7654_s12, 32 }
 0x9b7   :  { %v4692_v13 = vpop.f32.mrb[115].mxu1  ;;  %9909 = vmatprep.subr.bf16.mxu0 %v9908_v59  ;;  %v4551_v15 = vpop.f32.mrb[67].mxu0  ;;  %p10420_p10 = scmp.ne.s32.totalorder %s7654_s12, %s10419_s15  ;;  %p10425_p12 = scmp.lt.s32.totalorder %s10419_s15, %s10419_s15 }
 0x9b8   :  { %9181 = vmatprep.mubr.msk.f32.mxu0 %vm4051_vm9, %v4692_v13 }
 0x9b9   :  { %9182 = vmatmul.mubr.msk.f32.gmra.mrb[74].mxu0 %vm4051_vm9, %v9163_v16  ;;  %p10426_p13 = por %p10425_p12, %p10424_p11 }
 0x9ba   :  { %v9166_v47 = vpop.f32.mrb[116].mxu1  ;;  %9911 = vmatpush3.bf16.msra.mxu0 %v9908_v59  ;;  %v9138_v18 = vpop.f32.mrb[68].mxu0 }
 0x9bb   :  { %v4702_v24 = vpop.f32.mrb[117].mxu1  ;;  %v4561_v56 = vpop.f32.mrb[69].mxu0  ;;  %9929 = vmatprep.subr.bf16.mxu0 %v9928_v36  ;;  %p10427_p0 = pnand %p10426_p13, %p10420_p10 }
 0x9bc   :  { %9184 = vmatprep.mubr.msk.f32.mxu0 %vm4051_vm9, %v4702_v24 }
 0x9bd   :  { %9185 = vmatmul.mubr.msk.f32.gmra.mrb[76].mxu0 %vm4051_vm9, %v9166_v47 }
 0x9be   :  { %v9169_v10 = vpop.f32.mrb[118].mxu1  ;;  %v9141_v19 = vpop.f32.mrb[70].mxu0 }
 0x9bf   :  { %v4712_v32 = vpop.f32.mrb[119].mxu1  ;;  %v4571_v49 = vpop.f32.mrb[71].mxu0 }
 0x9c0   :  { %9187 = vmatprep.mubr.msk.f32.mxu0 %vm4051_vm9, %v4712_v32 }
 0x9c1   :  { %9188 = vmatmul.mubr.msk.f32.gmra.mrb[78].mxu0 %vm4051_vm9, %v9169_v10  ;;  %v5269_v10 = vld [vmem:[%s13035_s16 + $0x10] sm:$0xff] }
 0x9c2   :  { %9198 = vmatprep.mubr.msk.f32.mxu0 %vm4051_vm9, %v4541_v57  ;;  %v9228_v20 = vpop.f32.mrb[120].mxu1 }
 0x9c3   :  { %v5081_v2 = vpop.f32.mrb[121].mxu1 }
 0x9c5   :  { %9199 = vmatmul.mubr.msk.f32.vlgmr.msra.gmra.mrb[72].mxu0 %vm4051_vm9, %v9132_v17  ;;  %v5267_v17 = vld [vmem:[%s13035_s16] sm:$0xff] }
 0x9c6   :  { %9201 = vmatprep.mubr.msk.f32.mxu0 %vm4051_vm9, %v4551_v15  ;;  %9931 = vmatpush3.bf16.msra.mxu0 %v9928_v36  ;;  %v9231_v37 = vpop.f32.mrb[122].mxu1  ;;  %v5268_v36 = vld [vmem:[%s13035_s16 + $0x8] sm:$0xff] }
 0x9c7   :  { %9933 = vmatprep.subr.bf16.mxu0 %v9932_v55  ;;  %v5091_v46 = vpop.f32.mrb[123].mxu1 }
 0x9c9   :  { %9202 = vmatmul.mubr.msk.f32.gmra.mrb[74].mxu0 %vm4051_vm9, %v9135_v60 }
 0x9ca   :  { %9204 = vmatprep.mubr.msk.f32.mxu0 %vm4051_vm9, %v4561_v56  ;;  %9935 = vmatpush3.bf16.msra.mxu0 %v9932_v55  ;;  %v9234_v30 = vpop.f32.mrb[124].mxu1  ;;  %v5270_v55 = vld [vmem:[%s13035_s16 + $0x18] sm:$0xff] }
 0x9cb   :  { %v5101_v28 = vpop.f32.mrb[125].mxu1 }
 0x9cd   :  { %9205 = vmatmul.mubr.msk.f32.gmra.mrb[76].mxu0 %vm4051_vm9, %v9138_v18 }
 0x9ce   :  { %9207 = vmatprep.mubr.msk.f32.mxu0 %vm4051_vm9, %v4571_v49  ;;  %v9237_v44 = vpop.f32.mrb[126].mxu1 }
 0x9cf   :  { %v5111_v53 = vpop.f32.mrb[127].mxu1 }
 0x9d1   :  { %9208 = vmatmul.mubr.msk.f32.gmra.mrb[78].mxu0 %vm4051_vm9, %v9141_v19 }
 0x9d2   :  { %9246 = vmatprep.mubr.msk.f32.mxu0 %vm4051_vm9, %v5081_v2 }
 0x9d5   :  { %9247 = vmatmul.mubr.msk.f32.vlgmr.msra.gmra.mrb[72].mxu0 %vm4051_vm9, %v9228_v20 }
 0x9d6   :  { %9249 = vmatprep.mubr.msk.f32.mxu0 %vm4051_vm9, %v5091_v46 }
 0x9d9   :  { %9250 = vmatmul.mubr.msk.f32.gmra.mrb[74].mxu0 %vm4051_vm9, %v9231_v37 }
 0x9da   :  { %9252 = vmatprep.mubr.msk.f32.mxu0 %vm4051_vm9, %v5101_v28 }
 0x9dd   :  { %9253 = vmatmul.mubr.msk.f32.gmra.mrb[76].mxu0 %vm4051_vm9, %v9234_v30 }
 0x9de   :  { %9255 = vmatprep.mubr.msk.f32.mxu0 %vm4051_vm9, %v5111_v53 }
 0x9e1   :  { %9256 = vmatmul.mubr.msk.f32.gmra.mrb[78].mxu0 %vm4051_vm9, %v9237_v44 }
 0xaa8   :  { %v9248_v5 = vpop.f32.mrb[72].mxu0 }
 0xaa9   :  { %v5272_v35 = vsel %vm1624_vm5, %v9248_v5, 0.0  ;;  %v5214_v12 = vpop.f32.mrb[73].mxu0 }
 0xaaa   :  { %v5271_v14 = vsel %vm1624_vm5, %v5214_v12, 0.0  ;;  %v9936_v27 = vpack.c.bf16 %v9248_v5, %v5214_v12 }
 0xaab   :  { %v5273_v38 = vadd.f32 %v5272_v35, %v5271_v14 }
 0xaac   :  { %v9251_v4 = vpop.f32.mrb[74].mxu0  ;;  %9937 = vmatprep.subr.bf16.mxu1 %v9936_v27 }
 0xaad   :  { %v5224_v63 = vpop.f32.mrb[75].mxu0  ;;  %9939 = vmatpush3.bf16.msra.mxu1 %v9936_v27  ;;  %v5276_v58 = vsel %vm1624_vm5, %v9251_v4, 0.0 }
 0xaae   :  { %v5274_v21 = vsel %vm1624_vm5, %v5224_v63, 0.0  ;;  %v9940_v11 = vpack.c.bf16 %v9251_v4, %v5224_v63 }
 0xaaf   :  { %v5275_v61 = vadd.f32 %v5274_v21, %v5273_v38 }
 0xab0   :  { %v9254_v51 = vpop.f32.mrb[76].mxu0  ;;  %9941 = vmatprep.subr.bf16.mxu1 %v9940_v11 }
 0xab1   :  { %v5234_v52 = vpop.f32.mrb[77].mxu0  ;;  %v5277_v43 = vadd.f32 %v5276_v58, %v5275_v61  ;;  %9943 = vmatpush3.bf16.msra.mxu1 %v9940_v11  ;;  %v5280_v39 = vsel %vm1624_vm5, %v9254_v51, 0.0 }
 0xab2   :  { %v5278_v26 = vsel %vm1624_vm5, %v5234_v52, 0.0  ;;  %v9944_v41 = vpack.c.bf16 %v9254_v51, %v5234_v52 }
 0xab3   :  { %v5279_v22 = vadd.f32 %v5278_v26, %v5277_v43 }
 0xab4   :  { %v9257_v29 = vpop.f32.mrb[78].mxu0  ;;  %9945 = vmatprep.subr.bf16.mxu1 %v9944_v41 }
 0xab5   :  { %v5244_v54 = vpop.f32.mrb[79].mxu0  ;;  %v5281_v9 = vadd.f32 %v5280_v39, %v5279_v22  ;;  %9947 = vmatpush3.bf16.msra.mxu1 %v9944_v41  ;;  %v5284_v48 = vsel %vm1624_vm5, %v9257_v29, 0.0 }
 0xab6   :  { %v5282_v34 = vsel %vm1624_vm5, %v5244_v54, 0.0  ;;  %v9948_v1 = vpack.c.bf16 %v9257_v29, %v5244_v54 }
 0xab7   :  { %v5283_v25 = vadd.f32 %v5282_v34, %v5281_v9  ;;  %v5261_v34 = vld [vmem:[%s13036_s9] sm:$0x1] }
 0xab8   :  { %9949 = vmatprep.subr.bf16.mxu1 %v9948_v1 }
 0xab9   :  { %v5285_v7 = vadd.f32 %v5284_v48, %v5283_v25  ;;  %9951 = vmatpush3.bf16.msra.mxu1 %v9948_v1 }
 0xaba   :  { %9953 = vmatprep.subr.bf16.mxu1 %v9936_v27 }
 0xabb   :  { %v5286_v8 = vrot.slane %v5285_v7, 4 }
 0xabc   :  { %9275 = vmatmul.mubr.msk.f32.vlgmr.msra.gmra.mrb[128].mxu1 %vm1624_vm5, %v5264_v42  ;;  %v5574_v42 = vld [vmem:[%s13038_s0] sm:$0xff] }
 0xabd   :  { %v5287_v62 = vadd.f32 %v5286_v8, %v5285_v7  ;;  %9955 = vmatpush3.bf16.msra.mxu1 %v9936_v27  ;;  %9277 = vmatprep.mubr.msk.f32.mxu1 %vm1624_vm5, %v5265_v3  ;;  %v5683_v7 = vld [vmem:[%s13037_s20] sm:$0xff] }
 0xabe   :  { %9957 = vmatprep.subr.bf16.mxu1 %v9940_v11  ;;  %9324 = vmatprep.mubr.msk.f32.mxu0 %vm4051_vm9, %v5683_v7  ;;  %v5262_v3 = vld [vmem:[%s13039_s28] sm:$0x1]  ;;  %v5676_v7 = vld [vmem:[%s13042_s22 + $0x8] sm:$0xff] }
 0xabf   :  { %v5288_v0 = vrot.slane %v5287_v62, 2 }
 0xac0   :  { %9278 = vmatmul.mubr.msk.f32.gmra.mrb[130].mxu1 %vm1624_vm5, %v5266_v40 }
 0xac1   :  { %v5289_v59 = vadd.f32 %v5288_v0, %v5287_v62  ;;  %9959 = vmatpush3.bf16.msra.mxu1 %v9940_v11  ;;  %9296 = vmatprep.mubr.msk.f32.mxu1 %vm1624_vm5, %v5267_v17 }
 0xac2   :  { %9961 = vmatprep.subr.bf16.mxu1 %v9944_v41 }
 0xac3   :  { %v5290_v57 = vrot.slane %v5289_v59, 1 }
 0xac5   :  { %v5291_v45 = vadd.f32 %v5290_v57, %v5289_v59  ;;  %9963 = vmatpush3.bf16.msra.mxu1 %v9944_v41 }
 0xac6   :  { %9965 = vmatprep.subr.bf16.mxu1 %v9948_v1 }
 0xac7   :  { %v5293_v50 = vmul.f32 0.015625, %v5291_v45 }
 0xac9   :  { %v5294_v16 = vsub.f32 %v5214_v12, %v5293_v50  ;;  %v5295_v60 = vsub.f32 %v9248_v5, %v5293_v50  ;;  %v5296_v13 = vsub.f32 %v5224_v63, %v5293_v50  ;;  %v5297_v15 = vsub.f32 %v9251_v4, %v5293_v50  ;;  %9967 = vmatpush3.bf16.msra.mxu1 %v9948_v1 }
 0xaca   :  { %v5298_v47 = vsub.f32 %v5234_v52, %v5293_v50  ;;  %v5299_v18 = vsub.f32 %v9254_v51, %v5293_v50  ;;  %v5300_v24 = vsub.f32 %v5244_v54, %v5293_v50  ;;  %v5301_v56 = vsub.f32 %v9257_v29, %v5293_v50 }
 0xacb   :  { %v5302_v19 = vmul.f32 %v5294_v16, %v5294_v16  ;;  %v5303_v32 = vmul.f32 %v5295_v60, %v5295_v60  ;;  %v5304_v49 = vmul.f32 %v5296_v13, %v5296_v13  ;;  %v5305_v23 = vmul.f32 %v5297_v15, %v5297_v15 }
 0xacc   :  { %9297 = vmatmul.mubr.msk.f32.vlgmr.msra.gmra.mrb[132].mxu1 %vm1624_vm5, %v5268_v36  ;;  %v5306_v37 = vmul.f32 %v5298_v47, %v5298_v47  ;;  %v5307_v28 = vmul.f32 %v5299_v18, %v5299_v18  ;;  %v5308_v31 = vmul.f32 %v5300_v24, %v5300_v24  ;;  %v5309_v12 = vmul.f32 %v5301_v56, %v5301_v56 }
 0xacd   :  { %v5310_v33 = vsel %vm1624_vm5, %v5302_v19, 0.0  ;;  %v5311_v20 = vsel %vm1624_vm5, %v5303_v32, 0.0  ;;  %9299 = vmatprep.mubr.msk.f32.mxu1 %vm1624_vm5, %v5269_v10  ;;  %v5313_v46 = vsel %vm1624_vm5, %v5304_v49, 0.0  ;;  %v5315_v44 = vsel %vm1624_vm5, %v5305_v23, 0.0 }
 0xace   :  { %v5312_v2 = vadd.f32 %v5311_v20, %v5310_v33  ;;  %v5317_v5 = vsel %vm1624_vm5, %v5306_v37, 0.0  ;;  %v5319_v14 = vsel %vm1624_vm5, %v5307_v28, 0.0  ;;  %v5321_v38 = vsel %vm1624_vm5, %v5308_v31, 0.0 }
 0xacf   :  { %v5323_v63 = vsel %vm1624_vm5, %v5309_v12, 0.0  ;;  %v5785_v12 = vld [vmem:[%s13040_s11 + $0x8] sm:$0xff] }
 0xad0   :  { %v5314_v30 = vadd.f32 %v5313_v46, %v5312_v2  ;;  %9300 = vmatmul.mubr.msk.f32.gmra.mrb[134].mxu1 %vm1624_vm5, %v5270_v55 }
 0xad1   :  { %9310 = vmatprep.mubr.msk.f32.mxu1 %vm4051_vm9, %v5574_v42 }
 0xad2   :  { %v5316_v53 = vadd.f32 %v5315_v44, %v5314_v30 }
 0xad4   :  { %v5318_v35 = vadd.f32 %v5317_v5, %v5316_v53 }
 0xad6   :  { %v5320_v27 = vadd.f32 %v5319_v14, %v5318_v35  ;;  %v5784_v35 = vld [vmem:[%s13040_s11] sm:$0xff] }
 0xad8   :  { %v5322_v4 = vadd.f32 %v5321_v38, %v5320_v27  ;;  %v9984_v38 = vpack.c.bf16 %v5785_v12, %v5784_v35 }
 0xada   :  { %v5324_v21 = vadd.f32 %v5323_v63, %v5322_v4  ;;  %v5684_v4 = vld [vmem:[%s13037_s20 + $0x8] sm:$0xff] }
 0xadb   :  { %v5575_v63 = vld [vmem:[%s13038_s0 + $0x8] sm:$0xff] }
 0xadc   :  { %v5325_v11 = vrot.slane %v5324_v21, 4 }
 0xade   :  { %v5326_v61 = vadd.f32 %v5325_v11, %v5324_v21  ;;  %v5685_v21 = vld [vmem:[%s13037_s20 + $0x10] sm:$0xff] }
 0xadf   :  { %v5576_v11 = vld [vmem:[%s13038_s0 + $0x10] sm:$0xff] }
 0xae0   :  { %v5327_v58 = vrot.slane %v5326_v61, 2 }
 0xae2   :  { %v5328_v51 = vadd.f32 %v5327_v58, %v5326_v61  ;;  %v5786_v61 = vld [vmem:[%s13040_s11 + $0x10] sm:$0xff]  ;;  %v5787_v58 = vld [vmem:[%s13040_s11 + $0x18] sm:$0xff] }
 0xae4   :  { %v5329_v52 = vrot.slane %v5328_v51, 1 }
 0xae6   :  { %v5330_v43 = vadd.f32 %v5329_v52, %v5328_v51  ;;  %v5686_v51 = vld [vmem:[%s13037_s20 + $0x18] sm:$0xff] }
 0xae7   :  { %v5577_v52 = vld [vmem:[%s13038_s0 + $0x18] sm:$0xff] }
 0xae8   :  { %v5331_v26 = vmul.f32 0.015625, %v5330_v43  ;;  %v5788_v43 = vld [vmem:[%s13040_s11 + $0x20] sm:$0xff] }
 0xaea   :  { %v5332_v41 = vadd.f32 1e-05, %v5331_v26  ;;  %v5789_v26 = vld [vmem:[%s13040_s11 + $0x28] sm:$0xff] }
 0xaec   :  { %10341 = vrsqrt.f32 %v5332_v41  ;;  %vm5335_vm12 = vcmp.eq.f32.partialorder %v5332_v41, inf  ;;  %v5338_v29 = vand.u32 2147483648, %v5332_v41  ;;  %vm5337_vm13 = vcmp.eq.f32.partialorder %v5332_v41, 0.0 }
 0xaf6   :  { %v10342_v22 = vpop.eup %10341 }
 0xaf7   :  { %v5334_v39 = vmul.f32 %v10342_v22, %v5332_v41  ;;  %v9988_v22 = vpack.c.bf16 %v5787_v58, %v5786_v61 }
 0xaf9   :  { %v5336_v54 = vsel %vm5335_vm12, %v5332_v41, %v5334_v39  ;;  %v5986_v41 = vld [vmem:[%s13041_s18] sm:$0xff]  ;;  %v9992_v39 = vpack.c.bf16 %v5789_v26, %v5788_v43 }
 0xafa   :  { %v5339_v9 = vsel %vm5337_vm13, %v5338_v29, %v5336_v54  ;;  %v5987_v29 = vld [vmem:[%s13041_s18 + $0x8] sm:$0xff]  ;;  %v5790_v54 = vld [vmem:[%s13040_s11 + $0x30] sm:$0xff] }
 0xafb   :  { %10343 = vrcp.f32 %v5339_v9  ;;  %v5791_v9 = vld [vmem:[%s13040_s11 + $0x38] sm:$0xff] }
 0xb05   :  { %v10344_v1 = vpop.eup %10343 }
 0xb06   :  { %v5341_v25 = vmul.f32 %v10344_v1, %v5261_v34  ;;  %v5988_v34 = vld [vmem:[%s13041_s18 + $0x10] sm:$0xff]  ;;  %v9996_v1 = vpack.c.bf16 %v5791_v9, %v5790_v54 }
 0xb08   :  { %v5342_v48 = vmul.f32 %v5341_v25, %v5293_v50  ;;  %v5542_v62 = vrot.slane %v5341_v25, %v10842_v6  ;;  %v5989_v25 = vld [vmem:[%s13041_s18 + $0x18] sm:$0xff] }
 0xb0a   :  { %v5343_v8 = vsub.f32 %v5262_v3, %v5342_v48  ;;  %v5675_v48 = vld [vmem:[%s13042_s22] sm:$0xff]  ;;  %v5677_v3 = vld [vmem:[%s13042_s22 + $0x10] sm:$0xff] }
 0xb0b   :  { %v10000_v42 = vpack.c.bf16 %v5676_v7, %v5675_v48 }
 0xb0c   :  { %v5552_v0 = vrot.slane %v5343_v8, %v10842_v6  ;;  %v5678_v8 = vld [vmem:[%s13042_s22 + $0x18] sm:$0xff] }
 0xb8f   :  { %v9276_v40 = vpop.f32.mrb[128].mxu1 }
 0xb90   :  { %v5545_v17 = vmul.f32 %v9276_v40, %v5542_v62  ;;  %v5422_v59 = vpop.f32.mrb[129].mxu1 }
 0xb91   :  { %v5544_v57 = vmul.f32 %v5542_v62, %v5422_v59 }
 0xb92   :  { %v5555_v45 = vadd.f32 %v5552_v0, %v5545_v17 }
 0xb93   :  { %v5554_v16 = vadd.f32 %v5552_v0, %v5544_v57  ;;  %v9279_v60 = vpop.f32.mrb[130].mxu1  ;;  %v5679_v57 = vld [vmem:[%s13042_s22 + $0x20] sm:$0xff] }
 0xb94   :  { %v5547_v50 = vmul.f32 %v9279_v60, %v5542_v62  ;;  %v5432_v13 = vpop.f32.mrb[131].mxu1 }
 0xb95   :  { %v5546_v15 = vmul.f32 %v5542_v62, %v5432_v13 }
 0xb96   :  { %v5557_v36 = vadd.f32 %v5552_v0, %v5547_v50 }
 0xb97   :  { %v5556_v47 = vadd.f32 %v5552_v0, %v5546_v15 }
 0xb9f   :  { %v9298_v18 = vpop.f32.mrb[132].mxu1 }
 0xba0   :  { %v5559_v24 = vmul.f32 %v9298_v18, %v5542_v62  ;;  %v5519_v56 = vpop.f32.mrb[133].mxu1 }
 0xba1   :  { %v5558_v10 = vmul.f32 %v5542_v62, %v5519_v56 }
 0xba2   :  { %v5563_v19 = vadd.f32 %v5559_v24, %v5552_v0 }
 0xba3   :  { %v5562_v32 = vadd.f32 %v5558_v10, %v5552_v0  ;;  %v9301_v49 = vpop.f32.mrb[134].mxu1  ;;  %v6087_v10 = vld [vmem:[%s13043_s27] sm:$0xff] }
 0xba4   :  { %v5567_v23 = vmax.f32 %v5555_v45, %v5563_v19  ;;  %v5561_v33 = vmul.f32 %v9301_v49, %v5542_v62  ;;  %v5529_v20 = vpop.f32.mrb[135].mxu1  ;;  %v5680_v45 = vld [vmem:[%s13042_s22 + $0x28] sm:$0xff] }
 0xba5   :  { %v5566_v55 = vmax.f32 %v5554_v16, %v5562_v32  ;;  %v5560_v2 = vmul.f32 %v5542_v62, %v5529_v20  ;;  %v10008_v50 = vpack.c.bf16 %v5680_v45, %v5679_v57  ;;  %v6088_v19 = vld [vmem:[%s13043_s27 + $0x8] sm:$0xff]  ;;  %v6090_v20 = vld [vmem:[%s13043_s27 + $0x18] sm:$0xff] }
 0xba6   :  { %v5571_v37 = vmax.f32 %v5567_v23, 0.0  ;;  %v5565_v46 = vadd.f32 %v5561_v33, %v5552_v0  ;;  %v10024_v49 = vpack.c.bf16 %v6088_v19, %v6087_v10  ;;  %v6089_v33 = vld [vmem:[%s13043_s27 + $0x10] sm:$0xff] }
 0xba7   :  { %v5570_v30 = vmax.f32 %v5566_v55, 0.0  ;;  %v5564_v28 = vadd.f32 %v5560_v2, %v5552_v0  ;;  %v10004_v0 = vpack.c.bf16 %v5678_v8, %v5677_v3  ;;  %v10028_v55 = vpack.c.bf16 %v6090_v20, %v6089_v33  ;;  %v6091_v2 = vld [vmem:[%s13043_s27 + $0x20] sm:$0xff] }
 0xba8   :  { %v5569_v44 = vmax.f32 %v5557_v36, %v5565_v46  ;;  %v5681_v36 = vld [vmem:[%s13042_s22 + $0x30] sm:$0xff] }
 0xba9   :  { %v9968_v53 = vpack.c.bf16 %v5571_v37, %v5570_v30  ;;  %v5568_v31 = vmax.f32 %v5556_v47, %v5564_v28  ;;  %v5682_v47 = vld [vmem:[%s13042_s22 + $0x38] sm:$0xff]  ;;  %v6092_v37 = vld [vmem:[%s13043_s27 + $0x28] sm:$0xff]  ;;  %v6093_v30 = vld [vmem:[%s13043_s27 + $0x30] sm:$0xff] }
 0xbaa   :  { %v5573_v5 = vmax.f32 %v5569_v44, 0.0  ;;  %v10012_v24 = vpack.c.bf16 %v5682_v47, %v5681_v36  ;;  %v10032_v46 = vpack.c.bf16 %v6092_v37, %v6091_v2  ;;  %v6094_v28 = vld [vmem:[%s13043_s27 + $0x38] sm:$0xff]  ;;  %v6781_v2 = vld [vmem:[%s13048_s5] sm:$0xff] }
 0xbab   :  { %v5572_v14 = vmax.f32 %v5568_v31, 0.0  ;;  %9969 = vmatprep.subr.bf16.mxu1 %v9968_v53  ;;  %9977 = vmatprep.subr.bf16.mxu0 %v9968_v53  ;;  %v10036_v44 = vpack.c.bf16 %v6094_v28, %v6093_v30  ;;  %v6197_v37 = vld [vmem:[%s13049_s13] sm:$0x1] }
 0xbac   :  { %9971 = vmatpush3.bf16.msra.mxu1 %v9968_v53  ;;  %9979 = vmatpush3.bf16.msra.mxu0 %v9968_v53 }
 0xbad   :  { %v9972_v27 = vpack.c.bf16 %v5573_v5, %v5572_v14 }
 0xbaf   :  { %9973 = vmatprep.subr.bf16.mxu1 %v9972_v27  ;;  %9981 = vmatprep.subr.bf16.mxu0 %v9972_v27 }
 0xbb0   :  { %9975 = vmatpush3.bf16.msra.mxu1 %v9972_v27  ;;  %9983 = vmatpush3.bf16.msra.mxu0 %v9972_v27 }
 0xbb1   :  { %10017 = vmatprep.subr.bf16.mxu0 %v9968_v53  ;;  %9985 = vmatprep.subr.bf16.mxu1 %v9984_v38 }
 0xbb3   :  { %9325 = vmatmul.mubr.msk.f32.vlgmr.msra.gmra.mrb[80].mxu0 %vm4051_vm9, %v5684_v4  ;;  %9311 = vmatmul.mubr.msk.f32.vlgmr.msra.gmra.mrb[136].mxu1 %vm4051_vm9, %v5575_v63 }
 0xbb4   :  { %10019 = vmatpush3.bf16.msra.mxu0 %v9968_v53  ;;  %9327 = vmatprep.mubr.msk.f32.mxu0 %vm4051_vm9, %v5685_v21  ;;  %v6198_v53 = vld [vmem:[%s13044_s1] sm:$0xff] }
 0xbb5   :  { %10021 = vmatprep.subr.bf16.mxu0 %v9972_v27  ;;  %9313 = vmatprep.mubr.msk.f32.mxu1 %vm4051_vm9, %v5576_v11 }
 0xbb6   :  { %9987 = vmatpush3.bf16.msra.mxu1 %v9984_v38 }
 0xbb7   :  { %9328 = vmatmul.mubr.msk.f32.gmra.mrb[82].mxu0 %vm4051_vm9, %v5686_v51  ;;  %9314 = vmatmul.mubr.msk.f32.gmra.mrb[138].mxu1 %vm4051_vm9, %v5577_v52  ;;  %v6199_v51 = vld [vmem:[%s13044_s1 + $0x8] sm:$0xff]  ;;  %v6200_v52 = vld [vmem:[%s13045_s26] sm:$0xff] }
 0xbb8   :  { %10023 = vmatpush3.bf16.msra.mxu0 %v9972_v27  ;;  %9382 = vmatprep.mubr.msk.f32.mxu0 %vm4051_vm9, %v5986_v41 }
 0xbb9   :  { %9989 = vmatprep.subr.bf16.mxu1 %v9988_v22 }
 0xbba   :  { %9991 = vmatpush3.bf16.msra.mxu1 %v9988_v22 }
 0xbbb   :  { %9383 = vmatmul.mubr.msk.f32.vlgmr.msra.gmra.mrb[84].mxu0 %vm4051_vm9, %v5987_v29  ;;  %9993 = vmatprep.subr.bf16.mxu1 %v9992_v39 }
 0xbbc   :  { %9385 = vmatprep.mubr.msk.f32.mxu0 %vm4051_vm9, %v5988_v34 }
 0xbbe   :  { %9995 = vmatpush3.bf16.msra.mxu1 %v9992_v39  ;;  %v6201_v39 = vld [vmem:[%s13045_s26 + $0x8] sm:$0xff] }
 0xbbf   :  { %9386 = vmatmul.mubr.msk.f32.gmra.mrb[86].mxu0 %vm4051_vm9, %v5989_v25  ;;  %9997 = vmatprep.subr.bf16.mxu1 %v9996_v1 }
 0xbc0   :  { %9418 = vmatprep.mubr.msk.f32.mxu0 %vm4051_vm9, %v6198_v53 }
 0xbc2   :  { %9999 = vmatpush3.bf16.msra.mxu1 %v9996_v1 }
 0xbc3   :  { %10001 = vmatprep.subr.bf16.mxu1 %v10000_v42 }
 0xc86   :  { %v9326_v62 = vpop.f32.mrb[80].mxu0  ;;  %v9312_v40 = vpop.f32.mrb[136].mxu1 }
 0xc87   :  { %v5765_v17 = vpop.f32.mrb[81].mxu0  ;;  %v5656_v59 = vpop.f32.mrb[137].mxu1 }
 0xc88   :  { %9346 = vmatprep.mubr.msk.f32.mxu1 %vm1624_vm5, %v5765_v17 }
 0xc89   :  { %9347 = vmatmul.mubr.msk.f32.vlgmr.msra.gmra.mrb[140].mxu1 %vm1624_vm5, %v9326_v62 }
 0xc8a   :  { %10003 = vmatpush3.bf16.msra.mxu1 %v10000_v42  ;;  %v9329_v16 = vpop.f32.mrb[82].mxu0  ;;  %v9315_v60 = vpop.f32.mrb[138].mxu1 }
 0xc8b   :  { %10005 = vmatprep.subr.bf16.mxu1 %v10004_v0  ;;  %v5775_v13 = vpop.f32.mrb[83].mxu0  ;;  %v5666_v15 = vpop.f32.mrb[139].mxu1 }
 0xc8c   :  { %9349 = vmatprep.mubr.msk.f32.mxu1 %vm1624_vm5, %v5775_v13 }
 0xc8d   :  { %9350 = vmatmul.mubr.msk.f32.gmra.mrb[142].mxu1 %vm1624_vm5, %v9329_v16 }
 0xc8e   :  { %10007 = vmatpush3.bf16.msra.mxu1 %v10004_v0  ;;  %9368 = vmatprep.mubr.msk.f32.mxu1 %vm1624_vm5, %v5656_v59  ;;  %v9384_v18 = vpop.f32.mrb[84].mxu0 }
 0xc8f   :  { %10009 = vmatprep.subr.bf16.mxu1 %v10008_v50  ;;  %v6068_v56 = vpop.f32.mrb[85].mxu0 }
 0xc92   :  { %10011 = vmatpush3.bf16.msra.mxu1 %v10008_v50  ;;  %v9387_v32 = vpop.f32.mrb[86].mxu0 }
 0xc93   :  { %10013 = vmatprep.subr.bf16.mxu1 %v10012_v24  ;;  %v6078_v23 = vpop.f32.mrb[87].mxu0 }
 0xc96   :  { %10015 = vmatpush3.bf16.msra.mxu1 %v10012_v24 }
 0xc97   :  { %10025 = vmatprep.subr.bf16.mxu1 %v10024_v49 }
 0xc99   :  { %9369 = vmatmul.mubr.msk.f32.vlgmr.msra.gmra.mrb[140].mxu1 %vm1624_vm5, %v9312_v40 }
 0xc9a   :  { %10027 = vmatpush3.bf16.msra.mxu1 %v10024_v49  ;;  %9371 = vmatprep.mubr.msk.f32.mxu1 %vm1624_vm5, %v5666_v15  ;;  %v6196_v49 = vld [vmem:[%s13046_s30] sm:$0x1] }
 0xc9b   :  { %10029 = vmatprep.subr.bf16.mxu1 %v10028_v55 }
 0xc9d   :  { %9372 = vmatmul.mubr.msk.f32.gmra.mrb[142].mxu1 %vm1624_vm5, %v9315_v60 }
 0xc9e   :  { %10031 = vmatpush3.bf16.msra.mxu1 %v10028_v55  ;;  %9404 = vmatprep.mubr.msk.f32.mxu1 %vm1624_vm5, %v6068_v56  ;;  %v6437_v55 = vld [vmem:[%s13047_s6] sm:$0xff] }
 0xc9f   :  { %10033 = vmatprep.subr.bf16.mxu1 %v10032_v46 }
 0xca2   :  { %10035 = vmatpush3.bf16.msra.mxu1 %v10032_v46 }
 0xca3   :  { %10037 = vmatprep.subr.bf16.mxu1 %v10036_v44 }
 0xca6   :  { %10039 = vmatpush3.bf16.msra.mxu1 %v10036_v44 }
 0xca9   :  { %9405 = vmatmul.mubr.msk.f32.vlgmr.msra.gmra.mrb[140].mxu1 %vm1624_vm5, %v9384_v18 }
 0xcaa   :  { %9407 = vmatprep.mubr.msk.f32.mxu1 %vm1624_vm5, %v6078_v23 }
 0xcad   :  { %9408 = vmatmul.mubr.msk.f32.gmra.mrb[142].mxu1 %vm1624_vm5, %v9387_v32 }
 0xcae   :  { %9488 = vmatprep.mubr.msk.f32.mxu1 %vm2333_vm6, %v6781_v2  ;;  %v6869_v2 = vld [vmem:[%s13053_s29 + $0x28] sm:$0xff] }
 0xd7c   :  { %v9406_v31 = vpop.f32.mrb[140].mxu1 }
 0xd7d   :  { %v6203_v5 = vsel %vm1624_vm5, %v9406_v31, 0.0  ;;  %v6173_v35 = vpop.f32.mrb[141].mxu1 }
 0xd7e   :  { %v6202_v12 = vsel %vm1624_vm5, %v6173_v35, 0.0  ;;  %v10040_v14 = vpack.c.bf16 %v9406_v31, %v6173_v35 }
 0xd7f   :  { %v6204_v27 = vadd.f32 %v6203_v5, %v6202_v12 }
 0xd80   :  { %v9409_v38 = vpop.f32.mrb[142].mxu1  ;;  %10041 = vmatprep.subr.bf16.mxu0 %v10040_v14 }
 0xd81   :  { %v6183_v4 = vpop.f32.mrb[143].mxu1  ;;  %10043 = vmatpush3.bf16.msra.mxu0 %v10040_v14  ;;  %v6207_v61 = vsel %vm1624_vm5, %v9409_v38, 0.0 }
 0xd82   :  { %v6205_v63 = vsel %vm1624_vm5, %v6183_v4, 0.0  ;;  %v10044_v21 = vpack.c.bf16 %v9409_v38, %v6183_v4 }
 0xd83   :  { %v6206_v11 = vadd.f32 %v6205_v63, %v6204_v27 }
 0xd84   :  { %10045 = vmatprep.subr.bf16.mxu0 %v10044_v21 }
 0xd85   :  { %v6208_v58 = vadd.f32 %v6207_v61, %v6206_v11  ;;  %10047 = vmatpush3.bf16.msra.mxu0 %v10044_v21 }
 0xd86   :  { %10049 = vmatprep.subr.bf16.mxu0 %v10040_v14 }
 0xd87   :  { %v6209_v43 = vrot.slane %v6208_v58, 4 }
 0xd88   :  { %9419 = vmatmul.mubr.msk.f32.vlgmr.msra.gmra.mrb[88].mxu0 %vm4051_vm9, %v6199_v51 }
 0xd89   :  { %v6210_v26 = vadd.f32 %v6209_v43, %v6208_v58  ;;  %10051 = vmatpush3.bf16.msra.mxu0 %v10040_v14  ;;  %9429 = vmatprep.mubr.msk.f32.mxu0 %vm4051_vm9, %v6200_v52  ;;  %v6611_v43 = vld [vmem:[%s13050_s17] sm:$0xff] }
 0xd8a   :  { %10053 = vmatprep.subr.bf16.mxu0 %v10044_v21 }
 0xd8b   :  { %v6211_v41 = vrot.slane %v6210_v26, 2 }
 0xd8d   :  { %v6212_v22 = vadd.f32 %v6211_v41, %v6210_v26  ;;  %10055 = vmatpush3.bf16.msra.mxu0 %v10044_v21  ;;  %v6612_v26 = vld [vmem:[%s13050_s17 + $0x8] sm:$0xff] }
 0xd8e   :  { %v6438_v41 = vld [vmem:[%s13047_s6 + $0x8] sm:$0xf] }
 0xd8f   :  { %v6213_v29 = vrot.slane %v6212_v22, 1 }
 0xd90   :  { %9430 = vmatmul.mubr.msk.f32.vlgmr.msra.gmra.mrb[90].mxu0 %vm4051_vm9, %v6201_v39  ;;  %v6528_v39 = vld [vmem:[%s13051_s21] sm:$0xff]  ;;  %vm7171_vm9 = vcmask 1045504  }
 0xd91   :  { %v6214_v54 = vadd.f32 %v6213_v29, %v6212_v22  ;;  %9436 = vmatprep.mubr.msk.f32.mxu0 %vm2333_vm6, %v6437_v55  ;;  %v6782_v22 = vld [vmem:[%s13048_s5 + $0x8] sm:$0xf]  ;;  %v10064_v29 = vpack.c.bf16 %v6612_v26, %v6611_v43  ;;  %v6868_v55 = vld [vmem:[%s13053_s29 + $0x20] sm:$0xff] }
 0xd93   :  { %v6216_v9 = vmul.f32 0.03125, %v6214_v54  ;;  %v6613_v54 = vld [vmem:[%s13050_s17 + $0x10] sm:$0xff] }
 0xd95   :  { %v6217_v34 = vsub.f32 %v6173_v35, %v6216_v9  ;;  %v6218_v1 = vsub.f32 %v9406_v31, %v6216_v9  ;;  %v6219_v25 = vsub.f32 %v6183_v4, %v6216_v9  ;;  %v6220_v48 = vsub.f32 %v9409_v38, %v6216_v9 }
 0xd97   :  { %v6221_v7 = vmul.f32 %v6217_v34, %v6217_v34  ;;  %v6222_v42 = vmul.f32 %v6218_v1, %v6218_v1  ;;  %v6223_v3 = vmul.f32 %v6219_v25, %v6219_v25  ;;  %v6224_v8 = vmul.f32 %v6220_v48, %v6220_v48  ;;  %v6529_v34 = vld [vmem:[%s13051_s21 + $0x8] sm:$0xf]  ;;  %v6615_v25 = vld [vmem:[%s13050_s17 + $0x20] sm:$0xff] }
 0xd98   :  { %v6616_v48 = vld [vmem:[%s13050_s17 + $0x28] sm:$0xff] }
 0xd99   :  { %v6225_v62 = vsel %vm1624_vm5, %v6221_v7, 0.0  ;;  %v6226_v40 = vsel %vm1624_vm5, %v6222_v42, 0.0  ;;  %v6228_v0 = vsel %vm1624_vm5, %v6223_v3, 0.0  ;;  %v6230_v57 = vsel %vm1624_vm5, %v6224_v8, 0.0  ;;  %v6617_v42 = vld [vmem:[%s13050_s17 + $0x30] sm:$0xff]  ;;  %v6618_v3 = vld [vmem:[%s13050_s17 + $0x38] sm:$0xff] }
 0xd9a   :  { %v6227_v17 = vadd.f32 %v6226_v40, %v6225_v62  ;;  %v10072_v7 = vpack.c.bf16 %v6616_v48, %v6615_v25  ;;  %v10076_v8 = vpack.c.bf16 %v6618_v3, %v6617_v42  ;;  %v6520_v62 = vld [vmem:[%s13052_s25] sm:$0xff]  ;;  %v6521_v40 = vld [vmem:[%s13052_s25 + $0x8] sm:$0xff] }
 0xd9c   :  { %v6229_v59 = vadd.f32 %v6228_v0, %v6227_v17  ;;  %v10080_v17 = vpack.c.bf16 %v6521_v40, %v6520_v62 }
 0xd9e   :  { %v6231_v45 = vadd.f32 %v6230_v57, %v6229_v59 }
 0xda0   :  { %v6232_v16 = vrot.slane %v6231_v45, 4 }
 0xda2   :  { %v6233_v60 = vadd.f32 %v6232_v16, %v6231_v45  ;;  %v6522_v16 = vld [vmem:[%s13052_s25 + $0x10] sm:$0xff] }
 0xda4   :  { %v6234_v50 = vrot.slane %v6233_v60, 2 }
 0xda6   :  { %v6235_v13 = vadd.f32 %v6234_v50, %v6233_v60  ;;  %v6523_v60 = vld [vmem:[%s13052_s25 + $0x18] sm:$0xff] }
 0xda8   :  { %v6236_v15 = vrot.slane %v6235_v13, 1 }
 0xdaa   :  { %v6237_v36 = vadd.f32 %v6236_v15, %v6235_v13  ;;  %v10084_v15 = vpack.c.bf16 %v6523_v60, %v6522_v16  ;;  %v7245_v60 = vld [vmem:[%s13056_s14] sm:$0xff] }
 0xdac   :  { %v6238_v47 = vmul.f32 0.03125, %v6237_v36  ;;  %v6524_v36 = vld [vmem:[%s13052_s25 + $0x20] sm:$0xff] }
 0xdae   :  { %v6239_v18 = vadd.f32 1e-05, %v6238_v47  ;;  %v6525_v47 = vld [vmem:[%s13052_s25 + $0x28] sm:$0xff] }
 0xdb0   :  { %10345 = vrsqrt.f32 %v6239_v18  ;;  %vm6242_vm14 = vcmp.eq.f32.partialorder %v6239_v18, inf  ;;  %v6245_v10 = vand.u32 2147483648, %v6239_v18  ;;  %vm6244_vm15 = vcmp.eq.f32.partialorder %v6239_v18, 0.0 }
 0xdba   :  { %v10346_v24 = vpop.eup %10345 }
 0xdbb   :  { %v6241_v56 = vmul.f32 %v10346_v24, %v6239_v18  ;;  %v6526_v24 = vld [vmem:[%s13052_s25 + $0x30] sm:$0xff] }
 0xdbd   :  { %v6243_v19 = vsel %vm6242_vm14, %v6239_v18, %v6241_v56  ;;  %v10088_v18 = vpack.c.bf16 %v6525_v47, %v6524_v36  ;;  %v6527_v56 = vld [vmem:[%s13052_s25 + $0x38] sm:$0xff] }
 0xdbe   :  { %v6246_v32 = vsel %vm6244_vm15, %v6245_v10, %v6243_v19  ;;  %v10092_v10 = vpack.c.bf16 %v6527_v56, %v6526_v24  ;;  %v6864_v19 = vld [vmem:[%s13053_s29] sm:$0xff]  ;;  %v7248_v36 = vld [vmem:[%s13056_s14 + $0x18] sm:$0xff] }
 0xdbf   :  { %10347 = vrcp.f32 %v6246_v32  ;;  %v6865_v32 = vld [vmem:[%s13053_s29 + $0x8] sm:$0xff] }
 0xdc9   :  { %v10348_v23 = vpop.eup %10347 }
 0xdca   :  { %v6248_v33 = vmul.f32 %v10348_v23, %v6196_v49  ;;  %v10100_v49 = vpack.c.bf16 %v6865_v32, %v6864_v19  ;;  %v6866_v23 = vld [vmem:[%s13053_s29 + $0x10] sm:$0xff] }
 0xdcc   :  { %v6249_v20 = vmul.f32 %v6248_v33, %v6216_v9  ;;  %v6417_v30 = vrot.slane %v6248_v33, %v10842_v6  ;;  %v6614_v9 = vld [vmem:[%s13050_s17 + $0x18] sm:$0xff] }
 0xdcd   :  { %v10068_v1 = vpack.c.bf16 %v6614_v9, %v6613_v54  ;;  %v6867_v33 = vld [vmem:[%s13053_s29 + $0x18] sm:$0xff] }
 0xdce   :  { %v6250_v46 = vsub.f32 %v6197_v37, %v6249_v20  ;;  %v10104_v20 = vpack.c.bf16 %v6867_v33, %v6866_v23  ;;  %v10108_v37 = vpack.c.bf16 %v6869_v2, %v6868_v55 }
 0xdd0   :  { %v6425_v53 = vrot.slane %v6250_v46, %v10842_v6  ;;  %v6870_v46 = vld [vmem:[%s13053_s29 + $0x30] sm:$0xff] }
 0xe5b   :  { %v9420_v28 = vpop.f32.mrb[88].mxu0 }
 0xe5c   :  { %v6420_v44 = vmul.f32 %v9420_v28, %v6417_v30  ;;  %v6323_v31 = vpop.f32.mrb[89].mxu0 }
 0xe5d   :  { %v6419_v5 = vmul.f32 %v6417_v30, %v6323_v31 }
 0xe5e   :  { %v6428_v35 = vadd.f32 %v6425_v53, %v6420_v44  ;;  %v10513_v44 = vmov 0.0|0.0  }
 0xe5f   :  { %v6427_v12 = vadd.f32 %v6425_v53, %v6419_v5 }
 0xe63   :  { %v9431_v14 = vpop.f32.mrb[90].mxu0 }
 0xe64   :  { %v6430_v27 = vmul.f32 %v9431_v14, %v6417_v30  ;;  %v6404_v38 = vpop.f32.mrb[91].mxu0 }
 0xe65   :  { %v6429_v4 = vmul.f32 %v6417_v30, %v6404_v38  ;;  %v6871_v30 = vld [vmem:[%s13053_s29 + $0x38] sm:$0xff]  ;;  %v6957_v38 = vld [vmem:[%s13054_s3] sm:$0x3f] }
 0xe66   :  { %v6432_v63 = vadd.f32 %v6430_v27, %v6425_v53  ;;  %v10112_v28 = vpack.c.bf16 %v6871_v30, %v6870_v46  ;;  %v7166_v30 = vld [vmem:[%s13057_s19] sm:$0x3] }
 0xe67   :  { %v6431_v21 = vadd.f32 %v6429_v4, %v6425_v53  ;;  %v10515_v53 = vmov 0.0  }
 0xe68   :  { %v6434_v11 = vmax.f32 %v6428_v35, %v6432_v63 }
 0xe69   :  { %v6433_v61 = vmax.f32 %v6427_v12, %v6431_v21  ;;  %v6958_v21 = vld [vmem:[%s13055_s8] sm:$0x3f] }
 0xe6a   :  { %v6436_v58 = vmax.f32 %v6434_v11, 0.0 }
 0xe6b   :  { %v6435_v51 = vmax.f32 %v6433_v61, 0.0 }
 0xe6d   :  { %v10056_v52 = vpack.c.bf16 %v6436_v58, %v6435_v51 }
 0xe6f   :  { %10057 = vmatprep.subr.bf16.mxu0 %v10056_v52  ;;  %10097 = vmatprep.subr.bf16.mxu1 %v10056_v52 }
 0xe70   :  { %10059 = vmatpush3.bf16.msra.mxu0 %v10056_v52  ;;  %10099 = vmatpush3.bf16.msra.mxu1 %v10056_v52 }
 0xe71   :  { %10061 = vmatprep.subr.bf16.mxu0 %v10056_v52  ;;  %10116 = vmatprep.subr.bf16.mxu1 %v10513_v44 }
 0xe73   :  { %9437 = vmatmul.mubr.msk.f32.vlgmr.msra.gmra.mrb[92].mxu0 %vm2333_vm6, %v6438_v41  ;;  %9489 = vmatmul.mubr.msk.f32.vlgmr.msra.gmra.mrb[144].mxu1 %vm2333_vm6, %v6782_v22 }
 0xe74   :  { %10063 = vmatpush3.bf16.msra.mxu0 %v10056_v52  ;;  %9443 = vmatprep.mubr.msk.f32.mxu0 %vm2333_vm6, %v6528_v39 }
 0xe75   :  { %10065 = vmatprep.subr.bf16.mxu0 %v10064_v29  ;;  %9514 = vmatprep.mubr.msk.f32.mxu1 %vm10514_vm0, %v10515_v53 }
 0xe77   :  { %9444 = vmatmul.mubr.msk.f32.vlgmr.msra.gmra.mrb[94].mxu0 %vm2333_vm6, %v6529_v34  ;;  %vm6997_vm6 = vcmask 97280  }
 0xe78   :  { %10067 = vmatpush3.bf16.msra.mxu0 %v10064_v29 }
 0xe79   :  { %10069 = vmatprep.subr.bf16.mxu0 %v10068_v1 }
 0xe7c   :  { %10071 = vmatpush3.bf16.msra.mxu0 %v10068_v1 }
 0xe7d   :  { %10073 = vmatprep.subr.bf16.mxu0 %v10072_v7 }
 0xe80   :  { %10075 = vmatpush3.bf16.msra.mxu0 %v10072_v7 }
 0xe81   :  { %10077 = vmatprep.subr.bf16.mxu0 %v10076_v8 }
 0xe84   :  { %10079 = vmatpush3.bf16.msra.mxu0 %v10076_v8 }
 0xe85   :  { %10081 = vmatprep.subr.bf16.mxu0 %v10080_v17 }
 0xf46   :  { %v9438_v0 = vpop.f32.mrb[92].mxu0  ;;  %v9490_v59 = vpop.f32.mrb[144].mxu1 }
 0xf47   :  { %v6511_v57 = vpop.f32.mrb[93].mxu0  ;;  %v6855_v45 = vpop.f32.mrb[145].mxu1 }
 0xf4a   :  { %v9445_v50 = vpop.f32.mrb[94].mxu0 }
 0xf4b   :  { %v6602_v13 = vpop.f32.mrb[95].mxu0 }
 0xf4c   :  { %9462 = vmatprep.mubr.msk.f32.mxu0 %vm1624_vm5, %v6602_v13 }
 0xf4d   :  { %9463 = vmatmul.mubr.msk.f32.vlgmr.msra.gmra.mrb[96].mxu0 %vm1624_vm5, %v9445_v50  ;;  %v7246_v50 = vld [vmem:[%s13056_s14 + $0x8] sm:$0xff] }
 0xf4e   :  { %10083 = vmatpush3.bf16.msra.mxu0 %v10080_v17  ;;  %9481 = vmatprep.mubr.msk.f32.mxu0 %vm1624_vm5, %v6511_v57  ;;  %v10137_v13 = vpack.c.bf16 %v7246_v50, %v7245_v60 }
 0xf4f   :  { %10085 = vmatprep.subr.bf16.mxu0 %v10084_v15 }
 0xf52   :  { %10087 = vmatpush3.bf16.msra.mxu0 %v10084_v15  ;;  %v7247_v15 = vld [vmem:[%s13056_s14 + $0x10] sm:$0xff] }
 0xf53   :  { %10089 = vmatprep.subr.bf16.mxu0 %v10088_v18  ;;  %v10140_v47 = vpack.c.bf16 %v7248_v36, %v7247_v15 }
 0xf56   :  { %10091 = vmatpush3.bf16.msra.mxu0 %v10088_v18  ;;  %v6956_v18 = vld [vmem:[#allocation9] sm:$0x1] }
 0xf57   :  { %10093 = vmatprep.subr.bf16.mxu0 %v10092_v10 }
 0xf5a   :  { %10095 = vmatpush3.bf16.msra.mxu0 %v10092_v10 }
 0xf5b   :  { %10101 = vmatprep.subr.bf16.mxu0 %v10100_v49 }
 0xf5d   :  { %9482 = vmatmul.mubr.msk.f32.vlgmr.msra.gmra.mrb[96].mxu0 %vm1624_vm5, %v9438_v0 }
 0xf5e   :  { %10103 = vmatpush3.bf16.msra.mxu0 %v10100_v49  ;;  %9507 = vmatprep.mubr.msk.f32.mxu0 %vm1624_vm5, %v6855_v45 }
 0xf5f   :  { %10105 = vmatprep.subr.bf16.mxu0 %v10104_v20 }
 0xf62   :  { %10107 = vmatpush3.bf16.msra.mxu0 %v10104_v20 }
 0xf63   :  { %10109 = vmatprep.subr.bf16.mxu0 %v10108_v37 }
 0xf66   :  { %10111 = vmatpush3.bf16.msra.mxu0 %v10108_v37 }
 0xf67   :  { %10113 = vmatprep.subr.bf16.mxu0 %v10112_v28 }
 0xf6a   :  { %10115 = vmatpush3.bf16.msra.mxu0 %v10112_v28  ;;  %v7327_v28 = vld [vmem:[%s13058_s23] sm:$0xff] }
 0xf6b   :  { %10136 = vmatprep.subr.bf16.mxu0 %v10513_v44 }
 0xf6d   :  { %9508 = vmatmul.mubr.msk.f32.vlgmr.msra.gmra.mrb[96].mxu0 %vm1624_vm5, %v9490_v59  ;;  %v6955_v59 = vld [vmem:[#allocation6] sm:$0x1] }
 0xf6e   :  { %9569 = vmatprep.mubr.msk.f32.mxu0 %vm10514_vm0, %v10515_v53  ;;  %10138 = vmatpush3.bf16.msra.mxu0 %v10137_v13  ;;  %v7946_v13 = vld [vmem:[#allocation11] ss:$0 sm:$0xff] }
 0xf6f   :  { %10139 = vmatprep.subr.bf16.mxu0 %v10513_v44 }
 0xf72   :  { %10141 = vmatpush3.bf16.msra.mxu0 %v10140_v47 }
 0xf73   :  { %10142 = vmatprep.subr.bf16.mxu0 %v10513_v44 }
0x1040   :  { %v9509_v31 = vpop.f32.mrb[96].mxu0 }
0x1041   :  { %v6961_v5 = vsel %vm6960_vm1, %v9509_v31, 0.0  ;;  %v6944_v35 = vpop.f32.mrb[97].mxu0 }
0x1042   :  { %v6959_v12 = vsel %vm1624_vm5, %v6944_v35, 0.0  ;;  %v10117_v14 = vpack.c.bf16 %v9509_v31, %v6944_v35 }
0x1043   :  { %v6962_v27 = vadd.f32 %v6961_v5, %v6959_v12  ;;  %v7330_v12 = vld [vmem:[%s13058_s23 + $0x18] sm:$0xff] }
0x1044   :  { %10119 = vmatpush3.bf16.msk.msra.mxu1 %vm10118_vm4, %v10117_v14 }
0x1045   :  { %v6963_v4 = vrot.slane %v6962_v27, 4  ;;  %10120 = vmatprep.subr.bf16.mxu1 %v10513_v44 }
0x1047   :  { %v6964_v63 = vadd.f32 %v6963_v4, %v6962_v27  ;;  %9515 = vmatmul.mubr.msk.f32.vlgmr.msra.gmra.mrb[146].mxu1 %vm6997_vm6, %v6957_v38  ;;  %v7331_v27 = vld [vmem:[%s13058_s23 + $0x20] sm:$0xff]  ;;  %v7332_v38 = vld [vmem:[%s13058_s23 + $0x28] sm:$0xff] }
0x1048   :  { %10123 = vmatpush3.bf16.msk.msra.mxu1 %vm10118_vm4, %v10117_v14  ;;  %9521 = vmatprep.mubr.msk.f32.mxu1 %vm10514_vm0, %v10515_v53  ;;  %v10131_v4 = vpack.c.bf16 %v7332_v38, %v7331_v27 }
0x1049   :  { %v6965_v11 = vrot.slane %v6964_v63, 2  ;;  %9524 = vmatprep.subr.mxu1 %v10515_v53 }
0x104b   :  { %v6966_v61 = vadd.f32 %v6965_v11, %v6964_v63  ;;  %9522 = vmatmul.mubr.msk.f32.vlgmr.msra.gmra.mrb[148].mxu1 %vm6997_vm6, %v6958_v21  ;;  %v7333_v63 = vld [vmem:[%s13058_s23 + $0x30] sm:$0xff]  ;;  %v7334_v21 = vld [vmem:[%s13058_s23 + $0x38] sm:$0xff] }
0x104c   :  { %9526 = vmatprep.mubr.msk.f32.mxu1 %vm10514_vm0, %v10515_v53  ;;  %v10134_v11 = vpack.c.bf16 %v7334_v21, %v7333_v63 }
0x104d   :  { %v6967_v58 = vrot.slane %v6966_v61, 1 }
0x104f   :  { %v6968_v51 = vadd.f32 %v6967_v58, %v6966_v61  ;;  %v7249_v61 = vld [vmem:[%s13056_s14 + $0x20] sm:$0xff]  ;;  %v7250_v58 = vld [vmem:[%s13056_s14 + $0x28] sm:$0xff] }
0x1051   :  { %v6970_v52 = vmul.f32 0.083333336, %v6968_v51  ;;  %v10143_v51 = vpack.c.bf16 %v7250_v58, %v7249_v61 }
0x1053   :  { %v6971_v43 = vsub.f32 %v6944_v35, %v6970_v52  ;;  %v6972_v26 = vsub.f32 %v9509_v31, %v6970_v52  ;;  %v7328_v31 = vld [vmem:[%s13058_s23 + $0x8] sm:$0xff]  ;;  %v7329_v35 = vld [vmem:[%s13058_s23 + $0x10] sm:$0xff]  ;;  %10144 = vmatpush3.bf16.msra.mxu0 %v10143_v51 }
0x1054   :  { %v10125_v5 = vpack.c.bf16 %v7328_v31, %v7327_v28  ;;  %v10128_v14 = vpack.c.bf16 %v7330_v12, %v7329_v35  ;;  %10145 = vmatprep.subr.bf16.mxu0 %v10513_v44 }
0x1055   :  { %v6973_v41 = vmul.f32 %v6971_v43, %v6971_v43  ;;  %v6974_v22 = vmul.f32 %v6972_v26, %v6972_v26  ;;  %v7252_v43 = vld [vmem:[%s13056_s14 + $0x38] sm:$0xff] }
0x1057   :  { %v6975_v39 = vsel %vm1624_vm5, %v6973_v41, 0.0  ;;  %v6976_v29 = vsel %vm6960_vm1, %v6974_v22, 0.0 }
0x1058   :  { %v6977_v54 = vadd.f32 %v6976_v29, %v6975_v39  ;;  %v7555_v39 = vld [vmem:[%s13060_s10] sm:$0xff]  ;;  %v7556_v29 = vld [vmem:[%s13060_s10 + $0x8] sm:$0xff] }
0x105a   :  { %v6978_v9 = vrot.slane %v6977_v54, 4 }
0x105c   :  { %v6979_v34 = vadd.f32 %v6978_v9, %v6977_v54 }
0x105e   :  { %v6980_v1 = vrot.slane %v6979_v34, 2 }
0x1060   :  { %v6981_v25 = vadd.f32 %v6980_v1, %v6979_v34  ;;  %v7481_v34 = vld [vmem:[%s13061_s2] sm:$0x3]  ;;  %v10149_v1 = vpack.c.bf16 %v7556_v29, %v7555_v39 }
0x1062   :  { %v6982_v48 = vrot.slane %v6981_v25, 1 }
0x1064   :  { %v6983_v7 = vadd.f32 %v6982_v48, %v6981_v25  ;;  %v7557_v25 = vld [vmem:[%s13060_s10 + $0x10] sm:$0xff]  ;;  %v7558_v48 = vld [vmem:[%s13060_s10 + $0x18] sm:$0xff] }
0x1066   :  { %v6984_v42 = vmul.f32 0.083333336, %v6983_v7  ;;  %v10152_v7 = vpack.c.bf16 %v7558_v48, %v7557_v25 }
0x1068   :  { %v6985_v3 = vadd.f32 1e-05, %v6984_v42  ;;  %v7559_v42 = vld [vmem:[%s13060_s10 + $0x20] sm:$0xff] }
0x106a   :  { %10349 = vrsqrt.f32 %v6985_v3  ;;  %vm6988_vm7 = vcmp.eq.f32.partialorder %v6985_v3, inf  ;;  %v6991_v40 = vand.u32 2147483648, %v6985_v3  ;;  %vm6990_vm8 = vcmp.eq.f32.partialorder %v6985_v3, 0.0 }
0x1074   :  { %v10350_v8 = vpop.eup %10349 }
0x1075   :  { %v6987_v62 = vmul.f32 %v10350_v8, %v6985_v3 }
0x1077   :  { %v6989_v17 = vsel %vm6988_vm7, %v6985_v3, %v6987_v62  ;;  %v7560_v3 = vld [vmem:[%s13060_s10 + $0x28] sm:$0xff]  ;;  %v7561_v62 = vld [vmem:[%s13060_s10 + $0x30] sm:$0xff] }
0x1078   :  { %v6992_v0 = vsel %vm6990_vm8, %v6991_v40, %v6989_v17  ;;  %v10155_v8 = vpack.c.bf16 %v7560_v3, %v7559_v42  ;;  %v7562_v40 = vld [vmem:[%s13060_s10 + $0x38] sm:$0xff] }
0x1079   :  { %10351 = vrcp.f32 %v6992_v0  ;;  %v10158_v17 = vpack.c.bf16 %v7562_v40, %v7561_v62 }
0x1083   :  { %v10352_v57 = vpop.eup %10351 }
0x1084   :  { %v6994_v45 = vmul.f32 %v10352_v57, %v6955_v59 }
0x1086   :  { %v6995_v16 = vmul.f32 %v6994_v45, %v6970_v52  ;;  %v7152_v56 = vrot.slane %v6994_v45, %v10842_v6  ;;  %v7251_v52 = vld [vmem:[%s13056_s14 + $0x30] sm:$0xff] }
0x1087   :  { %v10146_v26 = vpack.c.bf16 %v7252_v43, %v7251_v52 }
0x1088   :  { %v6996_v24 = vsub.f32 %v6956_v18, %v6995_v16 }
0x1089   :  { %10147 = vmatpush3.bf16.msra.mxu0 %v10146_v26 }
0x108a   :  { %v7159_v32 = vrot.slane %v6996_v24, %v10842_v6  ;;  %v7253_v6 = vld [vmem:[%s13059_s24] sm:$0x3] }
0x111a   :  { %v7071_v10 = vpop.f32.mrb[146].mxu1 }
0x111b   :  { %v7154_v19 = vmul.f32 %v7152_v56, %v7071_v10  ;;  %v9516_v49 = vpop.f32.mrb[147].mxu1 }
0x111d   :  { %v7161_v23 = vadd.f32 %v7159_v32, %v7154_v19 }
0x111e   :  { %v7144_v33 = vpop.f32.mrb[148].mxu1 }
0x111f   :  { %v7162_v20 = vmul.f32 %v7152_v56, %v7144_v33  ;;  %v9523_v55 = vpop.f32.mrb[149].mxu1 }
0x1121   :  { %v7163_v2 = vadd.f32 %v7162_v20, %v7159_v32 }
0x1123   :  { %v7164_v37 = vmax.f32 %v7161_v23, %v7163_v2 }
0x1125   :  { %v7165_v46 = vmax.f32 %v7164_v37, 0.0 }
0x1127   :  { %9525 = vmatpush3.msk.msra.mxu1 %vm7171_vm9, %v7165_v46 }
0x1128   :  { %9527 = vmatmul.mubr.msk.f32.vlgmr.msra.gmra.mrb[150].mxu1 %vm7167_vm10, %v7166_v30  ;;  %9529 = vmatprep.subr.mxu1 %v10515_v53 }
0x1129   :  { %9530 = vmatpush3.msk.msra.mxu1 %vm7171_vm9, %v7165_v46  ;;  %9531 = vmatprep.mubr.msk.f32.mxu1 %vm10514_vm0, %v10515_v53 }
0x112a   :  { %10124 = vmatprep.subr.bf16.mxu1 %v10513_v44 }
0x112c   :  { %9532 = vmatmul.mubr.msk.f32.vlgmr.msra.gmra.mrb[152].mxu1 %vm7167_vm10, %v7253_v6 }
0x112d   :  { %10126 = vmatpush3.bf16.msra.mxu1 %v10125_v5  ;;  %9550 = vmatprep.mubr.msk.f32.mxu1 %vm10514_vm0, %v10515_v53 }
0x112e   :  { %10127 = vmatprep.subr.bf16.mxu1 %v10513_v44 }
0x1131   :  { %10129 = vmatpush3.bf16.msra.mxu1 %v10128_v14 }
0x1132   :  { %10130 = vmatprep.subr.bf16.mxu1 %v10513_v44 }
0x1135   :  { %10132 = vmatpush3.bf16.msra.mxu1 %v10131_v4 }
0x1136   :  { %10133 = vmatprep.subr.bf16.mxu1 %v10513_v44 }
0x1139   :  { %10135 = vmatpush3.bf16.msra.mxu1 %v10134_v11 }
0x113a   :  { %9572 = vmatprep.subr.mxu1 %v10515_v53 }
0x11fb   :  { %v7241_v41 = vpop.f32.mrb[150].mxu1 }
0x11fc   :  { %v9528_v22 = vpop.f32.mrb[151].mxu1  ;;  %9570 = vmatmul.mubr.msk.f32.vlgmr.msra.gmra.mrb[98].mxu0 %vm1624_vm5, %v7241_v41 }
0x11ff   :  { %v7323_v54 = vpop.f32.mrb[152].mxu1 }
0x1200   :  { %9551 = vmatmul.mubr.msk.f32.vlgmr.msra.gmra.mrb[154].mxu1 %vm1624_vm5, %v7323_v54  ;;  %v9533_v9 = vpop.f32.mrb[153].mxu1 }
0x1201   :  { %9573 = vmatpush3.msk.msra.mxu1 %vm7171_vm9, %v7165_v46  ;;  %9574 = vmatprep.mubr.msk.f32.mxu1 %vm10514_vm0, %v10515_v53 }
0x1202   :  { %10148 = vmatprep.subr.bf16.mxu1 %v10513_v44 }
0x1204   :  { %9575 = vmatmul.mubr.msk.f32.vlgmr.msra.gmra.mrb[156].mxu1 %vm7167_vm10, %v7481_v34 }
0x1205   :  { %10150 = vmatpush3.bf16.msra.mxu1 %v10149_v1  ;;  %9593 = vmatprep.mubr.msk.f32.mxu1 %vm10514_vm0, %v10515_v53 }
0x1206   :  { %10151 = vmatprep.subr.bf16.mxu1 %v10513_v44 }
0x1209   :  { %10153 = vmatpush3.bf16.msra.mxu1 %v10152_v7 }
0x120a   :  { %10154 = vmatprep.subr.bf16.mxu1 %v10513_v44 }
0x120d   :  { %10156 = vmatpush3.bf16.msra.mxu1 %v10155_v8 }
0x120e   :  { %10157 = vmatprep.subr.bf16.mxu1 %v10513_v44 }
0x1211   :  { %10159 = vmatpush3.bf16.msra.mxu1 %v10158_v17 }
0x12cf   :  { %v7477_v0 = vpop.f32.mrb[98].mxu0 }
0x12d0   :  { %v9571_v59 = vpop.f32.mrb[99].mxu0 }
0x12d3   :  { %v7404_v57 = vpop.f32.mrb[154].mxu1 }
0x12d4   :  { %v9552_v45 = vpop.f32.mrb[155].mxu1  ;;  %v7478_v53 = vadd.f32 %v7477_v0, %v7404_v57 }
0x12d7   :  { %v7551_v16 = vpop.f32.mrb[156].mxu1 }
0x12d8   :  { %9594 = vmatmul.mubr.msk.f32.vlgmr.msra.gmra.mrb[158].mxu1 %vm1624_vm5, %v7551_v16  ;;  %v9576_v60 = vpop.f32.mrb[157].mxu1 }
0x13ab   :  { %v7632_v50 = vpop.f32.mrb[158].mxu1 }
0x13ac   :  { %v7636_v15 = vadd.f32 %v7632_v50, %v7478_v53  ;;  %v9595_v36 = vpop.f32.mrb[159].mxu1 }
0x13ae   :  { %v7644_v44 = vadd.f32 %v7946_v13, %v7636_v15 }
0x13b0   :  { %7646 = vst.msk [vmem:[#allocation12] sm:$0x3] %vm7645_vm11, %v7644_v44 }
0x13b1   :  { %10430 = shalt.err (!%p10427_p0)
}
0x13b2   :  { %s10431_s16 = scalar_lea.hbm %s10819_s4, 32 }
0x13b3   :  { %p10432_p1 = scmp.ne.s32.totalorder %s10819_s4, %s10431_s16  ;;  %p10435_p2 = scmp.lt.u32.totalorder %s10431_s16, %s10819_s4 }
0x13b5   :  { %p10437_p3 = pnand %p10435_p2, %p10432_p1 }
0x13b7   :  { %10440 = shalt.err (!%p10437_p3)
}
0x13b8   :  { %7656 = dma.vmem_to_hbm [thread:$0]  %s7654_s12, 32, %s10819_s4, [#allocation8]  }
0x13b9   :  { %10445 = dma.done.wait [#allocation8], 32  }
0x13ba   :  { %10446 = vsyncadd [#allocation8], 4294967264 }
0x13bb   :  { %7660 = vsyncpa [#allocation7], 1 }
0x13bc   :  { %7661 = vsyncpa [#allocation10], 1 }
0x13bd   :  { %7662 = vsyncpa [#allocation8], 1 }

</bundles_post_ra>
